<compile_context>
chip_gen: v5e
topology: v5e:2x2
jax: 0.10.0
libtpu: 0.0.40
codegen_flags: <defaults>
</compile_context>

<pallas_src>
import numpy as np
import jax
import jax.numpy as jnp
from jax.experimental import pallas as pl
from jax.experimental.pallas import tpu as pltpu


# MXU operand dtype (weights are stored / DMA'd in this dtype and activations
# are cast to it right before each jnp.dot).  Accumulation is always float32.
MXU_DTYPE = jnp.bfloat16


# ----------------------------------------------------------------------------
# Parameters (deterministic init, torch layouts)
# ----------------------------------------------------------------------------
def _init(key, shape, scale=0.1):
    return scale * jax.random.normal(key, shape, dtype=jnp.float32)


def make_params(cfg, key):
    ks = iter(jax.random.split(key, 64))
    C1 = cfg["seq2img_img_channels"]
    hw = list(cfg["hidden_width"])
    p = {}

    # Seq2ImgEncoder: 1D conv stack in_channel -> C1 -> ... -> C1 (ReLU)
    enc1d = []
    cin = cfg["in_channel"]
    for _ in range(cfg["seq2img_num_layers"]):
        enc1d.append((_init(next(ks), (C1, cin, 3)), _init(next(ks), (C1,))))
        cin = C1
    p["enc1d"] = enc1d

    # Img2LatentEncoder: 2D conv stack 1 -> hw[0] -> ... -> hw[-1] (ReLU)
    # TODO(synk): config.in_width unused — reference Img2LatentEncoder arch
    # (striding/pooling) is not available, so spatial dims are preserved.
    enc2d = []
    cin = 1
    for cout in hw:
        enc2d.append((_init(next(ks), (cout, cin, 3, 3)), _init(next(ks), (cout,))))
        cin = cout
    p["enc2d"] = enc2d

    # latent_encoder: 1x1 conv hw[-1] -> hw[-1]
    p["lat_enc"] = (_init(next(ks), (hw[-1], hw[-1], 1, 1)), _init(next(ks), (hw[-1],)))
    # latent_decoder: 1x1 conv hw[-1]//2 -> hw[-1]
    p["lat_dec"] = (_init(next(ks), (hw[-1], hw[-1] // 2, 1, 1)), _init(next(ks), (hw[-1],)))

    # Latent2ImgDecoder: hidden_width reversed + [1]
    dec_widths = list(reversed(hw)) + [1]
    dec2d = []
    for cin_, cout in zip(dec_widths[:-1], dec_widths[1:]):
        dec2d.append((_init(next(ks), (cout, cin_, 3, 3)), _init(next(ks), (cout,))))
    p["dec2d"] = dec2d

    # Img2SeqDecoder: 1D conv stack C1 -> ... -> C1 -> in_channel
    dec1d = []
    cin = C1
    for layer in range(cfg["seq2img_num_layers"]):
        cout = cfg["in_channel"] if layer == cfg["seq2img_num_layers"] - 1 else C1
        dec1d.append((_init(next(ks), (cout, cin, 3)), _init(next(ks), (cout,))))
        cin = cout
    p["dec1d"] = dec1d
    return p


# ----------------------------------------------------------------------------
# Host-side weight packing (done once): turn every conv into row-shifted GEMMs
# on the channel-major packed layout  row = s (sequence/height),
# lane = channel * W_img + w  (W_img = image width = seq2img_img_channels).
# ----------------------------------------------------------------------------
def _pack_conv1d(w):
    # torch Conv1d weight [Cout, Cin, 3] -> per-tap GEMM matrices [3, Cin, Cout]
    return jnp.transpose(w, (2, 1, 0))


def _pack_conv2d(w, wimg):
    # torch Conv2d weight [Cout, Cin, 3, 3] -> 3 per-height-tap GEMM matrices
    # acting on the packed layout [S, Cin*wimg] -> [S, Cout*wimg].  The kw taps
    # and the width-boundary zero padding are folded into the (block-banded)
    # matrix, so the kernel only needs height (row) shifts.
    cout, cin, kh_, kw_ = w.shape
    sel = np.stack([np.eye(wimg, k=1 - k, dtype=np.float32) for k in range(kw_)])
    m = jnp.einsum("ochk,kij->hcioj", w, jnp.asarray(sel))
    return m.reshape(kh_, cin * wimg, cout * wimg)


def _pack_conv1x1(w, wimg):
    # torch 1x1 Conv2d weight [Cout, Cin, 1, 1] -> block-diagonal GEMM matrix
    cout, cin = w.shape[:2]
    eye = jnp.eye(wimg, dtype=jnp.float32)
    m = jnp.einsum("oc,ij->cioj", w[:, :, 0, 0], eye)
    return m.reshape(cin * wimg, cout * wimg)


def _pack_bias2d(b, wimg):
    # lane = c*wimg + w  ->  bias value repeats wimg times per channel
    return jnp.repeat(b, wimg).reshape(1, -1)


def pack_params(params, cfg):
    wimg = cfg["seq2img_img_channels"]
    packed = []
    for w, b in params["enc1d"]:
        packed.append((_pack_conv1d(w), b.reshape(1, -1)))
    for w, b in params["enc2d"]:
        packed.append((_pack_conv2d(w, wimg), _pack_bias2d(b, wimg)))
    w, b = params["lat_enc"]
    packed.append((_pack_conv1x1(w, wimg), _pack_bias2d(b, wimg)))
    w, b = params["lat_dec"]
    packed.append((_pack_conv1x1(w, wimg), _pack_bias2d(b, wimg)))
    for w, b in params["dec2d"]:
        packed.append((_pack_conv2d(w, wimg), _pack_bias2d(b, wimg)))
    for w, b in params["dec1d"]:
        packed.append((_pack_conv1d(w), b.reshape(1, -1)))
    # MXU operands in MXU_DTYPE, biases stay f32 (added post-accumulation).
    return [(w.astype(MXU_DTYPE), b.astype(jnp.float32)) for w, b in packed]


# ----------------------------------------------------------------------------
# Fused forward
# ----------------------------------------------------------------------------
def vae_forward(packed, cfg, x, eps):
    """x: [B, S, in_channel] f32, eps: [B, S, (hw[-1]//2)*C1] f32 (packed)."""
    B, S, Cin = x.shape
    C1 = cfg["seq2img_img_channels"]
    hw = list(cfg["hidden_width"])
    n1d = cfg["seq2img_num_layers"]
    n2d = len(hw)
    half = hw[-1] // 2
    halfp = half * C1            # packed lane width of mean / logvar / z (=128)

    # Static layer plan, aligned with `packed`:  kind in {"tap", "mm"}.
    plan = [("tap", "relu")] * n1d                                  # Seq2ImgEncoder
    plan += [("tap", "relu")] * n2d                                 # Img2LatentEncoder
    plan += [("mm", "none")]                                        # latent_encoder
    reparam_after = len(plan) - 1
    plan += [("mm", "none")]                                        # latent_decoder
    plan += [("tap", "relu")] * (n2d - 1) + [("tap", "tanh")]       # Latent2ImgDecoder (+tanh)
    plan += [("tap", "relu")] * (n1d - 1) + [("tap", "none")]       # Img2SeqDecoder
    assert len(plan) == len(packed)
    n_layers = len(packed)

    pad_width = max(w.shape[1] for (w, _), (kind, _) in zip(packed, plan)
                    if kind == "tap")

    def kernel(*refs):
        x_ref, eps_ref = refs[0], refs[1]
        wrefs = refs[2:2 + 2 * n_layers]
        recon_ref = refs[2 + 2 * n_layers]
        mom_ref = refs[3 + 2 * n_layers]
        pad_ref = refs[4 + 2 * n_layers]      # VMEM scratch [S+2, pad_width] f32

        def act_fn(a, act):
            if act == "relu":
                return jnp.maximum(a, 0.0)
            if act == "tanh":
                return jnp.tanh(a)
            return a

        # Zero the two halo rows once; activations always go to rows [1, S+1),
        # so the halo rows stay zero for every conv layer of this grid step.
        zrow = jnp.zeros((1, pad_width), jnp.float32)
        pad_ref[0:1, :] = zrow
        pad_ref[S + 1:S + 2, :] = zrow

        def tap_conv(h, w_ref, b_ref, act):
            # k=3 / padding=1 conv along the sequence axis as 3 row-shifted
            # GEMMs on the zero-padded VMEM scratch (no im2col, no HBM).
            kin = h.shape[1]
            pad_ref[1:S + 1, :kin] = h
            acc = jnp.dot(pad_ref[0:S, :kin].astype(w_ref.dtype), w_ref[0],
                          preferred_element_type=jnp.float32)
            for k in (1, 2):
                acc = acc + jnp.dot(pad_ref[k:k + S, :kin].astype(w_ref.dtype),
                                    w_ref[k],
                                    preferred_element_type=jnp.float32)
            return act_fn(acc + b_ref[...], act)

        def mm_layer(h, w_ref, b_ref, act):
            acc = jnp.dot(h.astype(w_ref.dtype), w_ref[...],
                          preferred_element_type=jnp.float32)
            return act_fn(acc + b_ref[...], act)

        h = x_ref[0]                                   # [S, Cin] f32
        for li, (kind, act) in enumerate(plan):
            w_ref, b_ref = wrefs[2 * li], wrefs[2 * li + 1]
            if kind == "tap":
                h = tap_conv(h, w_ref, b_ref, act)
            else:
                h = mm_layer(h, w_ref, b_ref, act)
            if li == reparam_after:
                # torch.chunk along channels == aligned 128-lane split here.
                mean = h[:, :halfp]
                logvar = jnp.clip(h[:, halfp:], -30.0, 20.0)
                mom_ref[0, :, :halfp] = mean            # lane-dense 256-wide slab
                mom_ref[0, :, halfp:] = logvar
                # z = mean + exp(0.5*logvar) * eps   (all elementwise math f32)
                h = mean + jnp.exp(0.5 * logvar) * eps_ref[0]
        recon_ref[0] = h.astype(recon_ref.dtype)

    def _const_map(nd):
        return lambda b: (0,) * nd

    in_specs = [pl.BlockSpec((1, S, Cin), lambda b: (b, 0, 0)),
                pl.BlockSpec((1, S, halfp), lambda b: (b, 0, 0))]
    flat_w = []
    for w, bvec in packed:
        in_specs.append(pl.BlockSpec(w.shape, _const_map(w.ndim)))
        in_specs.append(pl.BlockSpec(bvec.shape, _const_map(bvec.ndim)))
        flat_w += [w, bvec]

    recon, moments = pl.pallas_call(
        kernel,
        out_shape=(jax.ShapeDtypeStruct((B, S, Cin), jnp.float32),
                   jax.ShapeDtypeStruct((B, S, 2 * halfp), jnp.float32)),
        grid=(B,),
        in_specs=in_specs,
        out_specs=(pl.BlockSpec((1, S, Cin), lambda b: (b, 0, 0)),
                   pl.BlockSpec((1, S, 2 * halfp), lambda b: (b, 0, 0))),
        scratch_shapes=[pltpu.VMEM((S + 2, pad_width), jnp.float32)],
        compiler_params=pltpu.CompilerParams(
            dimension_semantics=("parallel",)),   # megacore: batch across TCs
    )(x, eps, *flat_w)

    # Un-pack the channel-major latent layout (lane = c*C1 + w) back to the
    # NHWC [B, S(=H), C1(=W), half] layout of the reference reconstruction.
    mean_p, logvar_p = moments[..., :halfp], moments[..., halfp:]
    mu = jnp.transpose(mean_p.reshape(B, S, half, C1), (0, 1, 3, 2))
    logvar = jnp.transpose(logvar_p.reshape(B, S, half, C1), (0, 1, 3, 2))
    return recon, mu, logvar


# ----------------------------------------------------------------------------
# main
# ----------------------------------------------------------------------------
if __name__ == "__main__":
    cfg = dict(
        in_channel=5,
        seq2img_img_channels=8,
        seq2img_num_layers=2,
        in_width=5,                 # unused (see TODO in make_params)
        hidden_width=[16, 32],      # latent: 32 channels -> mean/logvar 16 each
    )
    B, S = 2, 32

    key = jax.random.PRNGKey(0)
    kx, keps, kparam = jax.random.split(key, 3)

    x = jax.random.normal(kx, (B, S, cfg["in_channel"]), dtype=jnp.float32)
    params = make_params(cfg, kparam)
    packed = pack_params(params, cfg)

    # eps ~ N(0,1), passed in the packed latent layout [B, S, half*C1].
    # (Kept as a tiny kernel input rather than in-kernel PRNG: exact Gaussian
    # synthesis from pltpu.prng_random_bits needs cos/log transcendentals whose
    # in-kernel support is not guaranteed across generations.)
    halfp = (cfg["hidden_width"][-1] // 2) * cfg["seq2img_img_channels"]
    eps = jax.random.normal(keps, (B, S, halfp), dtype=jnp.float32)

    fwd = jax.jit(lambda p, xx, ee: vae_forward(p, cfg, xx, ee))
    recon, mu, logvar = fwd(packed, x, eps)
    jax.block_until_ready((recon, mu, logvar))

    assert recon.shape == (B, S, cfg["in_channel"])
    assert mu.shape == (B, S, cfg["seq2img_img_channels"], cfg["hidden_width"][-1] // 2)
    assert logvar.shape == mu.shape
    assert bool(jnp.all(jnp.isfinite(recon)))
    assert bool(jnp.all(jnp.isfinite(mu)))
    assert bool(jnp.all(jnp.isfinite(logvar)))
    print("KERNEL_OK")
</pallas_src>

<mosaic_0001>
module attributes {stable_mosaic.version = 11 : i64} {
  func.func @kernel(%arg0: i32, %arg1: memref<1x32x5xf32, #tpu.memory_space<vmem>>, %arg2: memref<1x32x128xf32, #tpu.memory_space<vmem>>, %arg3: memref<3x5x8xbf16, #tpu.memory_space<vmem>>, %arg4: memref<1x8xf32, #tpu.memory_space<vmem>>, %arg5: memref<3x8x8xbf16, #tpu.memory_space<vmem>>, %arg6: memref<1x8xf32, #tpu.memory_space<vmem>>, %arg7: memref<3x8x128xbf16, #tpu.memory_space<vmem>>, %arg8: memref<1x128xf32, #tpu.memory_space<vmem>>, %arg9: memref<3x128x256xbf16, #tpu.memory_space<vmem>>, %arg10: memref<1x256xf32, #tpu.memory_space<vmem>>, %arg11: memref<256x256xbf16, #tpu.memory_space<vmem>>, %arg12: memref<1x256xf32, #tpu.memory_space<vmem>>, %arg13: memref<128x256xbf16, #tpu.memory_space<vmem>>, %arg14: memref<1x256xf32, #tpu.memory_space<vmem>>, %arg15: memref<3x256x128xbf16, #tpu.memory_space<vmem>>, %arg16: memref<1x128xf32, #tpu.memory_space<vmem>>, %arg17: memref<3x128x8xbf16, #tpu.memory_space<vmem>>, %arg18: memref<1x8xf32, #tpu.memory_space<vmem>>, %arg19: memref<3x8x8xbf16, #tpu.memory_space<vmem>>, %arg20: memref<1x8xf32, #tpu.memory_space<vmem>>, %arg21: memref<3x8x5xbf16, #tpu.memory_space<vmem>>, %arg22: memref<1x5xf32, #tpu.memory_space<vmem>>, %arg23: memref<1x32x5xf32, #tpu.memory_space<vmem>>, %arg24: memref<1x32x256xf32, #tpu.memory_space<vmem>>, %arg25: memref<34x256xf32, #tpu.memory_space<vmem>>) attributes {dimension_semantics = [#tpu.dimension_semantics<parallel>], iteration_bounds = array<i64: 2>, scalar_prefetch = 0 : i64, scratch_operands = 1 : i64, tpu.core_type = #tpu.core_type<tc>, window_params = [{transform_indices = @transform_0, window_bounds = array<i64: 1, 32, 5>}, {transform_indices = @transform_1, window_bounds = array<i64: 1, 32, 128>}, {pipeline_mode = #tpu.pipeline_mode<synchronous>, transform_indices = @transform_2, window_bounds = array<i64: 3, 5, 8>}, {pipeline_mode = #tpu.pipeline_mode<synchronous>, transform_indices = @transform_3, window_bounds = array<i64: 1, 8>}, {pipeline_mode = #tpu.pipeline_mode<synchronous>, transform_indices = @transform_4, window_bounds = array<i64: 3, 8, 8>}, {pipeline_mode = #tpu.pipeline_mode<synchronous>, transform_indices = @transform_5, window_bounds = array<i64: 1, 8>}, {pipeline_mode = #tpu.pipeline_mode<synchronous>, transform_indices = @transform_6, window_bounds = array<i64: 3, 8, 128>}, {pipeline_mode = #tpu.pipeline_mode<synchronous>, transform_indices = @transform_7, window_bounds = array<i64: 1, 128>}, {pipeline_mode = #tpu.pipeline_mode<synchronous>, transform_indices = @transform_8, window_bounds = array<i64: 3, 128, 256>}, {pipeline_mode = #tpu.pipeline_mode<synchronous>, transform_indices = @transform_9, window_bounds = array<i64: 1, 256>}, {pipeline_mode = #tpu.pipeline_mode<synchronous>, transform_indices = @transform_10, window_bounds = array<i64: 256, 256>}, {pipeline_mode = #tpu.pipeline_mode<synchronous>, transform_indices = @transform_11, window_bounds = array<i64: 1, 256>}, {pipeline_mode = #tpu.pipeline_mode<synchronous>, transform_indices = @transform_12, window_bounds = array<i64: 128, 256>}, {pipeline_mode = #tpu.pipeline_mode<synchronous>, transform_indices = @transform_13, window_bounds = array<i64: 1, 256>}, {pipeline_mode = #tpu.pipeline_mode<synchronous>, transform_indices = @transform_14, window_bounds = array<i64: 3, 256, 128>}, {pipeline_mode = #tpu.pipeline_mode<synchronous>, transform_indices = @transform_15, window_bounds = array<i64: 1, 128>}, {pipeline_mode = #tpu.pipeline_mode<synchronous>, transform_indices = @transform_16, window_bounds = array<i64: 3, 128, 8>}, {pipeline_mode = #tpu.pipeline_mode<synchronous>, transform_indices = @transform_17, window_bounds = array<i64: 1, 8>}, {pipeline_mode = #tpu.pipeline_mode<synchronous>, transform_indices = @transform_18, window_bounds = array<i64: 3, 8, 8>}, {pipeline_mode = #tpu.pipeline_mode<synchronous>, transform_indices = @transform_19, window_bounds = array<i64: 1, 8>}, {pipeline_mode = #tpu.pipeline_mode<synchronous>, transform_indices = @transform_20, window_bounds = array<i64: 3, 8, 5>}, {pipeline_mode = #tpu.pipeline_mode<synchronous>, transform_indices = @transform_21, window_bounds = array<i64: 1, 5>}, {transform_indices = @transform_22, window_bounds = array<i64: 1, 32, 5>}, {transform_indices = @transform_23, window_bounds = array<i64: 1, 32, 256>}]} {
    %cst = arith.constant 0.000000e+00 : f32
    %0 = vector.broadcast %cst : f32 to vector<1x256xf32>
    %c0 = arith.constant 0 : index
    %c0_0 = arith.constant 0 : index
    %1 = vector.load %arg25[%c0, %c0_0] : memref<34x256xf32, #tpu.memory_space<vmem>>, vector<1x256xf32>
    tpu.vector_store %arg25[%c0, %c0_0], %0 {strides = array<i32>} : memref<34x256xf32, #tpu.memory_space<vmem>>, vector<1x256xf32>,
    %c33 = arith.constant 33 : index
    %c0_1 = arith.constant 0 : index
    %2 = vector.load %arg25[%c33, %c0_1] : memref<34x256xf32, #tpu.memory_space<vmem>>, vector<1x256xf32>
    tpu.vector_store %arg25[%c33, %c0_1], %0 {strides = array<i32>} : memref<34x256xf32, #tpu.memory_space<vmem>>, vector<1x256xf32>,
    %c0_2 = arith.constant 0 : index
    %c0_3 = arith.constant 0 : index
    %c0_4 = arith.constant 0 : index
    %3 = vector.load %arg1[%c0_2, %c0_3, %c0_4] : memref<1x32x5xf32, #tpu.memory_space<vmem>>, vector<1x32x5xf32>
    %4 = vector.shape_cast %3 : vector<1x32x5xf32> to vector<32x5xf32>
    %c1 = arith.constant 1 : index
    %c0_5 = arith.constant 0 : index
    %5 = vector.load %arg25[%c1, %c0_5] : memref<34x256xf32, #tpu.memory_space<vmem>>, vector<32x5xf32>
    tpu.vector_store %arg25[%c1, %c0_5], %4 {strides = array<i32>} : memref<34x256xf32, #tpu.memory_space<vmem>>, vector<32x5xf32>,
    %c0_6 = arith.constant 0 : index
    %c0_7 = arith.constant 0 : index
    %6 = vector.load %arg25[%c0_6, %c0_7] : memref<34x256xf32, #tpu.memory_space<vmem>>, vector<32x5xf32>
    %7 = arith.truncf %6 : vector<32x5xf32> to vector<32x5xbf16>
    %c0_8 = arith.constant 0 : index
    %c0_9 = arith.constant 0 : index
    %c0_10 = arith.constant 0 : index
    %8 = vector.load %arg3[%c0_8, %c0_9, %c0_10] : memref<3x5x8xbf16, #tpu.memory_space<vmem>>, vector<1x5x8xbf16>
    %9 = vector.shape_cast %8 : vector<1x5x8xbf16> to vector<5x8xbf16>
    %cst_11 = arith.constant dense<0.000000e+00> : vector<32x8xf32>
    %10 = tpu.matmul %7, %9, %cst_11 {dimension_numbers = #tpu.dot_dimension_numbers<[1], [0], [0], [1], [0, 0, 1, 1], [], []>} : vector<32x5xbf16>, vector<5x8xbf16>, vector<32x8xf32> -> vector<32x8xf32>
    %c1_12 = arith.constant 1 : index
    %c0_13 = arith.constant 0 : index
    %11 = vector.load %arg25[%c1_12, %c0_13] : memref<34x256xf32, #tpu.memory_space<vmem>>, vector<32x5xf32>
    %12 = arith.truncf %11 : vector<32x5xf32> to vector<32x5xbf16>
    %c1_14 = arith.constant 1 : index
    %c0_15 = arith.constant 0 : index
    %c0_16 = arith.constant 0 : index
    %13 = vector.load %arg3[%c1_14, %c0_15, %c0_16] : memref<3x5x8xbf16, #tpu.memory_space<vmem>>, vector<1x5x8xbf16>
    %14 = vector.shape_cast %13 : vector<1x5x8xbf16> to vector<5x8xbf16>
    %cst_17 = arith.constant dense<0.000000e+00> : vector<32x8xf32>
    %15 = tpu.matmul %12, %14, %cst_17 {dimension_numbers = #tpu.dot_dimension_numbers<[1], [0], [0], [1], [0, 0, 1, 1], [], []>} : vector<32x5xbf16>, vector<5x8xbf16>, vector<32x8xf32> -> vector<32x8xf32>
    %16 = arith.addf %10, %15 : vector<32x8xf32>
    %c2 = arith.constant 2 : index
    %c0_18 = arith.constant 0 : index
    %17 = vector.load %arg25[%c2, %c0_18] : memref<34x256xf32, #tpu.memory_space<vmem>>, vector<32x5xf32>
    %18 = arith.truncf %17 : vector<32x5xf32> to vector<32x5xbf16>
    %c2_19 = arith.constant 2 : index
    %c0_20 = arith.constant 0 : index
    %c0_21 = arith.constant 0 : index
    %19 = vector.load %arg3[%c2_19, %c0_20, %c0_21] : memref<3x5x8xbf16, #tpu.memory_space<vmem>>, vector<1x5x8xbf16>
    %20 = vector.shape_cast %19 : vector<1x5x8xbf16> to vector<5x8xbf16>
    %cst_22 = arith.constant dense<0.000000e+00> : vector<32x8xf32>
    %21 = tpu.matmul %18, %20, %cst_22 {dimension_numbers = #tpu.dot_dimension_numbers<[1], [0], [0], [1], [0, 0, 1, 1], [], []>} : vector<32x5xbf16>, vector<5x8xbf16>, vector<32x8xf32> -> vector<32x8xf32>
    %22 = arith.addf %16, %21 : vector<32x8xf32>
    %c0_23 = arith.constant 0 : index
    %c0_24 = arith.constant 0 : index
    %23 = vector.load %arg4[%c0_23, %c0_24] : memref<1x8xf32, #tpu.memory_space<vmem>>, vector<1x8xf32>
    %24 = vector.broadcast %23 : vector<1x8xf32> to vector<32x8xf32>
    %25 = arith.addf %22, %24 : vector<32x8xf32>
    %cst_25 = arith.constant 0.000000e+00 : f32
    %26 = vector.broadcast %cst_25 : f32 to vector<32x8xf32>
    %27 = arith.maximumf %25, %26 : vector<32x8xf32>
    %c1_26 = arith.constant 1 : index
    %c0_27 = arith.constant 0 : index
    %28 = vector.load %arg25[%c1_26, %c0_27] : memref<34x256xf32, #tpu.memory_space<vmem>>, vector<32x8xf32>
    tpu.vector_store %arg25[%c1_26, %c0_27], %27 {strides = array<i32>} : memref<34x256xf32, #tpu.memory_space<vmem>>, vector<32x8xf32>,
    %c0_28 = arith.constant 0 : index
    %c0_29 = arith.constant 0 : index
    %29 = vector.load %arg25[%c0_28, %c0_29] : memref<34x256xf32, #tpu.memory_space<vmem>>, vector<32x8xf32>
    %30 = arith.truncf %29 : vector<32x8xf32> to vector<32x8xbf16>
    %c0_30 = arith.constant 0 : index
    %c0_31 = arith.constant 0 : index
    %c0_32 = arith.constant 0 : index
    %31 = vector.load %arg5[%c0_30, %c0_31, %c0_32] : memref<3x8x8xbf16, #tpu.memory_space<vmem>>, vector<1x8x8xbf16>
    %32 = vector.shape_cast %31 : vector<1x8x8xbf16> to vector<8x8xbf16>
    %cst_33 = arith.constant dense<0.000000e+00> : vector<32x8xf32>
    %33 = tpu.matmul %30, %32, %cst_33 {dimension_numbers = #tpu.dot_dimension_numbers<[1], [0], [0], [1], [0, 0, 1, 1], [], []>} : vector<32x8xbf16>, vector<8x8xbf16>, vector<32x8xf32> -> vector<32x8xf32>
    %c1_34 = arith.constant 1 : index
    %c0_35 = arith.constant 0 : index
    %34 = vector.load %arg25[%c1_34, %c0_35] : memref<34x256xf32, #tpu.memory_space<vmem>>, vector<32x8xf32>
    %35 = arith.truncf %34 : vector<32x8xf32> to vector<32x8xbf16>
    %c1_36 = arith.constant 1 : index
    %c0_37 = arith.constant 0 : index
    %c0_38 = arith.constant 0 : index
    %36 = vector.load %arg5[%c1_36, %c0_37, %c0_38] : memref<3x8x8xbf16, #tpu.memory_space<vmem>>, vector<1x8x8xbf16>
    %37 = vector.shape_cast %36 : vector<1x8x8xbf16> to vector<8x8xbf16>
    %cst_39 = arith.constant dense<0.000000e+00> : vector<32x8xf32>
    %38 = tpu.matmul %35, %37, %cst_39 {dimension_numbers = #tpu.dot_dimension_numbers<[1], [0], [0], [1], [0, 0, 1, 1], [], []>} : vector<32x8xbf16>, vector<8x8xbf16>, vector<32x8xf32> -> vector<32x8xf32>
    %39 = arith.addf %33, %38 : vector<32x8xf32>
    %c2_40 = arith.constant 2 : index
    %c0_41 = arith.constant 0 : index
    %40 = vector.load %arg25[%c2_40, %c0_41] : memref<34x256xf32, #tpu.memory_space<vmem>>, vector<32x8xf32>
    %41 = arith.truncf %40 : vector<32x8xf32> to vector<32x8xbf16>
    %c2_42 = arith.constant 2 : index
    %c0_43 = arith.constant 0 : index
    %c0_44 = arith.constant 0 : index
    %42 = vector.load %arg5[%c2_42, %c0_43, %c0_44] : memref<3x8x8xbf16, #tpu.memory_space<vmem>>, vector<1x8x8xbf16>
    %43 = vector.shape_cast %42 : vector<1x8x8xbf16> to vector<8x8xbf16>
    %cst_45 = arith.constant dense<0.000000e+00> : vector<32x8xf32>
    %44 = tpu.matmul %41, %43, %cst_45 {dimension_numbers = #tpu.dot_dimension_numbers<[1], [0], [0], [1], [0, 0, 1, 1], [], []>} : vector<32x8xbf16>, vector<8x8xbf16>, vector<32x8xf32> -> vector<32x8xf32>
    %45 = arith.addf %39, %44 : vector<32x8xf32>
    %c0_46 = arith.constant 0 : index
    %c0_47 = arith.constant 0 : index
    %46 = vector.load %arg6[%c0_46, %c0_47] : memref<1x8xf32, #tpu.memory_space<vmem>>, vector<1x8xf32>
    %47 = vector.broadcast %46 : vector<1x8xf32> to vector<32x8xf32>
    %48 = arith.addf %45, %47 : vector<32x8xf32>
    %cst_48 = arith.constant 0.000000e+00 : f32
    %49 = vector.broadcast %cst_48 : f32 to vector<32x8xf32>
    %50 = arith.maximumf %48, %49 : vector<32x8xf32>
    %c1_49 = arith.constant 1 : index
    %c0_50 = arith.constant 0 : index
    %51 = vector.load %arg25[%c1_49, %c0_50] : memref<34x256xf32, #tpu.memory_space<vmem>>, vector<32x8xf32>
    tpu.vector_store %arg25[%c1_49, %c0_50], %50 {strides = array<i32>} : memref<34x256xf32, #tpu.memory_space<vmem>>, vector<32x8xf32>,
    %c0_51 = arith.constant 0 : index
    %c0_52 = arith.constant 0 : index
    %52 = vector.load %arg25[%c0_51, %c0_52] : memref<34x256xf32, #tpu.memory_space<vmem>>, vector<32x8xf32>
    %53 = arith.truncf %52 : vector<32x8xf32> to vector<32x8xbf16>
    %c0_53 = arith.constant 0 : index
    %c0_54 = arith.constant 0 : index
    %c0_55 = arith.constant 0 : index
    %54 = vector.load %arg7[%c0_53, %c0_54, %c0_55] : memref<3x8x128xbf16, #tpu.memory_space<vmem>>, vector<1x8x128xbf16>
    %55 = vector.shape_cast %54 : vector<1x8x128xbf16> to vector<8x128xbf16>
    %cst_56 = arith.constant dense<0.000000e+00> : vector<32x128xf32>
    %56 = tpu.matmul %53, %55, %cst_56 {dimension_numbers = #tpu.dot_dimension_numbers<[1], [0], [0], [1], [0, 0, 1, 1], [], []>} : vector<32x8xbf16>, vector<8x128xbf16>, vector<32x128xf32> -> vector<32x128xf32>
    %c1_57 = arith.constant 1 : index
    %c0_58 = arith.constant 0 : index
    %57 = vector.load %arg25[%c1_57, %c0_58] : memref<34x256xf32, #tpu.memory_space<vmem>>, vector<32x8xf32>
    %58 = arith.truncf %57 : vector<32x8xf32> to vector<32x8xbf16>
    %c1_59 = arith.constant 1 : index
    %c0_60 = arith.constant 0 : index
    %c0_61 = arith.constant 0 : index
    %59 = vector.load %arg7[%c1_59, %c0_60, %c0_61] : memref<3x8x128xbf16, #tpu.memory_space<vmem>>, vector<1x8x128xbf16>
    %60 = vector.shape_cast %59 : vector<1x8x128xbf16> to vector<8x128xbf16>
    %cst_62 = arith.constant dense<0.000000e+00> : vector<32x128xf32>
    %61 = tpu.matmul %58, %60, %cst_62 {dimension_numbers = #tpu.dot_dimension_numbers<[1], [0], [0], [1], [0, 0, 1, 1], [], []>} : vector<32x8xbf16>, vector<8x128xbf16>, vector<32x128xf32> -> vector<32x128xf32>
    %62 = arith.addf %56, %61 : vector<32x128xf32>
    %c2_63 = arith.constant 2 : index
    %c0_64 = arith.constant 0 : index
    %63 = vector.load %arg25[%c2_63, %c0_64] : memref<34x256xf32, #tpu.memory_space<vmem>>, vector<32x8xf32>
    %64 = arith.truncf %63 : vector<32x8xf32> to vector<32x8xbf16>
    %c2_65 = arith.constant 2 : index
    %c0_66 = arith.constant 0 : index
    %c0_67 = arith.constant 0 : index
    %65 = vector.load %arg7[%c2_65, %c0_66, %c0_67] : memref<3x8x128xbf16, #tpu.memory_space<vmem>>, vector<1x8x128xbf16>
    %66 = vector.shape_cast %65 : vector<1x8x128xbf16> to vector<8x128xbf16>
    %cst_68 = arith.constant dense<0.000000e+00> : vector<32x128xf32>
    %67 = tpu.matmul %64, %66, %cst_68 {dimension_numbers = #tpu.dot_dimension_numbers<[1], [0], [0], [1], [0, 0, 1, 1], [], []>} : vector<32x8xbf16>, vector<8x128xbf16>, vector<32x128xf32> -> vector<32x128xf32>
    %68 = arith.addf %62, %67 : vector<32x128xf32>
    %c0_69 = arith.constant 0 : index
    %c0_70 = arith.constant 0 : index
    %69 = vector.load %arg8[%c0_69, %c0_70] : memref<1x128xf32, #tpu.memory_space<vmem>>, vector<1x128xf32>
    %70 = vector.broadcast %69 : vector<1x128xf32> to vector<32x128xf32>
    %71 = arith.addf %68, %70 : vector<32x128xf32>
    %cst_71 = arith.constant 0.000000e+00 : f32
    %72 = vector.broadcast %cst_71 : f32 to vector<32x128xf32>
    %73 = arith.maximumf %71, %72 : vector<32x128xf32>
    %c1_72 = arith.constant 1 : index
    %c0_73 = arith.constant 0 : index
    %74 = vector.load %arg25[%c1_72, %c0_73] : memref<34x256xf32, #tpu.memory_space<vmem>>, vector<32x128xf32>
    tpu.vector_store %arg25[%c1_72, %c0_73], %73 {strides = array<i32>} : memref<34x256xf32, #tpu.memory_space<vmem>>, vector<32x128xf32>,
    %c0_74 = arith.constant 0 : index
    %c0_75 = arith.constant 0 : index
    %75 = vector.load %arg25[%c0_74, %c0_75] : memref<34x256xf32, #tpu.memory_space<vmem>>, vector<32x128xf32>
    %76 = arith.truncf %75 : vector<32x128xf32> to vector<32x128xbf16>
    %c0_76 = arith.constant 0 : index
    %c0_77 = arith.constant 0 : index
    %c0_78 = arith.constant 0 : index
    %77 = vector.load %arg9[%c0_76, %c0_77, %c0_78] : memref<3x128x256xbf16, #tpu.memory_space<vmem>>, vector<1x128x256xbf16>
    %78 = vector.shape_cast %77 : vector<1x128x256xbf16> to vector<128x256xbf16>
    %cst_79 = arith.constant dense<0.000000e+00> : vector<32x256xf32>
    %79 = tpu.matmul %76, %78, %cst_79 {dimension_numbers = #tpu.dot_dimension_numbers<[1], [0], [0], [1], [0, 0, 1, 1], [], []>} : vector<32x128xbf16>, vector<128x256xbf16>, vector<32x256xf32> -> vector<32x256xf32>
    %c1_80 = arith.constant 1 : index
    %c0_81 = arith.constant 0 : index
    %80 = vector.load %arg25[%c1_80, %c0_81] : memref<34x256xf32, #tpu.memory_space<vmem>>, vector<32x128xf32>
    %81 = arith.truncf %80 : vector<32x128xf32> to vector<32x128xbf16>
    %c1_82 = arith.constant 1 : index
    %c0_83 = arith.constant 0 : index
    %c0_84 = arith.constant 0 : index
    %82 = vector.load %arg9[%c1_82, %c0_83, %c0_84] : memref<3x128x256xbf16, #tpu.memory_space<vmem>>, vector<1x128x256xbf16>
    %83 = vector.shape_cast %82 : vector<1x128x256xbf16> to vector<128x256xbf16>
    %cst_85 = arith.constant dense<0.000000e+00> : vector<32x256xf32>
    %84 = tpu.matmul %81, %83, %cst_85 {dimension_numbers = #tpu.dot_dimension_numbers<[1], [0], [0], [1], [0, 0, 1, 1], [], []>} : vector<32x128xbf16>, vector<128x256xbf16>, vector<32x256xf32> -> vector<32x256xf32>
    %85 = arith.addf %79, %84 : vector<32x256xf32>
    %c2_86 = arith.constant 2 : index
    %c0_87 = arith.constant 0 : index
    %86 = vector.load %arg25[%c2_86, %c0_87] : memref<34x256xf32, #tpu.memory_space<vmem>>, vector<32x128xf32>
    %87 = arith.truncf %86 : vector<32x128xf32> to vector<32x128xbf16>
    %c2_88 = arith.constant 2 : index
    %c0_89 = arith.constant 0 : index
    %c0_90 = arith.constant 0 : index
    %88 = vector.load %arg9[%c2_88, %c0_89, %c0_90] : memref<3x128x256xbf16, #tpu.memory_space<vmem>>, vector<1x128x256xbf16>
    %89 = vector.shape_cast %88 : vector<1x128x256xbf16> to vector<128x256xbf16>
    %cst_91 = arith.constant dense<0.000000e+00> : vector<32x256xf32>
    %90 = tpu.matmul %87, %89, %cst_91 {dimension_numbers = #tpu.dot_dimension_numbers<[1], [0], [0], [1], [0, 0, 1, 1], [], []>} : vector<32x128xbf16>, vector<128x256xbf16>, vector<32x256xf32> -> vector<32x256xf32>
    %91 = arith.addf %85, %90 : vector<32x256xf32>
    %c0_92 = arith.constant 0 : index
    %c0_93 = arith.constant 0 : index
    %92 = vector.load %arg10[%c0_92, %c0_93] : memref<1x256xf32, #tpu.memory_space<vmem>>, vector<1x256xf32>
    %93 = vector.broadcast %92 : vector<1x256xf32> to vector<32x256xf32>
    %94 = arith.addf %91, %93 : vector<32x256xf32>
    %cst_94 = arith.constant 0.000000e+00 : f32
    %95 = vector.broadcast %cst_94 : f32 to vector<32x256xf32>
    %96 = arith.maximumf %94, %95 : vector<32x256xf32>
    %97 = arith.truncf %96 : vector<32x256xf32> to vector<32x256xbf16>
    %c0_95 = arith.constant 0 : index
    %c0_96 = arith.constant 0 : index
    %98 = vector.load %arg11[%c0_95, %c0_96] : memref<256x256xbf16, #tpu.memory_space<vmem>>, vector<256x256xbf16>
    %cst_97 = arith.constant dense<0.000000e+00> : vector<32x256xf32>
    %99 = tpu.matmul %97, %98, %cst_97 {dimension_numbers = #tpu.dot_dimension_numbers<[1], [0], [0], [1], [0, 0, 1, 1], [], []>} : vector<32x256xbf16>, vector<256x256xbf16>, vector<32x256xf32> -> vector<32x256xf32>
    %c0_98 = arith.constant 0 : index
    %c0_99 = arith.constant 0 : index
    %100 = vector.load %arg12[%c0_98, %c0_99] : memref<1x256xf32, #tpu.memory_space<vmem>>, vector<1x256xf32>
    %101 = vector.broadcast %100 : vector<1x256xf32> to vector<32x256xf32>
    %102 = arith.addf %99, %101 : vector<32x256xf32>
    %103 = vector.extract_strided_slice %102 {offsets = [0, 0], sizes = [32, 128], strides = [1, 1]} : vector<32x256xf32> to vector<32x128xf32>
    %104 = vector.extract_strided_slice %102 {offsets = [0, 128], sizes = [32, 128], strides = [1, 1]} : vector<32x256xf32> to vector<32x128xf32>
    %cst_100 = arith.constant -3.000000e+01 : f32
    %cst_101 = arith.constant 2.000000e+01 : f32
    %105 = vector.broadcast %cst_100 : f32 to vector<32x128xf32>
    %106 = arith.maximumf %105, %104 : vector<32x128xf32>
    %107 = vector.broadcast %cst_101 : f32 to vector<32x128xf32>
    %108 = arith.minimumf %107, %106 : vector<32x128xf32>
    %c0_102 = arith.constant 0 : index
    %c0_103 = arith.constant 0 : index
    %c0_104 = arith.constant 0 : index
    %109 = vector.load %arg24[%c0_102, %c0_103, %c0_104] : memref<1x32x256xf32, #tpu.memory_space<vmem>>, vector<1x32x128xf32>
    %110 = vector.shape_cast %109 : vector<1x32x128xf32> to vector<32x128xf32>
    %111 = vector.shape_cast %103 : vector<32x128xf32> to vector<1x32x128xf32>
    tpu.vector_store %arg24[%c0_102, %c0_103, %c0_104], %111 {strides = array<i32>} : memref<1x32x256xf32, #tpu.memory_space<vmem>>, vector<1x32x128xf32>,
    %c0_105 = arith.constant 0 : index
    %c0_106 = arith.constant 0 : index
    %c128 = arith.constant 128 : index
    %112 = vector.load %arg24[%c0_105, %c0_106, %c128] : memref<1x32x256xf32, #tpu.memory_space<vmem>>, vector<1x32x128xf32>
    %113 = vector.shape_cast %112 : vector<1x32x128xf32> to vector<32x128xf32>
    %114 = vector.shape_cast %108 : vector<32x128xf32> to vector<1x32x128xf32>
    tpu.vector_store %arg24[%c0_105, %c0_106, %c128], %114 {strides = array<i32>} : memref<1x32x256xf32, #tpu.memory_space<vmem>>, vector<1x32x128xf32>,
    %cst_107 = arith.constant 5.000000e-01 : f32
    %115 = vector.broadcast %cst_107 : f32 to vector<32x128xf32>
    %116 = arith.mulf %115, %108 : vector<32x128xf32>
    %117 = math.exp %116 : vector<32x128xf32>
    %c0_108 = arith.constant 0 : index
    %c0_109 = arith.constant 0 : index
    %c0_110 = arith.constant 0 : index
    %118 = vector.load %arg2[%c0_108, %c0_109, %c0_110] : memref<1x32x128xf32, #tpu.memory_space<vmem>>, vector<1x32x128xf32>
    %119 = vector.shape_cast %118 : vector<1x32x128xf32> to vector<32x128xf32>
    %120 = arith.mulf %117, %119 : vector<32x128xf32>
    %121 = arith.addf %103, %120 : vector<32x128xf32>
    %122 = arith.truncf %121 : vector<32x128xf32> to vector<32x128xbf16>
    %c0_111 = arith.constant 0 : index
    %c0_112 = arith.constant 0 : index
    %123 = vector.load %arg13[%c0_111, %c0_112] : memref<128x256xbf16, #tpu.memory_space<vmem>>, vector<128x256xbf16>
    %cst_113 = arith.constant dense<0.000000e+00> : vector<32x256xf32>
    %124 = tpu.matmul %122, %123, %cst_113 {dimension_numbers = #tpu.dot_dimension_numbers<[1], [0], [0], [1], [0, 0, 1, 1], [], []>} : vector<32x128xbf16>, vector<128x256xbf16>, vector<32x256xf32> -> vector<32x256xf32>
    %c0_114 = arith.constant 0 : index
    %c0_115 = arith.constant 0 : index
    %125 = vector.load %arg14[%c0_114, %c0_115] : memref<1x256xf32, #tpu.memory_space<vmem>>, vector<1x256xf32>
    %126 = vector.broadcast %125 : vector<1x256xf32> to vector<32x256xf32>
    %127 = arith.addf %124, %126 : vector<32x256xf32>
    %c1_116 = arith.constant 1 : index
    %c0_117 = arith.constant 0 : index
    %128 = vector.load %arg25[%c1_116, %c0_117] : memref<34x256xf32, #tpu.memory_space<vmem>>, vector<32x256xf32>
    tpu.vector_store %arg25[%c1_116, %c0_117], %127 {strides = array<i32>} : memref<34x256xf32, #tpu.memory_space<vmem>>, vector<32x256xf32>,
    %c0_118 = arith.constant 0 : index
    %c0_119 = arith.constant 0 : index
    %129 = vector.load %arg25[%c0_118, %c0_119] : memref<34x256xf32, #tpu.memory_space<vmem>>, vector<32x256xf32>
    %130 = arith.truncf %129 : vector<32x256xf32> to vector<32x256xbf16>
    %c0_120 = arith.constant 0 : index
    %c0_121 = arith.constant 0 : index
    %c0_122 = arith.constant 0 : index
    %131 = vector.load %arg15[%c0_120, %c0_121, %c0_122] : memref<3x256x128xbf16, #tpu.memory_space<vmem>>, vector<1x256x128xbf16>
    %132 = vector.shape_cast %131 : vector<1x256x128xbf16> to vector<256x128xbf16>
    %cst_123 = arith.constant dense<0.000000e+00> : vector<32x128xf32>
    %133 = tpu.matmul %130, %132, %cst_123 {dimension_numbers = #tpu.dot_dimension_numbers<[1], [0], [0], [1], [0, 0, 1, 1], [], []>} : vector<32x256xbf16>, vector<256x128xbf16>, vector<32x128xf32> -> vector<32x128xf32>
    %c1_124 = arith.constant 1 : index
    %c0_125 = arith.constant 0 : index
    %134 = vector.load %arg25[%c1_124, %c0_125] : memref<34x256xf32, #tpu.memory_space<vmem>>, vector<32x256xf32>
    %135 = arith.truncf %134 : vector<32x256xf32> to vector<32x256xbf16>
    %c1_126 = arith.constant 1 : index
    %c0_127 = arith.constant 0 : index
    %c0_128 = arith.constant 0 : index
    %136 = vector.load %arg15[%c1_126, %c0_127, %c0_128] : memref<3x256x128xbf16, #tpu.memory_space<vmem>>, vector<1x256x128xbf16>
    %137 = vector.shape_cast %136 : vector<1x256x128xbf16> to vector<256x128xbf16>
    %cst_129 = arith.constant dense<0.000000e+00> : vector<32x128xf32>
    %138 = tpu.matmul %135, %137, %cst_129 {dimension_numbers = #tpu.dot_dimension_numbers<[1], [0], [0], [1], [0, 0, 1, 1], [], []>} : vector<32x256xbf16>, vector<256x128xbf16>, vector<32x128xf32> -> vector<32x128xf32>
    %139 = arith.addf %133, %138 : vector<32x128xf32>
    %c2_130 = arith.constant 2 : index
    %c0_131 = arith.constant 0 : index
    %140 = vector.load %arg25[%c2_130, %c0_131] : memref<34x256xf32, #tpu.memory_space<vmem>>, vector<32x256xf32>
    %141 = arith.truncf %140 : vector<32x256xf32> to vector<32x256xbf16>
    %c2_132 = arith.constant 2 : index
    %c0_133 = arith.constant 0 : index
    %c0_134 = arith.constant 0 : index
    %142 = vector.load %arg15[%c2_132, %c0_133, %c0_134] : memref<3x256x128xbf16, #tpu.memory_space<vmem>>, vector<1x256x128xbf16>
    %143 = vector.shape_cast %142 : vector<1x256x128xbf16> to vector<256x128xbf16>
    %cst_135 = arith.constant dense<0.000000e+00> : vector<32x128xf32>
    %144 = tpu.matmul %141, %143, %cst_135 {dimension_numbers = #tpu.dot_dimension_numbers<[1], [0], [0], [1], [0, 0, 1, 1], [], []>} : vector<32x256xbf16>, vector<256x128xbf16>, vector<32x128xf32> -> vector<32x128xf32>
    %145 = arith.addf %139, %144 : vector<32x128xf32>
    %c0_136 = arith.constant 0 : index
    %c0_137 = arith.constant 0 : index
    %146 = vector.load %arg16[%c0_136, %c0_137] : memref<1x128xf32, #tpu.memory_space<vmem>>, vector<1x128xf32>
    %147 = vector.broadcast %146 : vector<1x128xf32> to vector<32x128xf32>
    %148 = arith.addf %145, %147 : vector<32x128xf32>
    %cst_138 = arith.constant 0.000000e+00 : f32
    %149 = vector.broadcast %cst_138 : f32 to vector<32x128xf32>
    %150 = arith.maximumf %148, %149 : vector<32x128xf32>
    %c1_139 = arith.constant 1 : index
    %c0_140 = arith.constant 0 : index
    %151 = vector.load %arg25[%c1_139, %c0_140] : memref<34x256xf32, #tpu.memory_space<vmem>>, vector<32x128xf32>
    tpu.vector_store %arg25[%c1_139, %c0_140], %150 {strides = array<i32>} : memref<34x256xf32, #tpu.memory_space<vmem>>, vector<32x128xf32>,
    %c0_141 = arith.constant 0 : index
    %c0_142 = arith.constant 0 : index
    %152 = vector.load %arg25[%c0_141, %c0_142] : memref<34x256xf32, #tpu.memory_space<vmem>>, vector<32x128xf32>
    %153 = arith.truncf %152 : vector<32x128xf32> to vector<32x128xbf16>
    %c0_143 = arith.constant 0 : index
    %c0_144 = arith.constant 0 : index
    %c0_145 = arith.constant 0 : index
    %154 = vector.load %arg17[%c0_143, %c0_144, %c0_145] : memref<3x128x8xbf16, #tpu.memory_space<vmem>>, vector<1x128x8xbf16>
    %155 = vector.shape_cast %154 : vector<1x128x8xbf16> to vector<128x8xbf16>
    %cst_146 = arith.constant dense<0.000000e+00> : vector<32x8xf32>
    %156 = tpu.matmul %153, %155, %cst_146 {dimension_numbers = #tpu.dot_dimension_numbers<[1], [0], [0], [1], [0, 0, 1, 1], [], []>} : vector<32x128xbf16>, vector<128x8xbf16>, vector<32x8xf32> -> vector<32x8xf32>
    %c1_147 = arith.constant 1 : index
    %c0_148 = arith.constant 0 : index
    %157 = vector.load %arg25[%c1_147, %c0_148] : memref<34x256xf32, #tpu.memory_space<vmem>>, vector<32x128xf32>
    %158 = arith.truncf %157 : vector<32x128xf32> to vector<32x128xbf16>
    %c1_149 = arith.constant 1 : index
    %c0_150 = arith.constant 0 : index
    %c0_151 = arith.constant 0 : index
    %159 = vector.load %arg17[%c1_149, %c0_150, %c0_151] : memref<3x128x8xbf16, #tpu.memory_space<vmem>>, vector<1x128x8xbf16>
    %160 = vector.shape_cast %159 : vector<1x128x8xbf16> to vector<128x8xbf16>
    %cst_152 = arith.constant dense<0.000000e+00> : vector<32x8xf32>
    %161 = tpu.matmul %158, %160, %cst_152 {dimension_numbers = #tpu.dot_dimension_numbers<[1], [0], [0], [1], [0, 0, 1, 1], [], []>} : vector<32x128xbf16>, vector<128x8xbf16>, vector<32x8xf32> -> vector<32x8xf32>
    %162 = arith.addf %156, %161 : vector<32x8xf32>
    %c2_153 = arith.constant 2 : index
    %c0_154 = arith.constant 0 : index
    %163 = vector.load %arg25[%c2_153, %c0_154] : memref<34x256xf32, #tpu.memory_space<vmem>>, vector<32x128xf32>
    %164 = arith.truncf %163 : vector<32x128xf32> to vector<32x128xbf16>
    %c2_155 = arith.constant 2 : index
    %c0_156 = arith.constant 0 : index
    %c0_157 = arith.constant 0 : index
    %165 = vector.load %arg17[%c2_155, %c0_156, %c0_157] : memref<3x128x8xbf16, #tpu.memory_space<vmem>>, vector<1x128x8xbf16>
    %166 = vector.shape_cast %165 : vector<1x128x8xbf16> to vector<128x8xbf16>
    %cst_158 = arith.constant dense<0.000000e+00> : vector<32x8xf32>
    %167 = tpu.matmul %164, %166, %cst_158 {dimension_numbers = #tpu.dot_dimension_numbers<[1], [0], [0], [1], [0, 0, 1, 1], [], []>} : vector<32x128xbf16>, vector<128x8xbf16>, vector<32x8xf32> -> vector<32x8xf32>
    %168 = arith.addf %162, %167 : vector<32x8xf32>
    %c0_159 = arith.constant 0 : index
    %c0_160 = arith.constant 0 : index
    %169 = vector.load %arg18[%c0_159, %c0_160] : memref<1x8xf32, #tpu.memory_space<vmem>>, vector<1x8xf32>
    %170 = vector.broadcast %169 : vector<1x8xf32> to vector<32x8xf32>
    %171 = arith.addf %168, %170 : vector<32x8xf32>
    %172 = math.tanh %171 : vector<32x8xf32>
    %c1_161 = arith.constant 1 : index
    %c0_162 = arith.constant 0 : index
    %173 = vector.load %arg25[%c1_161, %c0_162] : memref<34x256xf32, #tpu.memory_space<vmem>>, vector<32x8xf32>
    tpu.vector_store %arg25[%c1_161, %c0_162], %172 {strides = array<i32>} : memref<34x256xf32, #tpu.memory_space<vmem>>, vector<32x8xf32>,
    %c0_163 = arith.constant 0 : index
    %c0_164 = arith.constant 0 : index
    %174 = vector.load %arg25[%c0_163, %c0_164] : memref<34x256xf32, #tpu.memory_space<vmem>>, vector<32x8xf32>
    %175 = arith.truncf %174 : vector<32x8xf32> to vector<32x8xbf16>
    %c0_165 = arith.constant 0 : index
    %c0_166 = arith.constant 0 : index
    %c0_167 = arith.constant 0 : index
    %176 = vector.load %arg19[%c0_165, %c0_166, %c0_167] : memref<3x8x8xbf16, #tpu.memory_space<vmem>>, vector<1x8x8xbf16>
    %177 = vector.shape_cast %176 : vector<1x8x8xbf16> to vector<8x8xbf16>
    %cst_168 = arith.constant dense<0.000000e+00> : vector<32x8xf32>
    %178 = tpu.matmul %175, %177, %cst_168 {dimension_numbers = #tpu.dot_dimension_numbers<[1], [0], [0], [1], [0, 0, 1, 1], [], []>} : vector<32x8xbf16>, vector<8x8xbf16>, vector<32x8xf32> -> vector<32x8xf32>
    %c1_169 = arith.constant 1 : index
    %c0_170 = arith.constant 0 : index
    %179 = vector.load %arg25[%c1_169, %c0_170] : memref<34x256xf32, #tpu.memory_space<vmem>>, vector<32x8xf32>
    %180 = arith.truncf %179 : vector<32x8xf32> to vector<32x8xbf16>
    %c1_171 = arith.constant 1 : index
    %c0_172 = arith.constant 0 : index
    %c0_173 = arith.constant 0 : index
    %181 = vector.load %arg19[%c1_171, %c0_172, %c0_173] : memref<3x8x8xbf16, #tpu.memory_space<vmem>>, vector<1x8x8xbf16>
    %182 = vector.shape_cast %181 : vector<1x8x8xbf16> to vector<8x8xbf16>
    %cst_174 = arith.constant dense<0.000000e+00> : vector<32x8xf32>
    %183 = tpu.matmul %180, %182, %cst_174 {dimension_numbers = #tpu.dot_dimension_numbers<[1], [0], [0], [1], [0, 0, 1, 1], [], []>} : vector<32x8xbf16>, vector<8x8xbf16>, vector<32x8xf32> -> vector<32x8xf32>
    %184 = arith.addf %178, %183 : vector<32x8xf32>
    %c2_175 = arith.constant 2 : index
    %c0_176 = arith.constant 0 : index
    %185 = vector.load %arg25[%c2_175, %c0_176] : memref<34x256xf32, #tpu.memory_space<vmem>>, vector<32x8xf32>
    %186 = arith.truncf %185 : vector<32x8xf32> to vector<32x8xbf16>
    %c2_177 = arith.constant 2 : index
    %c0_178 = arith.constant 0 : index
    %c0_179 = arith.constant 0 : index
    %187 = vector.load %arg19[%c2_177, %c0_178, %c0_179] : memref<3x8x8xbf16, #tpu.memory_space<vmem>>, vector<1x8x8xbf16>
    %188 = vector.shape_cast %187 : vector<1x8x8xbf16> to vector<8x8xbf16>
    %cst_180 = arith.constant dense<0.000000e+00> : vector<32x8xf32>
    %189 = tpu.matmul %186, %188, %cst_180 {dimension_numbers = #tpu.dot_dimension_numbers<[1], [0], [0], [1], [0, 0, 1, 1], [], []>} : vector<32x8xbf16>, vector<8x8xbf16>, vector<32x8xf32> -> vector<32x8xf32>
    %190 = arith.addf %184, %189 : vector<32x8xf32>
    %c0_181 = arith.constant 0 : index
    %c0_182 = arith.constant 0 : index
    %191 = vector.load %arg20[%c0_181, %c0_182] : memref<1x8xf32, #tpu.memory_space<vmem>>, vector<1x8xf32>
    %192 = vector.broadcast %191 : vector<1x8xf32> to vector<32x8xf32>
    %193 = arith.addf %190, %192 : vector<32x8xf32>
    %cst_183 = arith.constant 0.000000e+00 : f32
    %194 = vector.broadcast %cst_183 : f32 to vector<32x8xf32>
    %195 = arith.maximumf %193, %194 : vector<32x8xf32>
    %c1_184 = arith.constant 1 : index
    %c0_185 = arith.constant 0 : index
    %196 = vector.load %arg25[%c1_184, %c0_185] : memref<34x256xf32, #tpu.memory_space<vmem>>, vector<32x8xf32>
    tpu.vector_store %arg25[%c1_184, %c0_185], %195 {strides = array<i32>} : memref<34x256xf32, #tpu.memory_space<vmem>>, vector<32x8xf32>,
    %c0_186 = arith.constant 0 : index
    %c0_187 = arith.constant 0 : index
    %197 = vector.load %arg25[%c0_186, %c0_187] : memref<34x256xf32, #tpu.memory_space<vmem>>, vector<32x8xf32>
    %198 = arith.truncf %197 : vector<32x8xf32> to vector<32x8xbf16>
    %c0_188 = arith.constant 0 : index
    %c0_189 = arith.constant 0 : index
    %c0_190 = arith.constant 0 : index
    %199 = vector.load %arg21[%c0_188, %c0_189, %c0_190] : memref<3x8x5xbf16, #tpu.memory_space<vmem>>, vector<1x8x5xbf16>
    %200 = vector.shape_cast %199 : vector<1x8x5xbf16> to vector<8x5xbf16>
    %cst_191 = arith.constant dense<0.000000e+00> : vector<32x5xf32>
    %201 = tpu.matmul %198, %200, %cst_191 {dimension_numbers = #tpu.dot_dimension_numbers<[1], [0], [0], [1], [0, 0, 1, 1], [], []>} : vector<32x8xbf16>, vector<8x5xbf16>, vector<32x5xf32> -> vector<32x5xf32>
    %c1_192 = arith.constant 1 : index
    %c0_193 = arith.constant 0 : index
    %202 = vector.load %arg25[%c1_192, %c0_193] : memref<34x256xf32, #tpu.memory_space<vmem>>, vector<32x8xf32>
    %203 = arith.truncf %202 : vector<32x8xf32> to vector<32x8xbf16>
    %c1_194 = arith.constant 1 : index
    %c0_195 = arith.constant 0 : index
    %c0_196 = arith.constant 0 : index
    %204 = vector.load %arg21[%c1_194, %c0_195, %c0_196] : memref<3x8x5xbf16, #tpu.memory_space<vmem>>, vector<1x8x5xbf16>
    %205 = vector.shape_cast %204 : vector<1x8x5xbf16> to vector<8x5xbf16>
    %cst_197 = arith.constant dense<0.000000e+00> : vector<32x5xf32>
    %206 = tpu.matmul %203, %205, %cst_197 {dimension_numbers = #tpu.dot_dimension_numbers<[1], [0], [0], [1], [0, 0, 1, 1], [], []>} : vector<32x8xbf16>, vector<8x5xbf16>, vector<32x5xf32> -> vector<32x5xf32>
    %207 = arith.addf %201, %206 : vector<32x5xf32>
    %c2_198 = arith.constant 2 : index
    %c0_199 = arith.constant 0 : index
    %208 = vector.load %arg25[%c2_198, %c0_199] : memref<34x256xf32, #tpu.memory_space<vmem>>, vector<32x8xf32>
    %209 = arith.truncf %208 : vector<32x8xf32> to vector<32x8xbf16>
    %c2_200 = arith.constant 2 : index
    %c0_201 = arith.constant 0 : index
    %c0_202 = arith.constant 0 : index
    %210 = vector.load %arg21[%c2_200, %c0_201, %c0_202] : memref<3x8x5xbf16, #tpu.memory_space<vmem>>, vector<1x8x5xbf16>
    %211 = vector.shape_cast %210 : vector<1x8x5xbf16> to vector<8x5xbf16>
    %cst_203 = arith.constant dense<0.000000e+00> : vector<32x5xf32>
    %212 = tpu.matmul %209, %211, %cst_203 {dimension_numbers = #tpu.dot_dimension_numbers<[1], [0], [0], [1], [0, 0, 1, 1], [], []>} : vector<32x8xbf16>, vector<8x5xbf16>, vector<32x5xf32> -> vector<32x5xf32>
    %213 = arith.addf %207, %212 : vector<32x5xf32>
    %c0_204 = arith.constant 0 : index
    %c0_205 = arith.constant 0 : index
    %214 = vector.load %arg22[%c0_204, %c0_205] : memref<1x5xf32, #tpu.memory_space<vmem>>, vector<1x5xf32>
    %215 = vector.broadcast %214 : vector<1x5xf32> to vector<32x5xf32>
    %216 = arith.addf %213, %215 : vector<32x5xf32>
    %c0_206 = arith.constant 0 : index
    %c0_207 = arith.constant 0 : index
    %c0_208 = arith.constant 0 : index
    %217 = vector.load %arg23[%c0_206, %c0_207, %c0_208] : memref<1x32x5xf32, #tpu.memory_space<vmem>>, vector<1x32x5xf32>
    %218 = vector.shape_cast %217 : vector<1x32x5xf32> to vector<32x5xf32>
    %219 = vector.shape_cast %216 : vector<32x5xf32> to vector<1x32x5xf32>
    tpu.vector_store %arg23[%c0_206, %c0_207, %c0_208], %219 {strides = array<i32>} : memref<1x32x5xf32, #tpu.memory_space<vmem>>, vector<1x32x5xf32>,
    return
  }
  func.func @transform_0(%arg0: i32) -> (i32, i32, i32) {
    %c0_i32 = arith.constant 0 : i32
    %c0_i32_0 = arith.constant 0 : i32
    %c0_i32_1 = arith.constant 0 : i32
    return %arg0, %c0_i32, %c0_i32_0 : i32, i32, i32
  }
  func.func @transform_1(%arg0: i32) -> (i32, i32, i32) {
    %c0_i32 = arith.constant 0 : i32
    %c0_i32_0 = arith.constant 0 : i32
    %c0_i32_1 = arith.constant 0 : i32
    return %arg0, %c0_i32, %c0_i32_0 : i32, i32, i32
  }
  func.func @transform_2(%arg0: i32) -> (i32, i32, i32) {
    %c0_i32 = arith.constant 0 : i32
    %c0_i32_0 = arith.constant 0 : i32
    %c0_i32_1 = arith.constant 0 : i32
    %c0_i32_2 = arith.constant 0 : i32
    return %c0_i32, %c0_i32_0, %c0_i32_1 : i32, i32, i32
  }
  func.func @transform_3(%arg0: i32) -> (i32, i32) {
    %c0_i32 = arith.constant 0 : i32
    %c0_i32_0 = arith.constant 0 : i32
    %c0_i32_1 = arith.constant 0 : i32
    return %c0_i32, %c0_i32_0 : i32, i32
  }
  func.func @transform_4(%arg0: i32) -> (i32, i32, i32) {
    %c0_i32 = arith.constant 0 : i32
    %c0_i32_0 = arith.constant 0 : i32
    %c0_i32_1 = arith.constant 0 : i32
    %c0_i32_2 = arith.constant 0 : i32
    return %c0_i32, %c0_i32_0, %c0_i32_1 : i32, i32, i32
  }
  func.func @transform_5(%arg0: i32) -> (i32, i32) {
    %c0_i32 = arith.constant 0 : i32
    %c0_i32_0 = arith.constant 0 : i32
    %c0_i32_1 = arith.constant 0 : i32
    return %c0_i32, %c0_i32_0 : i32, i32
  }
  func.func @transform_6(%arg0: i32) -> (i32, i32, i32) {
    %c0_i32 = arith.constant 0 : i32
    %c0_i32_0 = arith.constant 0 : i32
    %c0_i32_1 = arith.constant 0 : i32
    %c0_i32_2 = arith.constant 0 : i32
    return %c0_i32, %c0_i32_0, %c0_i32_1 : i32, i32, i32
  }
  func.func @transform_7(%arg0: i32) -> (i32, i32) {
    %c0_i32 = arith.constant 0 : i32
    %c0_i32_0 = arith.constant 0 : i32
    %c0_i32_1 = arith.constant 0 : i32
    return %c0_i32, %c0_i32_0 : i32, i32
  }
  func.func @transform_8(%arg0: i32) -> (i32, i32, i32) {
    %c0_i32 = arith.constant 0 : i32
    %c0_i32_0 = arith.constant 0 : i32
    %c0_i32_1 = arith.constant 0 : i32
    %c0_i32_2 = arith.constant 0 : i32
    return %c0_i32, %c0_i32_0, %c0_i32_1 : i32, i32, i32
  }
  func.func @transform_9(%arg0: i32) -> (i32, i32) {
    %c0_i32 = arith.constant 0 : i32
    %c0_i32_0 = arith.constant 0 : i32
    %c0_i32_1 = arith.constant 0 : i32
    return %c0_i32, %c0_i32_0 : i32, i32
  }
  func.func @transform_10(%arg0: i32) -> (i32, i32) {
    %c0_i32 = arith.constant 0 : i32
    %c0_i32_0 = arith.constant 0 : i32
    %c0_i32_1 = arith.constant 0 : i32
    return %c0_i32, %c0_i32_0 : i32, i32
  }
  func.func @transform_11(%arg0: i32) -> (i32, i32) {
    %c0_i32 = arith.constant 0 : i32
    %c0_i32_0 = arith.constant 0 : i32
    %c0_i32_1 = arith.constant 0 : i32
    return %c0_i32, %c0_i32_0 : i32, i32
  }
  func.func @transform_12(%arg0: i32) -> (i32, i32) {
    %c0_i32 = arith.constant 0 : i32
    %c0_i32_0 = arith.constant 0 : i32
    %c0_i32_1 = arith.constant 0 : i32
    return %c0_i32, %c0_i32_0 : i32, i32
  }
  func.func @transform_13(%arg0: i32) -> (i32, i32) {
    %c0_i32 = arith.constant 0 : i32
    %c0_i32_0 = arith.constant 0 : i32
    %c0_i32_1 = arith.constant 0 : i32
    return %c0_i32, %c0_i32_0 : i32, i32
  }
  func.func @transform_14(%arg0: i32) -> (i32, i32, i32) {
    %c0_i32 = arith.constant 0 : i32
    %c0_i32_0 = arith.constant 0 : i32
    %c0_i32_1 = arith.constant 0 : i32
    %c0_i32_2 = arith.constant 0 : i32
    return %c0_i32, %c0_i32_0, %c0_i32_1 : i32, i32, i32
  }
  func.func @transform_15(%arg0: i32) -> (i32, i32) {
    %c0_i32 = arith.constant 0 : i32
    %c0_i32_0 = arith.constant 0 : i32
    %c0_i32_1 = arith.constant 0 : i32
    return %c0_i32, %c0_i32_0 : i32, i32
  }
  func.func @transform_16(%arg0: i32) -> (i32, i32, i32) {
    %c0_i32 = arith.constant 0 : i32
    %c0_i32_0 = arith.constant 0 : i32
    %c0_i32_1 = arith.constant 0 : i32
    %c0_i32_2 = arith.constant 0 : i32
    return %c0_i32, %c0_i32_0, %c0_i32_1 : i32, i32, i32
  }
  func.func @transform_17(%arg0: i32) -> (i32, i32) {
    %c0_i32 = arith.constant 0 : i32
    %c0_i32_0 = arith.constant 0 : i32
    %c0_i32_1 = arith.constant 0 : i32
    return %c0_i32, %c0_i32_0 : i32, i32
  }
  func.func @transform_18(%arg0: i32) -> (i32, i32, i32) {
    %c0_i32 = arith.constant 0 : i32
    %c0_i32_0 = arith.constant 0 : i32
    %c0_i32_1 = arith.constant 0 : i32
    %c0_i32_2 = arith.constant 0 : i32
    return %c0_i32, %c0_i32_0, %c0_i32_1 : i32, i32, i32
  }
  func.func @transform_19(%arg0: i32) -> (i32, i32) {
    %c0_i32 = arith.constant 0 : i32
    %c0_i32_0 = arith.constant 0 : i32
    %c0_i32_1 = arith.constant 0 : i32
    return %c0_i32, %c0_i32_0 : i32, i32
  }
  func.func @transform_20(%arg0: i32) -> (i32, i32, i32) {
    %c0_i32 = arith.constant 0 : i32
    %c0_i32_0 = arith.constant 0 : i32
    %c0_i32_1 = arith.constant 0 : i32
    %c0_i32_2 = arith.constant 0 : i32
    return %c0_i32, %c0_i32_0, %c0_i32_1 : i32, i32, i32
  }
  func.func @transform_21(%arg0: i32) -> (i32, i32) {
    %c0_i32 = arith.constant 0 : i32
    %c0_i32_0 = arith.constant 0 : i32
    %c0_i32_1 = arith.constant 0 : i32
    return %c0_i32, %c0_i32_0 : i32, i32
  }
  func.func @transform_22(%arg0: i32) -> (i32, i32, i32) {
    %c0_i32 = arith.constant 0 : i32
    %c0_i32_0 = arith.constant 0 : i32
    %c0_i32_1 = arith.constant 0 : i32
    return %arg0, %c0_i32, %c0_i32_0 : i32, i32, i32
  }
  func.func @transform_23(%arg0: i32) -> (i32, i32, i32) {
    %c0_i32 = arith.constant 0 : i32
    %c0_i32_0 = arith.constant 0 : i32
    %c0_i32_1 = arith.constant 0 : i32
    return %arg0, %c0_i32, %c0_i32_0 : i32, i32, i32
  }
}

</mosaic_0001>

<bundles_post_ra>
// kernel: _lambda_.1
= control target key start
LH: loop header
LB: loop body
LE: loop exit
PB: predicated region body
PF: predicated region fallthrough
CT: control target
= control target key end

     0   :  { %s6000_s0 = inlined_call_operand.vmem [shape: f32[2,32,5], index: 0, kind: input, shape index: {}]   ;;  %s6001_s1 = inlined_call_operand.hbm [shape: f32[2,32,128], index: 1, kind: input, shape index: {}]   ;;  %s6002_s2 = inlined_call_operand.vmem [shape: bf16[3,5,8], index: 2, kind: input, shape index: {}]   ;;  %s6003_s3 = inlined_call_operand.vmem [shape: f32[1,8], index: 3, kind: input, shape index: {}]   ;;  %s6004_s4 = inlined_call_operand.vmem [shape: bf16[3,8,8], index: 4, kind: input, shape index: {}]   ;;  %s6005_s5 = inlined_call_operand.hbm [shape: f32[1,8], index: 5, kind: input, shape index: {}]   ;;  %s6006_s6 = inlined_call_operand.vmem [shape: bf16[3,8,128], index: 6, kind: input, shape index: {}]   ;;  %s6007_s7 = inlined_call_operand.hbm [shape: f32[1,128], index: 7, kind: input, shape index: {}]   ;;  %s6008_s8 = inlined_call_operand.hbm [shape: bf16[3,128,256], index: 8, kind: input, shape index: {}]   ;;  %s6009_s9 = inlined_call_operand.hbm [shape: f32[1,256], index: 9, kind: input, shape index: {}]   ;;  %s6010_s10 = inlined_call_operand.vmem [shape: bf16[256,256], index: 10, kind: input, shape index: {}]   ;;  %s6011_s11 = inlined_call_operand.vmem [shape: f32[1,256], index: 11, kind: input, shape index: {}]   ;;  %s6012_s12 = inlined_call_operand.hbm [shape: bf16[128,256], index: 12, kind: input, shape index: {}]   ;;  %s6013_s13 = inlined_call_operand.vmem [shape: f32[1,256], index: 13, kind: input, shape index: {}]   ;;  %s6014_s14 = inlined_call_operand.hbm [shape: bf16[3,256,128], index: 14, kind: input, shape index: {}]   ;;  %s6015_s15 = inlined_call_operand.vmem [shape: f32[1,128], index: 15, kind: input, shape index: {}]   ;;  %s6016_s16 = inlined_call_operand.vmem [shape: bf16[3,128,8], index: 16, kind: input, shape index: {}]   ;;  %s6017_s17 = inlined_call_operand.vmem [shape: f32[1,8], index: 17, kind: input, shape index: {}]   ;;  %s6018_s18 = inlined_call_operand.vmem [shape: bf16[3,8,8], index: 18, kind: input, shape index: {}]   ;;  %s6019_s19 = inlined_call_operand.vmem [shape: f32[1,8], index: 19, kind: input, shape index: {}]   ;;  %s6020_s20 = inlined_call_operand.vmem [shape: bf16[3,8,5], index: 20, kind: input, shape index: {}]   ;;  %s6021_s21 = inlined_call_operand.vmem [shape: f32[1,5], index: 21, kind: input, shape index: {}]   ;;  %s6022_s22 = inlined_call_operand.vmem [shape: f32[2,32,5], index: 22, kind: output, shape index: {0}]   ;;  %s6023_s23 = inlined_call_operand.vmem [shape: f32[2,32,256], index: 23, kind: output, shape index: {1}]  }
   0x1   :  { %6031 = sst [smem:[#allocation18_spill]] %s6000_s0 }
   0x2   :  { %6032 = sst [smem:[#allocation19_spill]] %s6001_s1 }
   0x3   :  { %6033 = sst [smem:[#allocation20_spill]] %s6002_s2 }
   0x4   :  { %6034 = sst [smem:[#allocation21_spill]] %s6003_s3 }
   0x5   :  { %6035 = sst [smem:[#allocation22_spill]] %s6004_s4 }
   0x6   :  { %6036 = sst [smem:[#allocation23_spill]] %s6005_s5 }
   0x7   :  { %6037 = sst [smem:[#allocation24_spill]] %s6006_s6 }
   0x8   :  { %6038 = sst [smem:[#allocation25_spill]] %s6007_s7 }
   0x9   :  { %6039 = sst [smem:[#allocation26_spill]] %s6008_s8 }
   0xa   :  { %6040 = sst [smem:[#allocation27_spill]] %s6009_s9 }
   0xb   :  { %6041 = sst [smem:[#allocation28_spill]] %s6017_s17 }
   0xc   :  { %6042 = sst [smem:[#allocation29_spill]] %s6019_s19 }
   0xd   :  { %6043 = sst [smem:[#allocation30_spill]] %s6020_s20 }
   0xe   :  { %6044 = sst [smem:[#allocation31_spill]] %s6021_s21 }
   0xf   :  { %6045 = sst [smem:[#allocation32_spill]] %s6022_s22 }
  0x10   :  { %29 = vsyncpa [#allocation4], 0 }
  0x11   :  { %31 = vsyncpa [#allocation4 + $0x1], 0 }
  0x12   :  { %32 = vsyncpa [#allocation6], 0 }
  0x13   :  { %33 = vsyncpa [#allocation9], 0 }
  0x14   :  { %34 = vsyncpa [#allocation12], 0  ;;  %s5299_s4 = smov 0   ;;  %s5301_s30 = smov 0  }
  0x15   :  { %s5303_s24 = smov 0   ;;  %s5305_s25 = smov 0  }
  0x16 LB: > { %s6046_s26 = sld [smem:[#allocation23_spill]]  ;;  %s5323_s6 = sadd.s32 4294967295, %s5165_s25   ;;  %s5165_s25 = sphi %s5305_s25, %s6071_s25   ;;  %s5161_s24 = sphi %s5303_s24, %s6070_s24   ;;  %s5157_s30 = sphi %s5301_s30, %s6069_s30   ;;  %s5153_s4 = sphi %s5299_s4, %s6068_s4  }
  0x17   : > { %p3837_p0 = scmp.ge.s32.totalorder %s5165_s25, 1  ;;  %p87_p1 = scmp.eq.s32.totalorder %s5323_s6, 0 }
  0x18   : > { %p569_p2 = scmp.lt.s32.totalorder %s5165_s25, 3  ;;  %s5167_s7 = smov [#allocation5]  }
  0x19   : > { %s592_s28 = sshll.u32 %s5167_s7, 4  ;;  %s6048_s8 = sld [smem:[#allocation26_spill]]  ;;  %s593_s28 = int_to_ptr.vmem [resolvable:$true] %s592_s28 }
  0x1a   : > { %p5328_p3 = pnand %p3837_p0, %p569_p2  ;;  %s5168_s1 = smov [#allocation8]  }
  0x1b   : > { %s6029_s7 = smov 128   ;;  %s6030_s22 = smov 8  }
  0x1c   : > { %s590_s2 = sshll.u32 %s6046_s26, 4  ;;  %p4806_p4 = pneg %p5328_p3  ;;  %s591_s2 = int_to_ptr.hbm [resolvable:$true] %s590_s2 }
  0x1d   : > { %s618_s26 = sshll.u32 %s5168_s1, 4  ;;  %s5171_s21 = smov [#allocation11]   ;;  %s619_s26 = int_to_ptr.vmem [resolvable:$true] %s618_s26 }
  0x1e   : > { %p5339_p5 = pnand %p4806_p4, %p87_p1  ;;  %s650_s19 = sshll.u32 %s5171_s21, 4  ;;  %s651_s19 = int_to_ptr.vmem [resolvable:$true] %s650_s19 }
  0x1f   : > { %s616_s0 = sshll.u32 %s6048_s8, 4  ;;  %s648_s8 = sshll.u32 %s6012_s12, 4  ;;  %s617_s0 = int_to_ptr.hbm [resolvable:$true] %s616_s0  ;;  %s649_s8 = int_to_ptr.hbm [resolvable:$true] %s648_s8 }
  0x20   : > { %4809 = dma.hbm_to_vmem [thread:$0]  (!%p5339_p5), %s591_s2, 16, %s593_s28, [#allocation6]  }
  0x21   : > { %4815 = dma.hbm_to_vmem [thread:$0]  (!%p5339_p5), %s617_s0, 6144, %s619_s26, [#allocation9], %s6029_s7, %s6029_s7, %s6030_s22  }
  0x22   : > { %s6050_s2 = sld [smem:[#allocation25_spill]]  ;;  %s5172_s0 = smov [#allocation7]  }
  0x23   : > { %4821 = dma.hbm_to_vmem [thread:$0]  (!%p5339_p5), %s649_s8, 2048, %s651_s19, [#allocation12], %s6029_s7, %s6029_s7, %s6030_s22  }
  0x24   : > { %s607_s26 = sshll.u32 %s5172_s0, 4  ;;  %s6051_s9 = sld [smem:[#allocation27_spill]]  ;;  %s608_s26 = int_to_ptr.vmem [resolvable:$true] %s607_s26 }
  0x25   : > { %s665_s1 = sshll.u32 %s6014_s14, 4  ;;  %s5173_s8 = smov [#allocation10]   ;;  %s666_s1 = int_to_ptr.hbm [resolvable:$true] %s665_s1 }
  0x26   : > { %s633_s19 = sshll.u32 %s5173_s8, 4  ;;  %s5174_s17 = smov [#allocation13]   ;;  %s634_s19 = int_to_ptr.vmem [resolvable:$true] %s633_s19 }
  0x27   : > { %s5176_s0 = smov 4   ;;  %s73_s20 = sadd.s32 1, %s5161_s24 }
  0x28   : > { %s605_s28 = sshll.u32 %s6050_s2, 4  ;;  %s667_s2 = sshll.u32 %s5174_s17, 4  ;;  %s606_s28 = int_to_ptr.hbm [resolvable:$true] %s605_s28  ;;  %s668_s2 = int_to_ptr.vmem [resolvable:$true] %s667_s2 }
  0x29   : > { %4812 = dma.hbm_to_vmem [thread:$0]  (!%p5339_p5), %s606_s28, 16, %s608_s26, [#allocation6]  }
  0x2a   : > { %s631_s3 = sshll.u32 %s6051_s9, 4  ;;  %s5175_s28 = smov 64   ;;  %s632_s3 = int_to_ptr.hbm [resolvable:$true] %s631_s3 }
  0x2b   : > { %4818 = dma.hbm_to_vmem [thread:$0]  (!%p5339_p5), %s632_s3, 32, %s634_s19, [#allocation9]  }
  0x2c   : > { %4824 = dma.hbm_to_vmem [thread:$0]  (!%p5339_p5), %s666_s1, 6144, %s668_s2, [#allocation12], %s5175_s28, %s5175_s28, %s5176_s0  }
  0x2d   : > { %s5374_s26 = sadd.s32 1, %s5165_s25   ;;  %p80_p7 = scmp.ne.s32.totalorder %s5161_s24, %s5157_s30 }
  0x2e   : > { %s70_s29 = ssub.s32 %s5165_s25, %s5374_s26  ;;  %p81_p8 = scmp.eq.s32.totalorder %s5165_s25, 0 }
  0x2f   : > { %p71_p6 = scmp.eq.s32.totalorder %s70_s29, 0  ;;  %p86_p9 = scmp.ne.s32.totalorder %s5157_s30, %s5153_s4 }
  0x30   : > { %p4835_p11 = scmp.lt.s32.totalorder %s5165_s25, 2  ;;  %s710_s8 = sand.u32 1, %s5161_s24  }
  0x31   : > { %s5385_s3 = scalar_select %p71_p6, %s5161_s24, %s73_s20  }
  0x32   : > { %p5389_p10 = por %p87_p1, %p86_p9  ;;  %s4608_s5 = sshll.u32 %s5165_s25, 5 }
  0x33   : > { %p82_p12 = por %p81_p8, %p80_p7  ;;  %s3845_s1 = sshll.u32 %s710_s8, 5 }
  0x34   : > { %s6053_s2 = sld [smem:[#allocation19_spill]]  ;;  %s714_s29 = scalar_lea.vmem [#allocation3], %s3845_s1 }
  0x35   : > { %s722_s7 = sshll.u32 %s714_s29, 4  ;;  %p5399_p13 = pnand %p4835_p11, %p82_p12  ;;  %s723_s7 = int_to_ptr.vmem [resolvable:$true] %s722_s7 }
  0x36   : > { %s711_s20 = scalar_lea.sflag [#allocation4], %s710_s8 }
  0x37   : > { %p5093_p2 = pneg %p5399_p13 }
  0x3a   : > { %s719_s28 = scalar_lea.hbm %s6053_s2, %s4608_s5  ;;  %s5096_s1 = scalar_lea.hbm %s6053_s2, 64 }
  0x3b   : > { %s720_s0 = sshll.u32 %s719_s28, 4  ;;  %s721_s0 = int_to_ptr.hbm [resolvable:$true] %s720_s0 }
  0x3c   : > { %s5089_s22 = sshra.s32 %s721_s0, 4  ;;  %s5090_s22 = int_to_ptr.hbm [resolvable:$true] %s5089_s22 }
  0x3d   : > { %s5091_s25 = scalar_lea.hbm %s5090_s22, 32  ;;  %p5097_p6 = scmp.lt.s32.totalorder %s5090_s22, %s6053_s2 }
  0x3e   : > { %p5092_p0 = scmp.ne.s32.totalorder %s5090_s22, %s5091_s25  ;;  %p5098_p7 = scmp.lt.s32.totalorder %s5096_s1, %s5091_s25 }
  0x40   : > { %p5094_p4 = pnand %p5093_p2, %p5092_p0  ;;  %p5099_p8 = por %p5098_p7, %p5097_p6 }
  0x42   : > { %p5095_p5 = pneg %p5094_p4 }
  0x44   : > { %p5100_p9 = pnand %p5099_p8, %p5095_p5 }
  0x46   : > { %5103 = shalt.err (!%p5100_p9)
}
  0x47   : > { %s6055_s8 = smov 8   ;;  %s6056_s29 = smov 128  }
  0x48   : > { %4828 = dma.hbm_to_vmem [thread:$0]  (!%p5399_p13), %s721_s0, 512, %s723_s7, %s711_s20, %s6056_s29, %s6056_s29, %s6055_s8  }
  0x49   : > { %734 = sbr.rel (%p5328_p3) target bundleno = 1888 (0x760), region = 108  ;;  %s736_s5 = sand.u32 (!%p5328_p3), 1, %s5157_s30  }
  0x4a   : > { %s3849_s19 = sshll.u32 (!%p5328_p3), %s736_s5, 5  ;;  %s737_s9 = scalar_lea.sflag (!%p5328_p3), [#allocation4], %s736_s5 }
  0x4b   : > { %s5419_s17 = scalar_lea.vmem (!%p5328_p3), [#allocation3], %s3849_s19 }
  0x4e   : > { %5136 = dma.done.wait (%p5389_p10), %s737_s9, 512  }
  0x4f   : > { %5138 = vsyncadd (%p5389_p10), %s737_s9, 4294966784 }
  0x50   : > { %5140 = dma.done.wait (%p87_p1), [#allocation6], 32  }
  0x51   : > { %5142 = vsyncadd (%p87_p1), [#allocation6], 4294967264 }
  0x52   : > { %5144 = dma.done.wait (%p87_p1), [#allocation9], 6176  }
  0x53   : > { %5146 = vsyncadd (%p87_p1), [#allocation9], 4294961120 }
  0x54   : > { %5148 = dma.done.wait (%p87_p1), [#allocation12], 8192  }
  0x55   : > { %5150 = vsyncadd (%p87_p1), [#allocation12], 4294959104  ;;  %vm938_vm0 = vcmask 1041408   ;;  %p844_p3 = scmp.lt.s32.totalorder %s5323_s6, 1  ;;  %v860_v0 = vlaneseq  ;;  %vm939_vm1 = vcmask 1042432   ;;  %v5177_v1 = vmov 65535  }
  0x56   : > { %v940_v2 = vsel %vm938_vm0, 4294967295, %v5177_v1  ;;  %v5178_v3 = vmov 0.0   ;;  %s6057_s7 = sld [smem:[#allocation18_spill]]  ;;  %vm877_vm3 = vcmask 1040384   ;;  %vm890_vm4 = vcmask 39937  }
  0x57   : > { %s6073_s6 = smov (!%p844_p3, %s5323_s6), 1  ;;  %vm862_vm2 = vcmp.lt.s32.totalorder %v860_v0, 256  ;;  %v941_v4 = vsel %vm939_vm1, %v940_v2, 0  ;;  %s6058_s20 = sld [smem:[#allocation20_spill]]  ;;  %vm892_vm5 = vcmask 39936   ;;  %vm896_vm6 = vcmask 32768  }
  0x58   : > { %864 = vst.msk [vmem:[#allocation2] ss:$8 sm:$0x3] %vm862_vm2, %v5178_v3  ;;  %s4609_s9 = sshll.u32 %s6073_s6, 5  ;;  %vm1000_vm7 = vcmask 1046528   ;;  %s6059_s19 = sld [smem:[#allocation22_spill]] }
  0x59   : > { %867 = vst.msk [vmem:[#allocation2 + $0x41] ss:$8 sm:$0x3] %vm862_vm2, %v5178_v3  ;;  %vm911_vm8 = vsmask.f32 7424  ;;  %vm1113_vm9 = vcmask 1043456  }
  0x5a   : > { %vm1066_vm10 = vcmask 64513   ;;  %vm1068_vm11 = vcmask 64512   ;;  %vm1072_vm12 = vcmask 57344   ;;  %s6061_s8 = sld [smem:[#allocation24_spill]]  ;;  %s4611_s22 = sshll.u32 %s6073_s6, 6 }
  0x5b   : > { %s6063_s25 = sld [smem:[#allocation30_spill]] }
  0x5c   : > { %s848_s21 = scalar_lea.vmem %s6057_s7, %s4609_s9  ;;  %s6060_s7 = sld [smem:[#allocation21_spill]] }
  0x5d   : > { %v904_v5 = vld [vmem:[%s6058_s20] sm:$0x7]  ;;  %v870_v7 = vld [vmem:[%s848_s21 + $0x8] sm:$0xff]  ;;  %v871_v12 = vld [vmem:[%s848_s21 + $0x10] sm:$0xff]  ;;  %s6066_s4 = sld [smem:[#allocation31_spill]] }
  0x5e   : > { %v869_v6 = vld [vmem:[%s848_s21] sm:$0xff]  ;;  %v970_v8 = vand.u32 %v941_v4, %v904_v5  ;;  %v879_v10 = vrot.slane %v870_v7, 7  ;;  %v3867_v11 = vld [vmem:[%s6058_s20 + $0x8] sm:$0x7]  ;;  %v872_v13 = vld [vmem:[%s848_s21 + $0x18] sm:$0xff]  ;;  %v881_v15 = vrot.slane %v871_v12, 7  ;;  %s5763_s21 = scalar_lea.vmem %s6023_s23, %s4611_s22 }
  0x5f   : > { %v878_v9 = vrot.slane %v869_v6, 7  ;;  %v1013_v14 = vand.u32 %v3867_v11, %v941_v4  ;;  %v883_v16 = vrot.slane %v872_v13, 7  ;;  %v3862_v17 = vld [vmem:[%s6058_s20 + $0x4] sm:$0x7]  ;;  %v1080_v54 = vld [vmem:[%s6059_s19] sm:$0xf] }
  0x60   : > { %979 = vmatpush.bf16.msra.mxu1 %v970_v8  ;;  %v943_v19 = vand.u32 %v3862_v17, %v941_v4  ;;  %v882_v20 = vsel %vm877_vm3, %v879_v10, %v881_v15  ;;  %v1142_v55 = vsel %vm1113_vm9, %v1080_v54, 0  ;;  %v3875_v62 = vld [vmem:[%s6059_s19 + $0x8] sm:$0xf]  ;;  %s6062_s22 = sld [smem:[#allocation28_spill]] }
  0x61   : > { %v880_v18 = vsel %vm877_vm3, %v878_v9, %v879_v10  ;;  %891 = vst.msk [vmem:[#allocation2] sm:$0xfe] %vm890_vm4, %v878_v9  ;;  %1022 = vmatpush.bf16.msra.mxu2 %v1013_v14  ;;  %v884_v21 = vsel %vm877_vm3, %v881_v15, %v883_v16  ;;  %v1184_v0 = vsel %vm1113_vm9, %v3875_v62, 0  ;;  %v3870_v10 = vld [vmem:[%s6059_s19 + $0x4] sm:$0xf]  ;;  %s6064_s1 = smov %s6063_s25  ;;  %s6067_s29 = sld [smem:[#allocation32_spill]] }
  0x62   : > { %893 = vst.msk [vmem:[#allocation2 + $0x10] sm:$0xff] %vm892_vm5, %v880_v18  ;;  %952 = vmatpush.bf16.msra.mxu0 %v943_v19  ;;  %v4886_v58 = vld [vmem:[%s6060_s7] ss:$0 sm:$0xff]  ;;  %v1115_v13 = vsel %vm1113_vm9, %v3870_v10, 0 }
  0x63   : > { %894 = vst.msk [vmem:[#allocation2 + $0x20] sm:$0xff] %vm892_vm5, %v882_v20  ;;  %1124 = vmatpush.bf16.msra.mxu3 %v1115_v13  ;;  %v1248_v62 = vld [vmem:[%s6061_s8] sm:$0xf] }
  0x64   : > { %895 = vst.msk [vmem:[#allocation2 + $0x30] sm:$0xff] %vm892_vm5, %v884_v21  ;;  %1193 = vmatpush.bf16.msrb.mxu1 %v1184_v0  ;;  %v1309_v0 = vsel %vm1113_vm9, %v1248_v62, 0 }
  0x65   : > { %897 = vst.msk [vmem:[#allocation2 + $0x40] sm:$0x1] %vm896_vm6, %v883_v16 }
  0x66   : > { %1151 = vmatpush.bf16.msrb.mxu0 %v1142_v55 }
  0x67   : > { %1318 = vmatpush.bf16.msrb.mxu3 %v1309_v0  ;;  %s853_s5 = scalar_lea.vmem %s6067_s29, %s4609_s9 }
  0x68   : > { %v898_v22 = vld [vmem:[#allocation2] sm:$0xff] }
  0x69   : > { %v991_v23 = vld [vmem:[#allocation2] sm:$0xfc]  ;;  %v899_v25 = vld [vmem:[#allocation2 + $0x10] sm:$0xff] }
  0x6a   : > { %v905_v24 = vld [vmem:[#allocation2] sm:$0xfe]  ;;  %v902_v26 = vpack.c.bf16 %v899_v25, %v898_v22  ;;  %v993_v28 = vpack.c.bf16 %v899_v25, %v991_v23 }
  0x6b   : > { %v900_v27 = vld [vmem:[#allocation2 + $0x20] sm:$0xff]  ;;  %v907_v29 = vpack.c.bf16 %v899_v25, %v905_v24  ;;  %v901_v30 = vld [vmem:[#allocation2 + $0x30] sm:$0xff] }
  0x6c   : > { %3865 = vmatmul.msk.bf16.vlgmr.msra.gmra.mxu1 %vm892_vm5, %v902_v26  ;;  %v903_v31 = vpack.c.bf16 %v901_v30, %v900_v27  ;;  %v1001_v32 = vrot.slane %v993_v28, 1  ;;  %v906_v41 = vld [vmem:[#allocation2 + $0x40] sm:$0x1] }
  0x6d   : > { %v913_v33 = vshrl.u32 %v907_v29, 16  ;;  %v915_v34 = vshll.u32 %v907_v29, 16  ;;  %v992_v43 = vld [vmem:[#allocation2 + $0x40] sm:$0x3]  ;;  %v908_v44 = vpack.c.bf16 %v906_v41, %v906_v41 }
  0x6e   : > { %v1002_v35 = vrot.slane %v903_v31, 1  ;;  %v920_v37 = vshll.u32 %v903_v31, 16  ;;  %v994_v45 = vpack.c.bf16 %v992_v43, %v992_v43  ;;  %v924_v46 = vshrl.u32 %v903_v31, 16 }
  0x6f   : > { %v917_v36 = vrot.slane %v915_v34, 1  ;;  %v928_v47 = vshll.u32 %v908_v44, 16 }
  0x70   : > { %v1003_v38 = vsel %vm1000_vm7, %v1001_v32, %v1002_v35  ;;  %v922_v40 = vrot.slane %v920_v37, 1  ;;  %v1004_v48 = vrot.slane %v994_v45, 1 }
  0x71   : > { %v918_v39 = vor.u32 %v917_v36, %v913_v33  ;;  %3868 = vmatmul.msk.bf16.vlgmr.msra.gmra.mxu2 %vm892_vm5, %v1003_v38  ;;  %v930_v50 = vrot.slane %v928_v47, 1 }
  0x72   : > { %v926_v49 = vor.u32 %v924_v46, %v922_v40  ;;  %v1005_v51 = vsel %vm1000_vm7, %v1002_v35, %v1004_v48 }
  0x73   : > { %v923_v42 = vsel %vm911_vm8, %v918_v39, %v922_v40 }
  0x74   : > { %3863 = vmatmul.msk.bf16.vlgmr.msra.gmra.mxu0 %vm892_vm5, %v923_v42  ;;  %v931_v52 = vsel %vm911_vm8, %v926_v49, %v930_v50 }
  0x7c   : > { %3866 = vmatmul.msk.bf16.gmra.mxu1 %vm892_vm5, %v903_v31 }
  0x81   : > { %3869 = vmatmul.msk.bf16.gmra.mxu2 %vm892_vm5, %v1005_v51 }
  0x84   : > { %3864 = vmatmul.msk.bf16.gmra.mxu0 %vm892_vm5, %v931_v52 }
  0xe9   : > { %v981_v53 = vpop.f32.mrf.mxu1 }
  0xf1   : > { %v954_v56 = vpop.f32.mrf.mxu0  ;;  %v983_v59 = vpop.f32.mrf.mxu1 }
  0xf2   : > { %v982_v57 = vadd.f32 %v981_v53, %v954_v56 }
  0xf4   : > { %v1024_v60 = vpop.f32.mrf.mxu2 }
  0xf5   : > { %v1034_v61 = vadd.f32 %v1024_v60, %v982_v57 }
  0xf7   : > { %v1042_v63 = vadd.f32 %v4886_v58, %v1034_v61 }
  0xf9   : > { %v956_v1 = vpop.f32.mrf.mxu0  ;;  %v1046_v2 = vmax.f32 %v1042_v63, 0.0  ;;  %v986_v7 = vpop.f32.mrf.mxu1 }
  0xfa   : > { %v984_v3 = vadd.f32 %v983_v59, %v956_v1 }
  0xfb   : > { %v1054_v4 = vrot.slane %v1046_v2, 7  ;;  %v3878_v2 = vld [vmem:[%s6061_s8 + $0x4] sm:$0xf] }
  0xfc   : > { %v1026_v5 = vpop.f32.mrf.mxu2 }
  0xfd   : > { %1067 = vst.msk [vmem:[#allocation2] sm:$0xfe] %vm1066_vm10, %v1054_v4  ;;  %v1035_v6 = vadd.f32 %v1026_v5, %v984_v3  ;;  %v1282_v3 = vsel %vm1113_vm9, %v3878_v2, 0 }
  0xfe   : > { %1291 = vmatpush.bf16.msrb.mxu2 %v1282_v3 }
  0xff   : > { %v1043_v8 = vadd.f32 %v4886_v58, %v1035_v6  ;;  %v4887_v6 = vld [vmem:[#allocation5] ss:$0 sm:$0xff] }
 0x101   : > { %v959_v9 = vpop.f32.mrf.mxu0  ;;  %v1047_v11 = vmax.f32 %v1043_v8, 0.0  ;;  %v988_v19 = vpop.f32.mrf.mxu1 }
 0x102   : > { %v987_v12 = vadd.f32 %v986_v7, %v959_v9  ;;  %v3883_v9 = vld [vmem:[%s6061_s8 + $0x8] sm:$0xf] }
 0x103   : > { %v1055_v14 = vrot.slane %v1047_v11, 7  ;;  %v1351_v11 = vsel %vm1113_vm9, %v3883_v9, 0  ;;  %v4626_v9 = vld [vmem:[#allocation8 + $0x74] sm:$0xf] }
 0x104   : > { %v1029_v15 = vpop.f32.mrf.mxu2  ;;  %v1074_v27 = vld [vmem:[#allocation2] sm:$0xff]  ;;  %1360 = vmatpush.bf16.msra.mxu0 %v1351_v11  ;;  %v4010_v11 = vld [vmem:[#allocation8 + $0x78] sm:$0xf0] }
 0x105   : > { %v1056_v16 = vsel %vm877_vm3, %v1054_v4, %v1055_v14  ;;  %v1036_v17 = vadd.f32 %v1029_v15, %v987_v12  ;;  %v1081_v34 = vld [vmem:[#allocation2] sm:$0xfe] }
 0x106   : > { %1069 = vst.msk [vmem:[#allocation2 + $0x10] sm:$0xff] %vm1068_vm11, %v1056_v16  ;;  %v1163_v37 = vld [vmem:[#allocation2] sm:$0xfc] }
 0x107   : > { %v1044_v18 = vadd.f32 %v4886_v58, %v1036_v17 }
 0x109   : > { %v961_v20 = vpop.f32.mrf.mxu0  ;;  %v1048_v21 = vmax.f32 %v1044_v18, 0.0 }
 0x10a   : > { %v989_v22 = vadd.f32 %v988_v19, %v961_v20 }
 0x10b   : > { %v1057_v23 = vrot.slane %v1048_v21, 7 }
 0x10c   : > { %v1031_v24 = vpop.f32.mrf.mxu2 }
 0x10d   : > { %v1058_v25 = vsel %vm877_vm3, %v1055_v14, %v1057_v23  ;;  %v1037_v26 = vadd.f32 %v1031_v24, %v989_v22  ;;  %v1075_v28 = vld [vmem:[#allocation2 + $0x10] sm:$0xff] }
 0x10e   : > { %1070 = vst.msk [vmem:[#allocation2 + $0x20] sm:$0xff] %vm1068_vm11, %v1058_v25  ;;  %v1078_v29 = vpack.c.bf16 %v1075_v28, %v1074_v27  ;;  %v1083_v35 = vpack.c.bf16 %v1075_v28, %v1081_v34  ;;  %v1165_v38 = vpack.c.bf16 %v1075_v28, %v1163_v37 }
 0x10f   : > { %v1045_v30 = vadd.f32 %v4886_v58, %v1037_v26 }
 0x110   : > { %3873 = vmatmul.msk.bf16.vlgmr.msrb.gmra.mxu0 %vm1068_vm11, %v1078_v29  ;;  %v1090_v36 = vshll.u32 %v1083_v35, 16  ;;  %v1172_v43 = vrot.slane %v1165_v38, 1  ;;  %v1088_v45 = vshrl.u32 %v1083_v35, 16 }
 0x111   : > { %v1049_v31 = vmax.f32 %v1045_v30, 0.0 }
 0x112   : > { %v1092_v42 = vrot.slane %v1090_v36, 1 }
 0x113   : > { %v1059_v32 = vrot.slane %v1049_v31, 7 }
 0x114   : > { %v1093_v48 = vor.u32 %v1092_v42, %v1088_v45 }
 0x115   : > { %v1060_v33 = vsel %vm877_vm3, %v1057_v23, %v1059_v32  ;;  %1073 = vst.msk [vmem:[#allocation2 + $0x40] sm:$0x1] %vm1072_vm12, %v1059_v32  ;;  %v1076_v39 = vld [vmem:[#allocation2 + $0x20] sm:$0xff] }
 0x116   : > { %1071 = vst.msk [vmem:[#allocation2 + $0x30] sm:$0xff] %vm1068_vm11, %v1060_v33 }
 0x11c   : > { %v1164_v51 = vld [vmem:[#allocation2 + $0x40] sm:$0x3] }
 0x11d   : > { %v1077_v40 = vld [vmem:[#allocation2 + $0x30] sm:$0xff]  ;;  %v1082_v52 = vld [vmem:[#allocation2 + $0x40] sm:$0x1]  ;;  %v1166_v53 = vpack.c.bf16 %v1164_v51, %v1164_v51 }
 0x11e   : > { %v1079_v41 = vpack.c.bf16 %v1077_v40, %v1076_v39  ;;  %v1084_v54 = vpack.c.bf16 %v1082_v52, %v1082_v52 }
 0x11f   : > { %v1175_v55 = vrot.slane %v1166_v53, 1 }
 0x120   : > { %3874 = vmatmul.msk.bf16.gmra.mxu0 %vm1068_vm11, %v1079_v41  ;;  %v1173_v44 = vrot.slane %v1079_v41, 1  ;;  %v1095_v46 = vshll.u32 %v1079_v41, 16  ;;  %v1099_v56 = vshrl.u32 %v1079_v41, 16  ;;  %v1103_v57 = vshll.u32 %v1084_v54, 16 }
 0x122   : > { %v1174_v47 = vsel %vm1000_vm7, %v1172_v43, %v1173_v44  ;;  %v1097_v49 = vrot.slane %v1095_v46, 1  ;;  %v1176_v59 = vsel %vm1000_vm7, %v1173_v44, %v1175_v55  ;;  %v1105_v60 = vrot.slane %v1103_v57, 1 }
 0x123   : > { %3876 = vmatmul.msk.bf16.vlgmr.msrb.gmra.mxu1 %vm1068_vm11, %v1174_v47 }
 0x124   : > { %v1098_v50 = vsel %vm911_vm8, %v1093_v48, %v1097_v49  ;;  %v1101_v58 = vor.u32 %v1099_v56, %v1097_v49 }
 0x125   : > { %3871 = vmatmul.msk.bf16.vlgmr.msra.gmra.mxu3 %vm1068_vm11, %v1098_v50 }
 0x126   : > { %v1106_v61 = vsel %vm911_vm8, %v1101_v58, %v1105_v60 }
 0x133   : > { %3877 = vmatmul.msk.bf16.gmra.mxu1 %vm1068_vm11, %v1176_v59 }
 0x135   : > { %3872 = vmatmul.msk.bf16.gmra.mxu3 %vm1068_vm11, %v1106_v61 }
 0x18d   : > { %v1153_v63 = vpop.f32.mrf.mxu0 }
 0x195   : > { %v1155_v8 = vpop.f32.mrf.mxu0 }
 0x19d   : > { %v1158_v19 = vpop.f32.mrf.mxu0 }
 0x1a0   : > { %v1195_v1 = vpop.f32.mrf.mxu1 }
 0x1a5   : > { %v1160_v29 = vpop.f32.mrf.mxu0 }
 0x1a8   : > { %v1126_v4 = vpop.f32.mrf.mxu3  ;;  %v1197_v12 = vpop.f32.mrf.mxu1 }
 0x1a9   : > { %v1154_v5 = vadd.f32 %v1153_v63, %v1126_v4 }
 0x1ab   : > { %v1205_v7 = vadd.f32 %v1195_v1, %v1154_v5 }
 0x1ad   : > { %v1213_v10 = vadd.f32 %v4887_v6, %v1205_v7  ;;  %v4008_v7 = vld [vmem:[#allocation8 + $0x70] sm:$0xf] }
 0x1af   : > { %v1217_v13 = vmax.f32 %v1213_v10, 0.0 }
 0x1b0   : > { %v1128_v14 = vpop.f32.mrf.mxu3  ;;  %v1200_v21 = vpop.f32.mrf.mxu1 }
 0x1b1   : > { %v1225_v15 = vrot.slane %v1217_v13, 7  ;;  %v1156_v16 = vadd.f32 %v1155_v8, %v1128_v14  ;;  %v4627_v8 = vld [vmem:[#allocation8 + $0x74] sm:$0xf0]  ;;  %v4000_v13 = vld [vmem:[#allocation8 + $0x60] sm:$0xf] }
 0x1b2   : > { %v4009_v10 = vor.u32 %v4627_v8, %v4008_v7  ;;  %v4625_v14 = vld [vmem:[#allocation8 + $0x64] sm:$0xf0]  ;;  %v4639_v7 = vld [vmem:[#allocation8 + $0xd4] sm:$0xf0] }
 0x1b3   : > { %1237 = vst.msk [vmem:[#allocation2] sm:$0xfe] %vm1066_vm10, %v1225_v15  ;;  %v1206_v17 = vadd.f32 %v1197_v12, %v1156_v16  ;;  %v4013_v12 = vor.u32 %v4626_v9, %v4010_v11  ;;  %v4001_v16 = vor.u32 %v4625_v14, %v4000_v13  ;;  %v4636_v9 = vld [vmem:[#allocation8 + $0xc4] sm:$0xf]  ;;  %v3920_v11 = vld [vmem:[#allocation8 + $0xc0] sm:$0xf] }
 0x1b4   : > { %1672 = vmatpush.bf16.msra.mxu3 %v4009_v10  ;;  %v3922_v10 = vld [vmem:[#allocation8 + $0xc8] sm:$0xf0]  ;;  %v4637_v13 = vld [vmem:[#allocation8 + $0xc4] sm:$0xf0] }
 0x1b5   : > { %v1214_v18 = vadd.f32 %v4887_v6, %v1206_v17  ;;  %1691 = vmatpush.bf16.msrb.mxu0 %v4013_v12  ;;  %v4002_v17 = vld [vmem:[#allocation8 + $0x68] sm:$0xf0]  ;;  %v3925_v12 = vor.u32 %v4636_v9, %v3922_v10  ;;  %v3921_v14 = vor.u32 %v4637_v13, %v3920_v11 }
 0x1b7   : > { %v1218_v20 = vmax.f32 %v1214_v18, 0.0 }
 0x1b8   : > { %v1131_v22 = vpop.f32.mrf.mxu3  ;;  %v1202_v33 = vpop.f32.mrf.mxu1  ;;  %1673 = vmatpush.bf16.msra.mxu3 %v4001_v16  ;;  %v3914_v16 = vld [vmem:[#allocation8 + $0xb8] sm:$0xf0] }
 0x1b9   : > { %v1226_v23 = vrot.slane %v1218_v20, 7  ;;  %v1159_v24 = vadd.f32 %v1158_v19, %v1131_v22  ;;  %v3992_v19 = vld [vmem:[#allocation8 + $0x50] sm:$0xf]  ;;  %v4623_v20 = vld [vmem:[#allocation8 + $0x54] sm:$0xf0] }
 0x1ba   : > { %v1242_v36 = vld [vmem:[#allocation2] sm:$0xff]  ;;  %v3993_v22 = vor.u32 %v4623_v20, %v3992_v19  ;;  %v4635_v20 = vld [vmem:[#allocation8 + $0xb4] sm:$0xf0] }
 0x1bb   : > { %v1227_v25 = vsel %vm877_vm3, %v1225_v15, %v1226_v23  ;;  %v1207_v26 = vadd.f32 %v1200_v21, %v1159_v24  ;;  %v1249_v43 = vld [vmem:[#allocation2] sm:$0xfe]  ;;  %v4624_v15 = vld [vmem:[#allocation8 + $0x64] sm:$0xf]  ;;  %v4622_v21 = vld [vmem:[#allocation8 + $0x54] sm:$0xf] }
 0x1bc   : > { %1238 = vst.msk [vmem:[#allocation2 + $0x10] sm:$0xff] %vm1068_vm11, %v1227_v25  ;;  %v1330_v46 = vld [vmem:[#allocation2] sm:$0xfc]  ;;  %v4005_v18 = vor.u32 %v4624_v15, %v4002_v17  ;;  %1674 = vmatpush.bf16.msra.mxu3 %v3993_v22  ;;  %v3984_v25 = vld [vmem:[#allocation8 + $0x40] sm:$0xf] }
 0x1bd   : > { %v1215_v27 = vadd.f32 %v4887_v6, %v1207_v26  ;;  %v4621_v26 = vld [vmem:[#allocation8 + $0x44] sm:$0xf0]  ;;  %v4634_v15 = vld [vmem:[#allocation8 + $0xb4] sm:$0xf]  ;;  %v3912_v17 = vld [vmem:[#allocation8 + $0xb0] sm:$0xf] }
 0x1be   : > { %1692 = vmatpush.bf16.msrb.mxu0 %v4005_v18  ;;  %v3917_v19 = vor.u32 %v4634_v15, %v3914_v16  ;;  %v4050_v15 = vld [vmem:[#allocation8 + $0x148] sm:$0xf0] }
 0x1bf   : > { %v1219_v28 = vmax.f32 %v1215_v27, 0.0  ;;  %v4620_v27 = vld [vmem:[#allocation8 + $0x44] sm:$0xf] }
 0x1c0   : > { %v1133_v30 = vpop.f32.mrf.mxu3 }
 0x1c1   : > { %v1228_v31 = vrot.slane %v1219_v28, 7  ;;  %v1161_v32 = vadd.f32 %v1160_v29, %v1133_v30  ;;  %v3985_v28 = vor.u32 %v4621_v26, %v3984_v25  ;;  %v3986_v29 = vld [vmem:[#allocation8 + $0x48] sm:$0xf0]  ;;  %v3904_v25 = vld [vmem:[#allocation8 + $0xa0] sm:$0xf] }
 0x1c2   : > { %v3989_v30 = vor.u32 %v4620_v27, %v3986_v29  ;;  %v4633_v27 = vld [vmem:[#allocation8 + $0xa4] sm:$0xf0] }
 0x1c3   : > { %v1229_v34 = vsel %vm877_vm3, %v1226_v23, %v1228_v31  ;;  %v1208_v35 = vadd.f32 %v1202_v33, %v1161_v32  ;;  %v1243_v37 = vld [vmem:[#allocation2 + $0x10] sm:$0xff]  ;;  %1675 = vmatpush.bf16.msra.mxu3 %v3985_v28  ;;  %v4619_v32 = vld [vmem:[#allocation8 + $0x34] sm:$0xf0]  ;;  %v4618_v33 = vld [vmem:[#allocation8 + $0x34] sm:$0xf]  ;;  %v3905_v28 = vor.u32 %v4633_v27, %v3904_v25 }
 0x1c4   : > { %1239 = vst.msk [vmem:[#allocation2 + $0x20] sm:$0xff] %vm1068_vm11, %v1229_v34  ;;  %v1246_v38 = vpack.c.bf16 %v1243_v37, %v1242_v36  ;;  %v1251_v44 = vpack.c.bf16 %v1243_v37, %v1249_v43  ;;  %v1332_v47 = vpack.c.bf16 %v1243_v37, %v1330_v46  ;;  %v3994_v23 = vld [vmem:[#allocation8 + $0x58] sm:$0xf0]  ;;  %v3968_v37 = vld [vmem:[#allocation8 + $0x20] sm:$0xf] }
 0x1c5   : > { %v1216_v39 = vadd.f32 %v4887_v6, %v1208_v35  ;;  %v3997_v24 = vor.u32 %v4622_v21, %v3994_v23  ;;  %v3978_v35 = vld [vmem:[#allocation8 + $0x38] sm:$0xf0]  ;;  %v3970_v43 = vld [vmem:[#allocation8 + $0x28] sm:$0xf0]  ;;  %v3944_v46 = vld [vmem:[#allocation8 + $0xf0] sm:$0xf]  ;;  %v3913_v21 = vor.u32 %v4635_v20, %v3912_v17 }
 0x1c6   : > { %3881 = vmatmul.msk.bf16.vlgmr.msrb.gmra.mxu3 %vm1068_vm11, %v1246_v38  ;;  %v1258_v45 = vshll.u32 %v1251_v44, 16  ;;  %v1339_v52 = vrot.slane %v1332_v47, 1  ;;  %v1256_v54 = vshrl.u32 %v1251_v44, 16  ;;  %v3981_v36 = vor.u32 %v4618_v33, %v3978_v35  ;;  %v4617_v38 = vld [vmem:[#allocation8 + $0x24] sm:$0xf0] }
 0x1c7   : > { %v1220_v40 = vmax.f32 %v1216_v39, 0.0  ;;  %1693 = vmatpush.bf16.msrb.mxu0 %v3997_v24  ;;  %v4616_v39 = vld [vmem:[#allocation8 + $0x24] sm:$0xf]  ;;  %v4643_v47 = vld [vmem:[#allocation8 + $0xf4] sm:$0xf0] }
 0x1c8   : > { %v1260_v51 = vrot.slane %v1258_v45, 1  ;;  %v3973_v45 = vor.u32 %v4616_v39, %v3970_v43  ;;  %v4632_v23 = vld [vmem:[#allocation8 + $0xa4] sm:$0xf]  ;;  %v3906_v24 = vld [vmem:[#allocation8 + $0xa8] sm:$0xf0] }
 0x1c9   : > { %v1230_v41 = vrot.slane %v1220_v40, 7  ;;  %v4642_v40 = vld [vmem:[#allocation8 + $0xf4] sm:$0xf]  ;;  %v3909_v26 = vor.u32 %v4632_v23, %v3906_v24  ;;  %v3898_v33 = vld [vmem:[#allocation8 + $0x98] sm:$0xf0] }
 0x1ca   : > { %v1261_v57 = vor.u32 %v1260_v51, %v1256_v54  ;;  %v4614_v51 = vld [vmem:[#allocation8 + $0x14] sm:$0xf]  ;;  %v3888_v43 = vld [vmem:[#allocation8 + $0x80] sm:$0xf] }
 0x1cb   : > { %v1231_v42 = vsel %vm877_vm3, %v1228_v31, %v1230_v41  ;;  %1241 = vst.msk [vmem:[#allocation2 + $0x40] sm:$0x1] %vm1072_vm12, %v1230_v41  ;;  %v1244_v48 = vld [vmem:[#allocation2 + $0x20] sm:$0xff]  ;;  %1694 = vmatpush.bf16.msrb.mxu0 %v3989_v30  ;;  %v3946_v41 = vld [vmem:[#allocation8 + $0xf8] sm:$0xf0] }
 0x1cc   : > { %1240 = vst.msk [vmem:[#allocation2 + $0x30] sm:$0xff] %vm1068_vm11, %v1231_v42  ;;  %v3976_v31 = vld [vmem:[#allocation8 + $0x30] sm:$0xf]  ;;  %v3969_v42 = vor.u32 %v4617_v38, %v3968_v37  ;;  %v3949_v44 = vor.u32 %v4642_v40, %v3946_v41  ;;  %v5535_v30 = vld [vmem:[#allocation7] ss:$0 sm:$0xff] }
 0x1cd   : > { %v3977_v34 = vor.u32 %v4619_v32, %v3976_v31  ;;  %v4630_v32 = vld [vmem:[#allocation8 + $0x94] sm:$0xf]  ;;  %v4628_v41 = vld [vmem:[#allocation8 + $0x84] sm:$0xf]  ;;  %v4048_v17 = vld [vmem:[#allocation8 + $0x140] sm:$0xf] }
 0x1ce   : > { %1573 = vmatpush.bf16.msra.mxu2 %v3949_v44  ;;  %v3901_v35 = vor.u32 %v4630_v32, %v3898_v33 }
 0x1cf   : > { %1676 = vmatpush.bf16.msra.mxu3 %v3977_v34  ;;  %1695 = vmatpush.bf16.msrb.mxu0 %v3981_v36  ;;  %v3896_v34 = vld [vmem:[#allocation8 + $0x90] sm:$0xf]  ;;  %v4631_v36 = vld [vmem:[#allocation8 + $0x94] sm:$0xf0] }
 0x1d0   : > { %v3897_v38 = vor.u32 %v4631_v36, %v3896_v34  ;;  %v4651_v36 = vld [vmem:[#allocation8 + $0x134] sm:$0xf0] }
 0x1d2   : > { %v1331_v60 = vld [vmem:[#allocation2 + $0x40] sm:$0x3] }
 0x1d3   : > { %v1245_v49 = vld [vmem:[#allocation2 + $0x30] sm:$0xff]  ;;  %v1250_v61 = vld [vmem:[#allocation2 + $0x40] sm:$0x1]  ;;  %v1333_v62 = vpack.c.bf16 %v1331_v60, %v1331_v60  ;;  %1677 = vmatpush.bf16.msra.mxu3 %v3969_v42  ;;  %1696 = vmatpush.bf16.msrb.mxu0 %v3973_v45 }
 0x1d4   : > { %v1247_v50 = vpack.c.bf16 %v1245_v49, %v1244_v48  ;;  %v1252_v63 = vpack.c.bf16 %v1250_v61, %v1250_v61  ;;  %v3945_v48 = vor.u32 %v4643_v47, %v3944_v46  ;;  %v3960_v49 = vld [vmem:[#allocation8 + $0x10] sm:$0xf]  ;;  %v3952_v61 = vld [vmem:[#allocation8] sm:$0xf]  ;;  %v3890_v42 = vld [vmem:[#allocation8 + $0x88] sm:$0xf0] }
 0x1d5   : > { %v1342_v0 = vrot.slane %v1333_v62, 1  ;;  %v4613_v62 = vld [vmem:[#allocation8 + $0x4] sm:$0xf0]  ;;  %v3893_v45 = vor.u32 %v4628_v41, %v3890_v42  ;;  %v4032_v41 = vld [vmem:[#allocation8 + $0x120] sm:$0xf] }
 0x1d6   : > { %3882 = vmatmul.msk.bf16.gmra.mxu3 %vm1068_vm11, %v1247_v50  ;;  %v1340_v53 = vrot.slane %v1247_v50, 1  ;;  %v1263_v55 = vshll.u32 %v1247_v50, 16  ;;  %v1267_v1 = vshrl.u32 %v1247_v50, 16  ;;  %v1271_v2 = vshll.u32 %v1252_v63, 16  ;;  %v4615_v50 = vld [vmem:[#allocation8 + $0x14] sm:$0xf0]  ;;  %1554 = vmatpush.bf16.msra.mxu1 %v3945_v48 }
 0x1d7   : > { %v3961_v54 = vor.u32 %v4615_v50, %v3960_v49  ;;  %v4612_v63 = vld [vmem:[#allocation8 + $0x4] sm:$0xf]  ;;  %v4629_v46 = vld [vmem:[#allocation8 + $0x84] sm:$0xf0] }
 0x1d8   : > { %v1341_v56 = vsel %vm1000_vm7, %v1339_v52, %v1340_v53  ;;  %v1265_v58 = vrot.slane %v1263_v55, 1  ;;  %v1343_v4 = vsel %vm1000_vm7, %v1340_v53, %v1342_v0  ;;  %v1273_v5 = vrot.slane %v1271_v2, 1  ;;  %v4640_v52 = vld [vmem:[#allocation8 + $0xe4] sm:$0xf]  ;;  %v3938_v53 = vld [vmem:[#allocation8 + $0xe8] sm:$0xf0] }
 0x1d9   : > { %3884 = vmatmul.msk.bf16.vlgmr.msra.gmra.mxu0 %vm1068_vm11, %v1341_v56  ;;  %v3962_v55 = vld [vmem:[#allocation8 + $0x18] sm:$0xf0]  ;;  %v3941_v56 = vor.u32 %v4640_v52, %v3938_v53  ;;  %1678 = vmatpush.bf16.msra.mxu3 %v3961_v54  ;;  %v4638_v0 = vld [vmem:[#allocation8 + $0xd4] sm:$0xf]  ;;  %v3953_v2 = vor.u32 %v4613_v62, %v3952_v61  ;;  %v3889_v48 = vor.u32 %v4629_v46, %v3888_v43  ;;  %v4064_v62 = vld [vmem:[#allocation8 + $0x160] sm:$0xf] }
 0x1da   : > { %v1266_v59 = vsel %vm911_vm8, %v1261_v57, %v1265_v58  ;;  %v1269_v3 = vor.u32 %v1267_v1, %v1265_v58  ;;  %v3965_v57 = vor.u32 %v4614_v51, %v3962_v55  ;;  %v3936_v58 = vld [vmem:[#allocation8 + $0xe0] sm:$0xf]  ;;  %v3930_v1 = vld [vmem:[#allocation8 + $0xd8] sm:$0xf0]  ;;  %v4658_v52 = vld [vmem:[#allocation8 + $0x174] sm:$0xf] }
 0x1db   : > { %3879 = vmatmul.msk.bf16.vlgmr.msrb.gmra.mxu2 %vm1068_vm11, %v1266_v59  ;;  %v4641_v59 = vld [vmem:[#allocation8 + $0xe4] sm:$0xf0]  ;;  %v4074_v53 = vld [vmem:[#allocation8 + $0x178] sm:$0xf0]  ;;  %v4072_v55 = vld [vmem:[#allocation8 + $0x170] sm:$0xf] }
 0x1dc   : > { %v1274_v6 = vsel %vm911_vm8, %v1269_v3, %v1273_v5  ;;  %v3937_v60 = vor.u32 %v4641_v59, %v3936_v58  ;;  %1574 = vmatpush.bf16.msra.mxu2 %v3941_v56  ;;  %1697 = vmatpush.bf16.msrb.mxu0 %v3965_v57  ;;  %v3954_v3 = vld [vmem:[#allocation8 + $0x8] sm:$0xf0]  ;;  %v4077_v54 = vor.u32 %v4658_v52, %v4074_v53  ;;  %v4659_v56 = vld [vmem:[#allocation8 + $0x174] sm:$0xf0]  ;;  %v4656_v59 = vld [vmem:[#allocation8 + $0x164] sm:$0xf] }
 0x1dd   : > { %v3957_v5 = vor.u32 %v4612_v63, %v3954_v3  ;;  %1679 = vmatpush.bf16.msra.mxu3 %v3953_v2  ;;  %v4073_v58 = vor.u32 %v4659_v56, %v4072_v55  ;;  %v4657_v63 = vld [vmem:[#allocation8 + $0x164] sm:$0xf0]  ;;  %v4654_v2 = vld [vmem:[#allocation8 + $0x154] sm:$0xf]  ;;  %v4058_v3 = vld [vmem:[#allocation8 + $0x158] sm:$0xf0] }
 0x1de   : > { %1555 = vmatpush.bf16.msra.mxu1 %v3937_v60  ;;  %v4066_v60 = vld [vmem:[#allocation8 + $0x168] sm:$0xf0]  ;;  %v4061_v10 = vor.u32 %v4654_v2, %v4058_v3 }
 0x1df   : > { %v4069_v61 = vor.u32 %v4656_v59, %v4066_v60  ;;  %v4016_v59 = vld [vmem:[#allocation8 + $0x100] sm:$0xf]  ;;  %v4645_v60 = vld [vmem:[#allocation8 + $0x104] sm:$0xf0] }
 0x1e0   : > { %1698 = vmatpush.bf16.msrb.mxu0 %v3957_v5  ;;  %v4056_v5 = vld [vmem:[#allocation8 + $0x150] sm:$0xf] }
 0x1e9   : > { %3885 = vmatmul.msk.bf16.gmra.mxu0 %vm1068_vm11, %v1343_v4  ;;  %v3933_v4 = vor.u32 %v4638_v0, %v3930_v1  ;;  %v4065_v1 = vor.u32 %v4657_v63, %v4064_v62 }
 0x1eb   : > { %3880 = vmatmul.msk.bf16.gmra.mxu2 %vm1068_vm11, %v1274_v6  ;;  %v3928_v6 = vld [vmem:[#allocation8 + $0xd0] sm:$0xf] }
 0x1ec   : > { %v3929_v8 = vor.u32 %v4639_v7, %v3928_v6  ;;  %1575 = vmatpush.bf16.msra.mxu2 %v3933_v4  ;;  %v4655_v6 = vld [vmem:[#allocation8 + $0x154] sm:$0xf0] }
 0x1ed   : > { %v4057_v13 = vor.u32 %v4655_v6, %v4056_v5 }
 0x1ee   : > { %1556 = vmatpush.bf16.msra.mxu1 %v3929_v8 }
 0x1f0   : > { %1576 = vmatpush.bf16.msra.mxu2 %v3925_v12 }
 0x1f2   : > { %1557 = vmatpush.bf16.msra.mxu1 %v3921_v14  ;;  %v4652_v14 = vld [vmem:[#allocation8 + $0x144] sm:$0xf] }
 0x1f4   : > { %1577 = vmatpush.bf16.msra.mxu2 %v3917_v19 }
 0x1f6   : > { %1558 = vmatpush.bf16.msra.mxu1 %v3913_v21 }
 0x1f8   : > { %1578 = vmatpush.bf16.msra.mxu2 %v3909_v26 }
 0x1fa   : > { %1559 = vmatpush.bf16.msra.mxu1 %v3905_v28 }
 0x1fc   : > { %1579 = vmatpush.bf16.msra.mxu2 %v3901_v35  ;;  %v4040_v35 = vld [vmem:[#allocation8 + $0x130] sm:$0xf] }
 0x1fe   : > { %1560 = vmatpush.bf16.msra.mxu1 %v3897_v38  ;;  %v4041_v38 = vor.u32 %v4651_v36, %v4040_v35  ;;  %v4690_v36 = vld [vmem:[%s6010_s10 + $0xf4] sm:$0xf] }
 0x200   : > { %1580 = vmatpush.bf16.msra.mxu2 %v3893_v45 }
 0x202   : > { %1561 = vmatpush.bf16.msra.mxu1 %v3889_v48  ;;  %v4026_v48 = vld [vmem:[#allocation8 + $0x118] sm:$0xf0] }
 0x204   : > { %1840 = vmatpush.bf16.msrb.mxu2 %v4077_v54 }
 0x206   : > { %1821 = vmatpush.bf16.msrb.mxu1 %v4073_v58  ;;  %v4018_v58 = vld [vmem:[#allocation8 + $0x108] sm:$0xf0] }
 0x208   : > { %1841 = vmatpush.bf16.msrb.mxu2 %v4069_v61 }
 0x20a   : > { %1822 = vmatpush.bf16.msrb.mxu1 %v4065_v1  ;;  %v4017_v1 = vor.u32 %v4645_v60, %v4016_v59  ;;  %v4686_v60 = vld [vmem:[%s6010_s10 + $0xd4] sm:$0xf] }
 0x20c   : > { %1842 = vmatpush.bf16.msrb.mxu2 %v4061_v10 }
 0x20e   : > { %1823 = vmatpush.bf16.msrb.mxu1 %v4057_v13 }
 0x249   : > { %v1320_v18 = vpop.f32.mrf.mxu3 }
 0x251   : > { %v1322_v39 = vpop.f32.mrf.mxu3 }
 0x256   : > { %v1362_v22 = vpop.f32.mrf.mxu0 }
 0x259   : > { %v1325_v4 = vpop.f32.mrf.mxu3 }
 0x25e   : > { %v1293_v29 = vpop.f32.mrf.mxu2  ;;  %v1364_v44 = vpop.f32.mrf.mxu0 }
 0x25f   : > { %v1321_v31 = vadd.f32 %v1320_v18, %v1293_v29  ;;  %v4653_v18 = vld [vmem:[#allocation8 + $0x144] sm:$0xf0]  ;;  %v4650_v29 = vld [vmem:[#allocation8 + $0x134] sm:$0xf] }
 0x260   : > { %v4049_v23 = vor.u32 %v4653_v18, %v4048_v17 }
 0x261   : > { %v1372_v37 = vadd.f32 %v1362_v22, %v1321_v31  ;;  %v4053_v22 = vor.u32 %v4652_v14, %v4050_v15  ;;  %v1327_v25 = vpop.f32.mrf.mxu3  ;;  %v4042_v31 = vld [vmem:[#allocation8 + $0x138] sm:$0xf0] }
 0x262   : > { %1824 = vmatpush.bf16.msrb.mxu1 %v4049_v23  ;;  %v4045_v34 = vor.u32 %v4650_v29, %v4042_v31  ;;  %v4128_v29 = vld [vmem:[%s6010_s10 + $0x60] sm:$0xf]  ;;  %v4673_v31 = vld [vmem:[%s6010_s10 + $0x64] sm:$0xf0] }
 0x263   : > { %v1380_v40 = vadd.f32 %v5535_v30, %v1372_v37  ;;  %1843 = vmatpush.bf16.msrb.mxu2 %v4053_v22 }
 0x265   : > { %v1384_v47 = vmax.f32 %v1380_v40, 0.0  ;;  %v4034_v40 = vld [vmem:[#allocation8 + $0x128] sm:$0xf0] }
 0x266   : > { %v1295_v49 = vpop.f32.mrf.mxu2  ;;  %v1367_v8 = vpop.f32.mrf.mxu0  ;;  %1825 = vmatpush.bf16.msrb.mxu1 %v4041_v38  ;;  %v4200_v38 = vld [vmem:[%s6010_s10 + $0xf0] sm:$0xf] }
 0x267   : > { %v1392_v50 = vrot.slane %v1384_v47, 7  ;;  %v1323_v51 = vadd.f32 %v1322_v39, %v1295_v49  ;;  %v4648_v39 = vld [vmem:[#allocation8 + $0x124] sm:$0xf]  ;;  %1844 = vmatpush.bf16.msrb.mxu2 %v4045_v34  ;;  %v4646_v47 = vld [vmem:[#allocation8 + $0x114] sm:$0xf] }
 0x268   : > { %v4037_v43 = vor.u32 %v4648_v39, %v4034_v40  ;;  %v4024_v49 = vld [vmem:[#allocation8 + $0x110] sm:$0xf]  ;;  %v4029_v54 = vor.u32 %v4646_v47, %v4026_v48  ;;  %v4130_v34 = vld [vmem:[%s6010_s10 + $0x68] sm:$0xf0]  ;;  %v4691_v40 = vld [vmem:[%s6010_s10 + $0xf4] sm:$0xf0] }
 0x269   : > { %1404 = vst [vmem:[#allocation2] sm:$0xfe] %v1392_v50  ;;  %v1373_v57 = vadd.f32 %v1364_v44, %v1323_v51  ;;  %v4649_v44 = vld [vmem:[#allocation8 + $0x124] sm:$0xf0]  ;;  %v4688_v48 = vld [vmem:[%s6010_s10 + $0xe4] sm:$0xf] }
 0x26a   : > { %v4033_v46 = vor.u32 %v4649_v44, %v4032_v41  ;;  %v4201_v41 = vor.u32 %v4691_v40, %v4200_v38  ;;  %v4670_v44 = vld [vmem:[%s6010_s10 + $0x54] sm:$0xf] }
 0x26b   : > { %v1381_v0 = vadd.f32 %v5535_v30, %v1373_v57  ;;  %1845 = vmatpush.bf16.msrb.mxu2 %v4037_v43  ;;  %v4644_v57 = vld [vmem:[#allocation8 + $0x104] sm:$0xf] }
 0x26c   : > { %1826 = vmatpush.bf16.msrb.mxu1 %v4033_v46  ;;  %v4671_v43 = vld [vmem:[%s6010_s10 + $0x54] sm:$0xf0]  ;;  %v4122_v46 = vld [vmem:[%s6010_s10 + $0x58] sm:$0xf0]  ;;  %2110 = vmatpush.bf16.msra.mxu0 %v4201_v41  ;;  %v4080_v41 = vld [vmem:[%s6010_s10] sm:$0xf] }
 0x26d   : > { %v1385_v7 = vmax.f32 %v1381_v0, 0.0  ;;  %v4021_v0 = vor.u32 %v4644_v57, %v4018_v58  ;;  %v4125_v47 = vor.u32 %v4670_v44, %v4122_v46  ;;  %v4114_v58 = vld [vmem:[%s6010_s10 + $0x48] sm:$0xf0] }
 0x26e   : > { %v1298_v9 = vpop.f32.mrf.mxu2  ;;  %v1369_v33 = vpop.f32.mrf.mxu0 }
 0x26f   : > { %v1393_v11 = vrot.slane %v1385_v7, 7  ;;  %v1326_v12 = vadd.f32 %v1325_v4, %v1298_v9  ;;  %1846 = vmatpush.bf16.msrb.mxu2 %v4029_v54  ;;  %v4112_v54 = vld [vmem:[%s6010_s10 + $0x40] sm:$0xf] }
 0x270   : > { %v1409_v16 = vld [vmem:[#allocation2] sm:$0xff] }
 0x271   : > { %v5540_v19 = vsel %vm877_vm3, %v1392_v50, %v1393_v11  ;;  %v1374_v20 = vadd.f32 %v1367_v8, %v1326_v12  ;;  %v1431_v28 = vld [vmem:[#allocation2] sm:$0xfe]  ;;  %v4647_v50 = vld [vmem:[#allocation8 + $0x114] sm:$0xf0] }
 0x272   : > { %v1413_v21 = vpack.c.bf16 %v5540_v19, %v1409_v16  ;;  %v1433_v42 = vpack.c.bf16 %v5540_v19, %v1431_v28  ;;  %v4025_v56 = vor.u32 %v4647_v50, %v4024_v49  ;;  %v1710_v14 = vld [vmem:[#allocation2] sm:$0xfc]  ;;  %v4194_v49 = vld [vmem:[%s6010_s10 + $0xe8] sm:$0xf0] }
 0x273   : > { %v1382_v24 = vadd.f32 %v5535_v30, %v1374_v20  ;;  %1847 = vmatpush.bf16.msrb.mxu2 %v4021_v0  ;;  %v1712_v15 = vpack.c.bf16 %v5540_v19, %v1710_v14  ;;  %v4675_v19 = vld [vmem:[%s6010_s10 + $0x74] sm:$0xf0]  ;;  %v4192_v50 = vld [vmem:[%s6010_s10 + $0xe0] sm:$0xf] }
 0x274   : > { %1680 = vmatmul.bf16.vlgmr.msra.gmra.mxu3 %v1413_v21  ;;  %1699 = vmatmul.bf16.vlgmr.msrb.gmra.mxu0 %v1413_v21  ;;  %v1455_v53 = vshll.u32 %v1433_v42, 16  ;;  %v1453_v2 = vshrl.u32 %v1433_v42, 16  ;;  %v4120_v42 = vld [vmem:[%s6010_s10 + $0x50] sm:$0xf]  ;;  %v4096_v14 = vld [vmem:[%s6010_s10 + $0x20] sm:$0xf] }
 0x275   : > { %v1386_v32 = vmax.f32 %v1382_v24, 0.0  ;;  %1827 = vmatpush.bf16.msrb.mxu1 %v4025_v56  ;;  %v1734_v17 = vrot.slane %v1712_v15, 1  ;;  %v4136_v24 = vld [vmem:[%s6010_s10 + $0x70] sm:$0xf]  ;;  %v4668_v56 = vld [vmem:[%s6010_s10 + $0x44] sm:$0xf] }
 0x276   : > { %v1300_v26 = vpop.f32.mrf.mxu2  ;;  %v1457_v63 = vrot.slane %v1455_v53, 1  ;;  %v4117_v59 = vor.u32 %v4668_v56, %v4114_v58  ;;  %v4665_v15 = vld [vmem:[%s6010_s10 + $0x24] sm:$0xf0]  ;;  %v4146_v56 = vld [vmem:[%s6010_s10 + $0x88] sm:$0xf0] }
 0x277   : > { %v1328_v27 = vadd.f32 %v1327_v25, %v1300_v26  ;;  %v1395_v51 = vrot.slane %v1386_v32, 7  ;;  %v4674_v25 = vld [vmem:[%s6010_s10 + $0x74] sm:$0xf]  ;;  %v4137_v26 = vor.u32 %v4675_v19, %v4136_v24  ;;  %v4672_v32 = vld [vmem:[%s6010_s10 + $0x64] sm:$0xf] }
 0x278   : > { %v1458_v4 = vor.u32 %v1457_v63, %v1453_v2  ;;  %v4133_v35 = vor.u32 %v4672_v32, %v4130_v34  ;;  %v4687_v63 = vld [vmem:[%s6010_s10 + $0xd4] sm:$0xf0]  ;;  %v4662_v32 = vld [vmem:[%s6010_s10 + $0x14] sm:$0xf] }
 0x279   : > { %v1375_v37 = vadd.f32 %v1369_v33, %v1328_v27  ;;  %1828 = vmatpush.bf16.msrb.mxu1 %v4017_v1  ;;  %v4138_v27 = vld [vmem:[%s6010_s10 + $0x78] sm:$0xf0]  ;;  %2091 = vmatpush.bf16.msrb.mxu3 %v4137_v26  ;;  %v4129_v33 = vor.u32 %v4673_v31, %v4128_v29  ;;  %v4104_v1 = vld [vmem:[%s6010_s10 + $0x30] sm:$0xf]  ;;  %v4667_v2 = vld [vmem:[%s6010_s10 + $0x34] sm:$0xf0] }
 0x27a   : > { %v4141_v28 = vor.u32 %v4674_v25, %v4138_v27  ;;  %v4683_v25 = vld [vmem:[%s6010_s10 + $0xb4] sm:$0xf0]  ;;  %v4088_v27 = vld [vmem:[%s6010_s10 + $0x10] sm:$0xf] }
 0x27b   : > { %v1383_v45 = vadd.f32 %v5535_v30, %v1375_v37  ;;  %v1396_v30 = vsel %vm877_vm3, %v1393_v11, %v1395_v51  ;;  %v4202_v37 = vld [vmem:[%s6010_s10 + $0xf8] sm:$0xf0] }
 0x27c   : > { %v4205_v39 = vor.u32 %v4690_v36, %v4202_v37  ;;  %v4162_v36 = vld [vmem:[%s6010_s10 + $0xa8] sm:$0xf0]  ;;  %v4160_v37 = vld [vmem:[%s6010_s10 + $0xa0] sm:$0xf] }
 0x27d   : > { %v1387_v52 = vmax.f32 %v1383_v45, 0.0  ;;  %2092 = vmatpush.bf16.msrb.mxu3 %v4129_v33  ;;  %v4121_v45 = vor.u32 %v4671_v43, %v4120_v42  ;;  %v4090_v33 = vld [vmem:[%s6010_s10 + $0x18] sm:$0xf0]  ;;  %v4661_v42 = vld [vmem:[%s6010_s10 + $0x4] sm:$0xf0] }
 0x27e   : > { %v4093_v34 = vor.u32 %v4662_v32, %v4090_v33  ;;  %v4660_v43 = vld [vmem:[%s6010_s10 + $0x4] sm:$0xf]  ;;  %v4081_v44 = vor.u32 %v4661_v42, %v4080_v41 }
 0x27f   : > { %v1397_v55 = vrot.slane %v1387_v52, 7  ;;  %v4689_v52 = vld [vmem:[%s6010_s10 + $0xe4] sm:$0xf0] }
 0x280   : > { %v4193_v53 = vor.u32 %v4689_v52, %v4192_v50  ;;  %v4679_v52 = vld [vmem:[%s6010_s10 + $0x94] sm:$0xf0] }
 0x281   : > { %v1398_v61 = vsel %vm877_vm3, %v1395_v51, %v1397_v55  ;;  %1408 = vst [vmem:[#allocation2 + $0x40] sm:$0x1] %v1397_v55  ;;  %2093 = vmatpush.bf16.msrb.mxu3 %v4121_v45  ;;  %v4197_v51 = vor.u32 %v4688_v48, %v4194_v49  ;;  %v4669_v55 = vld [vmem:[%s6010_s10 + $0x44] sm:$0xf0]  ;;  %v4082_v45 = vld [vmem:[%s6010_s10 + $0x8] sm:$0xf0] }
 0x282   : > { %v1414_v62 = vpack.c.bf16 %v1398_v61, %v1396_v30  ;;  %v4113_v57 = vor.u32 %v4669_v55, %v4112_v54  ;;  %2111 = vmatpush.bf16.msra.mxu0 %v4193_v53  ;;  %v4186_v30 = vld [vmem:[%s6010_s10 + $0xd8] sm:$0xf0]  ;;  %v4184_v61 = vld [vmem:[%s6010_s10 + $0xd0] sm:$0xf]  ;;  %v4085_v46 = vor.u32 %v4660_v43, %v4082_v45  ;;  %v4676_v55 = vld [vmem:[%s6010_s10 + $0x84] sm:$0xf] }
 0x283   : > { %v4185_v0 = vor.u32 %v4687_v63, %v4184_v61  ;;  %v4154_v48 = vld [vmem:[%s6010_s10 + $0x98] sm:$0xf0]  ;;  %v4152_v49 = vld [vmem:[%s6010_s10 + $0x90] sm:$0xf]  ;;  %v4149_v58 = vor.u32 %v4676_v55, %v4146_v56  ;;  %v4264_v55 = vld [vmem:[#allocation11 + $0x70] sm:$0xf] }
 0x284   : > { %1685 = vmatmul.bf16.gmra.mxu3 %v1414_v62  ;;  %1704 = vmatmul.bf16.gmra.mxu0 %v1414_v62  ;;  %v1460_v3 = vshll.u32 %v1414_v62, 16  ;;  %v1464_v10 = vshrl.u32 %v1414_v62, 16  ;;  %v1735_v16 = vrot.slane %v1414_v62, 1  ;;  %v4189_v62 = vor.u32 %v4686_v60, %v4186_v30  ;;  %v4707_v56 = vld [vmem:[#allocation11 + $0x74] sm:$0xf0] }
 0x285   : > { %2094 = vmatpush.bf16.msrb.mxu3 %v4113_v57  ;;  %v4153_v53 = vor.u32 %v4679_v52, %v4152_v49  ;;  %v4144_v57 = vld [vmem:[%s6010_s10 + $0x80] sm:$0xf] }
 0x286   : > { %v1462_v5 = vrot.slane %v1460_v3, 1  ;;  %v1736_v18 = vsel %vm1000_vm7, %v1734_v17, %v1735_v16  ;;  %v4666_v3 = vld [vmem:[%s6010_s10 + $0x34] sm:$0xf]  ;;  %2112 = vmatpush.bf16.msra.mxu0 %v4185_v0  ;;  %v4097_v17 = vor.u32 %v4665_v15, %v4096_v14 }
 0x288   : > { %v1463_v6 = vsel %vm911_vm8, %v1458_v4, %v1462_v5  ;;  %v1432_v7 = vld [vmem:[#allocation2 + $0x40] sm:$0x1]  ;;  %v1466_v12 = vor.u32 %v1464_v10, %v1462_v5  ;;  %v4105_v5 = vor.u32 %v4667_v2, %v4104_v1 }
 0x289   : > { %1562 = vmatmul.bf16.vlgmr.msra.gmra.mxu1 %v1463_v6  ;;  %1581 = vmatmul.bf16.vlgmr.msra.gmra.mxu2 %v1463_v6  ;;  %v1434_v8 = vpack.c.bf16 %v1432_v7, %v1432_v7  ;;  %v1711_v20 = vld [vmem:[#allocation2 + $0x40] sm:$0x3]  ;;  %v4106_v6 = vld [vmem:[%s6010_s10 + $0x38] sm:$0xf0] }
 0x28a   : > { %v1713_v21 = vpack.c.bf16 %v1711_v20, %v1711_v20  ;;  %2129 = vmatpush.bf16.msra.mxu1 %v4141_v28  ;;  %2148 = vmatpush.bf16.msra.mxu2 %v4205_v39  ;;  %v4109_v7 = vor.u32 %v4666_v3, %v4106_v6  ;;  %v4663_v28 = vld [vmem:[%s6010_s10 + $0x14] sm:$0xf0]  ;;  %v4681_v39 = vld [vmem:[%s6010_s10 + $0xa4] sm:$0xf0]  ;;  %v1867_v3 = vld [vmem:[#allocation10] sm:$0x3] }
 0x28b   : > { %v1468_v9 = vshll.u32 %v1434_v8, 16  ;;  %v4684_v8 = vld [vmem:[%s6010_s10 + $0xc4] sm:$0xf]  ;;  %2095 = vmatpush.bf16.msrb.mxu3 %v4105_v5  ;;  %v4089_v31 = vor.u32 %v4663_v28, %v4088_v27  ;;  %v4161_v40 = vor.u32 %v4681_v39, %v4160_v37 }
 0x28c   : > { %v1737_v22 = vrot.slane %v1713_v21, 1  ;;  %v4682_v21 = vld [vmem:[%s6010_s10 + $0xb4] sm:$0xf] }
 0x28d   : > { %v1470_v11 = vrot.slane %v1468_v9, 1  ;;  %v4178_v9 = vld [vmem:[%s6010_s10 + $0xc8] sm:$0xf0] }
 0x28e   : > { %v1738_v23 = vsel %vm1000_vm7, %v1735_v16, %v1737_v22  ;;  %2130 = vmatpush.bf16.msra.mxu1 %v4133_v35  ;;  %2149 = vmatpush.bf16.msra.mxu2 %v4197_v51  ;;  %v4181_v10 = vor.u32 %v4684_v8, %v4178_v9  ;;  %v4664_v16 = vld [vmem:[%s6010_s10 + $0x24] sm:$0xf]  ;;  %v4170_v22 = vld [vmem:[%s6010_s10 + $0xb8] sm:$0xf0] }
 0x28f   : > { %v1471_v13 = vsel %vm911_vm8, %v1466_v12, %v1470_v11  ;;  %v4176_v11 = vld [vmem:[%s6010_s10 + $0xc0] sm:$0xf]  ;;  %v4685_v12 = vld [vmem:[%s6010_s10 + $0xc4] sm:$0xf0]  ;;  %2096 = vmatpush.bf16.msrb.mxu3 %v4097_v17  ;;  %v4173_v19 = vor.u32 %v4682_v21, %v4170_v22  ;;  %v4680_v35 = vld [vmem:[%s6010_s10 + $0xa4] sm:$0xf] }
 0x290   : > { %v4165_v38 = vor.u32 %v4680_v35, %v4162_v36 }
 0x292   : > { %2131 = vmatpush.bf16.msra.mxu1 %v4125_v47  ;;  %2150 = vmatpush.bf16.msra.mxu2 %v4189_v62  ;;  %v4678_v47 = vld [vmem:[%s6010_s10 + $0x94] sm:$0xf] }
 0x293   : > { %2097 = vmatpush.bf16.msrb.mxu3 %v4089_v31  ;;  %v4157_v51 = vor.u32 %v4678_v47, %v4154_v48 }
 0x296   : > { %2132 = vmatpush.bf16.msra.mxu1 %v4117_v59  ;;  %2151 = vmatpush.bf16.msra.mxu2 %v4181_v10  ;;  %v4677_v59 = vld [vmem:[%s6010_s10 + $0x84] sm:$0xf0] }
 0x297   : > { %2098 = vmatpush.bf16.msrb.mxu3 %v4081_v44  ;;  %v4145_v60 = vor.u32 %v4677_v59, %v4144_v57  ;;  %v4706_v57 = vld [vmem:[#allocation11 + $0x74] sm:$0xf]  ;;  %v4266_v59 = vld [vmem:[#allocation11 + $0x78] sm:$0xf0] }
 0x299   : > { %1567 = vmatmul.bf16.gmra.mxu1 %v1471_v13  ;;  %1586 = vmatmul.bf16.gmra.mxu2 %v1471_v13  ;;  %v4177_v13 = vor.u32 %v4685_v12, %v4176_v11 }
 0x29a   : > { %2133 = vmatpush.bf16.msra.mxu1 %v4109_v7  ;;  %2152 = vmatpush.bf16.msra.mxu2 %v4173_v19  ;;  %v1869_v7 = vperm.slane %v1867_v3, 0 }
 0x29b   : > { %2113 = vmatpush.bf16.msra.mxu0 %v4177_v13 }
 0x29e   : > { %2153 = vmatpush.bf16.msra.mxu2 %v4165_v38 }
 0x2a2   : > { %2154 = vmatpush.bf16.msra.mxu2 %v4157_v51 }
 0x2a6   : > { %2155 = vmatpush.bf16.msra.mxu2 %v4149_v58  ;;  %v4265_v58 = vor.u32 %v4707_v56, %v4264_v55 }
 0x2a8   : > { %2311 = vmatpush.bf16.msra.mxu3 %v4265_v58 }
 0x2a9   : > { %1829 = vmatmul.bf16.vlgmr.msrb.gmra.mxu1 %v1736_v18  ;;  %1848 = vmatmul.bf16.vlgmr.msrb.gmra.mxu2 %v1736_v18  ;;  %v4098_v18 = vld [vmem:[%s6010_s10 + $0x28] sm:$0xf0] }
 0x2aa   : > { %v4101_v20 = vor.u32 %v4664_v16, %v4098_v18  ;;  %v1870_v16 = vperm.slane %v1867_v3, 1  ;;  %v4703_v3 = vld [vmem:[#allocation11 + $0x54] sm:$0xf0] }
 0x2ac   : > { %2134 = vmatpush.bf16.msra.mxu1 %v4101_v20 }
 0x2b0   : > { %2135 = vmatpush.bf16.msra.mxu1 %v4093_v34 }
 0x2b4   : > { %2136 = vmatpush.bf16.msra.mxu1 %v4085_v46 }
 0x2b9   : > { %1834 = vmatmul.bf16.gmra.mxu1 %v1738_v23  ;;  %1853 = vmatmul.bf16.gmra.mxu2 %v1738_v23  ;;  %v4168_v23 = vld [vmem:[%s6010_s10 + $0xb0] sm:$0xf] }
 0x2ba   : > { %v4169_v26 = vor.u32 %v4683_v25, %v4168_v23 }
 0x2bc   : > { %2114 = vmatpush.bf16.msra.mxu0 %v4169_v26 }
 0x2c0   : > { %2115 = vmatpush.bf16.msra.mxu0 %v4161_v40 }
 0x2c4   : > { %2116 = vmatpush.bf16.msra.mxu0 %v4153_v53 }
 0x2c8   : > { %2117 = vmatpush.bf16.msra.mxu0 %v4145_v60  ;;  %v4269_v60 = vor.u32 %v4706_v57, %v4266_v59 }
 0x2cc   : > { %2330 = vmatpush.bf16.msrb.mxu0 %v4269_v60 }
 0x2f1   : > { %v1700_v63 = vpop.f32.mrf.mxu0 }
 0x2f7   : > { %v1681_v61 = vpop.f32.mrf.mxu3 }
 0x2f9   : > { %v1702_v10 = vpop.f32.mrf.mxu0 }
 0x2ff   : > { %v1683_v2 = vpop.f32.mrf.mxu3 }
 0x301   : > { %v1705_v28 = vpop.f32.mrf.mxu0 }
 0x306   : > { %v5646_v4 = vpop.f32.mrf.mxu1 }
 0x307   : > { %v1682_v5 = vadd.f32 %v1681_v61, %v5646_v4  ;;  %v1686_v18 = vpop.f32.mrf.mxu3  ;;  %v4705_v61 = vld [vmem:[#allocation11 + $0x64] sm:$0xf0] }
 0x309   : > { %v1707_v43 = vpop.f32.mrf.mxu0 }
 0x30c   : > { %v5684_v24 = vpop.f32.mrf.mxu2 }
 0x30d   : > { %v1701_v12 = vadd.f32 %v1700_v63, %v5684_v24 }
 0x30e   : > { %v1565_v29 = vpop.f32.mrf.mxu1 }
 0x30f   : > { %v1684_v9 = vadd.f32 %v1683_v2, %v1565_v29  ;;  %v1688_v34 = vpop.f32.mrf.mxu3  ;;  %v4248_v2 = vld [vmem:[#allocation11 + $0x50] sm:$0xf] }
 0x314   : > { %v1584_v50 = vpop.f32.mrf.mxu2 }
 0x315   : > { %v1703_v20 = vadd.f32 %v1702_v10, %v1584_v50  ;;  %v4701_v10 = vld [vmem:[#allocation11 + $0x44] sm:$0xf0] }
 0x316   : > { %v1568_v54 = vpop.f32.mrf.mxu1 }
 0x317   : > { %v1687_v29 = vadd.f32 %v1686_v18, %v1568_v54 }
 0x31c   : > { %v1587_v30 = vpop.f32.mrf.mxu2 }
 0x31d   : > { %v1706_v38 = vadd.f32 %v1705_v28, %v1587_v30  ;;  %v4256_v30 = vld [vmem:[#allocation11 + $0x60] sm:$0xf] }
 0x31e   : > { %v1570_v62 = vpop.f32.mrf.mxu1  ;;  %v4257_v63 = vor.u32 %v4705_v61, %v4256_v30 }
 0x31f   : > { %v1689_v36 = vadd.f32 %v1688_v34, %v1570_v62  ;;  %v4704_v62 = vld [vmem:[#allocation11 + $0x64] sm:$0xf]  ;;  %v4218_v34 = vld [vmem:[#allocation11 + $0x18] sm:$0xf0] }
 0x320   : > { %2312 = vmatpush.bf16.msra.mxu3 %v4257_v63 }
 0x324   : > { %v1589_v0 = vpop.f32.mrf.mxu2 }
 0x325   : > { %v1708_v44 = vadd.f32 %v1707_v43, %v1589_v0  ;;  %v4258_v0 = vld [vmem:[#allocation11 + $0x68] sm:$0xf0] }
 0x326   : > { %v1830_v1 = vpop.f32.mrf.mxu1 }
 0x327   : > { %v1859_v6 = vadd.f32 %v1830_v1, %v1682_v5  ;;  %v4261_v1 = vor.u32 %v4704_v62, %v4258_v0  ;;  %v4702_v5 = vld [vmem:[#allocation11 + $0x54] sm:$0xf] }
 0x329   : > { %v1873_v13 = vadd.f32 %v1869_v7, %v1859_v6  ;;  %2331 = vmatpush.bf16.msrb.mxu0 %v4261_v1  ;;  %v4249_v6 = vor.u32 %v4703_v3, %v4248_v2 }
 0x32b   : > { %v1881_v21 = vmax.f32 %v1873_v13, 0.0  ;;  %2313 = vmatpush.bf16.msra.mxu3 %v4249_v6  ;;  %v4242_v13 = vld [vmem:[#allocation11 + $0x48] sm:$0xf0] }
 0x32c   : > { %v1849_v8 = vpop.f32.mrf.mxu2 }
 0x32d   : > { %v1860_v15 = vadd.f32 %v1849_v8, %v1701_v12 }
 0x32e   : > { %v1832_v11 = vpop.f32.mrf.mxu1 }
 0x32f   : > { %v1861_v14 = vadd.f32 %v1832_v11, %v1684_v9  ;;  %v1874_v19 = vadd.f32 %v1870_v16, %v1860_v15  ;;  %v4240_v9 = vld [vmem:[#allocation11 + $0x40] sm:$0xf]  ;;  %v4700_v11 = vld [vmem:[#allocation11 + $0x44] sm:$0xf]  ;;  %v4232_v15 = vld [vmem:[#allocation11 + $0x30] sm:$0xf] }
 0x330   : > { %v4241_v12 = vor.u32 %v4701_v10, %v4240_v9  ;;  %v4715_v9 = vld [vmem:[#allocation13 + $0x38] sm:$0xff] }
 0x331   : > { %v1875_v17 = vadd.f32 %v1869_v7, %v1861_v14  ;;  %v1882_v24 = vmax.f32 %v1874_v19, 0.0  ;;  %v4245_v14 = vor.u32 %v4700_v11, %v4242_v13  ;;  %v4696_v19 = vld [vmem:[#allocation11 + $0x24] sm:$0xf]  ;;  %v4722_v13 = vld [vmem:[#allocation13 + $0x70] sm:$0xff] }
 0x332   : > { %2314 = vmatpush.bf16.msra.mxu3 %v4241_v12 }
 0x333   : > { %v1883_v22 = vmax.f32 %v1875_v17, 0.0  ;;  %v4698_v17 = vld [vmem:[#allocation11 + $0x34] sm:$0xf] }
 0x334   : > { %v1851_v23 = vpop.f32.mrf.mxu2 }
 0x335   : > { %v1889_v4 = vpack.c.bf16 %v1883_v22, %v1881_v21  ;;  %v1862_v25 = vadd.f32 %v1851_v23, %v1703_v20  ;;  %v4234_v20 = vld [vmem:[#allocation11 + $0x38] sm:$0xf0]  ;;  %v4224_v22 = vld [vmem:[#allocation11 + $0x20] sm:$0xf]  ;;  %v4697_v23 = vld [vmem:[#allocation11 + $0x24] sm:$0xf0] }
 0x336   : > { %v1835_v26 = vpop.f32.mrf.mxu1  ;;  %v4237_v21 = vor.u32 %v4698_v17, %v4234_v20 }
 0x337   : > { %v1876_v27 = vadd.f32 %v1870_v16, %v1862_v25  ;;  %2099 = vmatmul.bf16.vlgmr.msrb.gmra.mxu3 %v1889_v4  ;;  %2137 = vmatmul.bf16.vlgmr.msra.gmra.mxu1 %v1889_v4  ;;  %v1863_v33 = vadd.f32 %v1835_v26, %v1687_v29  ;;  %v4225_v4 = vor.u32 %v4697_v23, %v4224_v22  ;;  %v4226_v25 = vld [vmem:[#allocation11 + $0x28] sm:$0xf0]  ;;  %v1925_v26 = vld [vmem:[%s6011_s11] sm:$0x3]  ;;  %v2195_v22 = vld [vmem:[%s5419_s17] sm:$0xff] }
 0x338   : > { %v4229_v28 = vor.u32 %v4696_v19, %v4226_v25  ;;  %v5754_v29 = vperm.slane %v1925_v26, 0 }
 0x339   : > { %v1884_v31 = vmax.f32 %v1876_v27, 0.0  ;;  %v1877_v39 = vadd.f32 %v1869_v7, %v1863_v33 }
 0x33b   : > { %v1890_v32 = vpack.c.bf16 %v1884_v31, %v1882_v24  ;;  %v1885_v45 = vmax.f32 %v1877_v39, 0.0  ;;  %v4216_v24 = vld [vmem:[#allocation11 + $0x10] sm:$0xf]  ;;  %v4695_v31 = vld [vmem:[#allocation11 + $0x14] sm:$0xf0] }
 0x33c   : > { %v1854_v35 = vpop.f32.mrf.mxu2  ;;  %v4217_v33 = vor.u32 %v4695_v31, %v4216_v24 }
 0x33d   : > { %2118 = vmatmul.bf16.vlgmr.msra.gmra.mxu0 %v1890_v32  ;;  %2156 = vmatmul.bf16.vlgmr.msra.gmra.mxu2 %v1890_v32  ;;  %v1864_v41 = vadd.f32 %v1854_v35, %v1706_v38  ;;  %v4694_v32 = vld [vmem:[#allocation11 + $0x14] sm:$0xf] }
 0x33e   : > { %v1837_v37 = vpop.f32.mrf.mxu1  ;;  %v4221_v35 = vor.u32 %v4694_v32, %v4218_v34 }
 0x33f   : > { %v1865_v40 = vadd.f32 %v1837_v37, %v1689_v36  ;;  %v1878_v48 = vadd.f32 %v1870_v16, %v1864_v41  ;;  %v5757_v36 = vperm.slane %v1925_v26, 1  ;;  %v4693_v41 = vld [vmem:[#allocation11 + $0x4] sm:$0xf0] }
 0x341   : > { %v1879_v42 = vadd.f32 %v1869_v7, %v1865_v40  ;;  %v1886_v52 = vmax.f32 %v1878_v48, 0.0  ;;  %v4250_v7 = vld [vmem:[#allocation11 + $0x58] sm:$0xf0]  ;;  %v4208_v40 = vld [vmem:[#allocation11] sm:$0xf] }
 0x342   : > { %v4253_v8 = vor.u32 %v4702_v5, %v4250_v7  ;;  %v4209_v43 = vor.u32 %v4693_v41, %v4208_v40  ;;  %v2198_v40 = vld [vmem:[%s5419_s17 + $0x18] sm:$0xff] }
 0x343   : > { %v1887_v46 = vmax.f32 %v1879_v42, 0.0  ;;  %v4692_v42 = vld [vmem:[#allocation11 + $0x4] sm:$0xf] }
 0x344   : > { %v1856_v47 = vpop.f32.mrf.mxu2  ;;  %2332 = vmatpush.bf16.msrb.mxu0 %v4253_v8  ;;  %v4723_v8 = vld [vmem:[#allocation13 + $0x78] sm:$0xff] }
 0x345   : > { %v1866_v49 = vadd.f32 %v1856_v47, %v1708_v44  ;;  %v1891_v50 = vpack.c.bf16 %v1887_v46, %v1885_v45  ;;  %v4210_v44 = vld [vmem:[#allocation11 + $0x8] sm:$0xf0] }
 0x346   : > { %v4213_v46 = vor.u32 %v4692_v42, %v4210_v44 }
 0x347   : > { %v1880_v51 = vadd.f32 %v1870_v16, %v1866_v49  ;;  %2104 = vmatmul.bf16.gmra.mxu3 %v1891_v50  ;;  %2142 = vmatmul.bf16.gmra.mxu1 %v1891_v50  ;;  %v4699_v16 = vld [vmem:[#allocation11 + $0x34] sm:$0xf0] }
 0x348   : > { %2333 = vmatpush.bf16.msrb.mxu0 %v4245_v14  ;;  %v4233_v18 = vor.u32 %v4699_v16, %v4232_v15 }
 0x349   : > { %v1888_v53 = vmax.f32 %v1880_v51, 0.0 }
 0x34a   : > { %2315 = vmatpush.bf16.msra.mxu3 %v4233_v18 }
 0x34b   : > { %v1892_v54 = vpack.c.bf16 %v1888_v53, %v1886_v52 }
 0x34c   : > { %2334 = vmatpush.bf16.msrb.mxu0 %v4237_v21 }
 0x34d   : > { %2123 = vmatmul.bf16.gmra.mxu0 %v1892_v54  ;;  %2161 = vmatmul.bf16.gmra.mxu2 %v1892_v54 }
 0x34e   : > { %2316 = vmatpush.bf16.msra.mxu3 %v4225_v4  ;;  %v2196_v4 = vld [vmem:[%s5419_s17 + $0x8] sm:$0xff] }
 0x350   : > { %2335 = vmatpush.bf16.msrb.mxu0 %v4229_v28 }
 0x352   : > { %2317 = vmatpush.bf16.msra.mxu3 %v4217_v33 }
 0x354   : > { %2336 = vmatpush.bf16.msrb.mxu0 %v4221_v35 }
 0x356   : > { %2318 = vmatpush.bf16.msra.mxu3 %v4209_v43 }
 0x358   : > { %2337 = vmatpush.bf16.msrb.mxu0 %v4213_v46 }
 0x35a   : > { %2750 = vmatpush.bf16.msrb.mxu3 %v4715_v9  ;;  %v4733_v9 = vld [vmem:[#allocation13 + $0xc8] sm:$0xff] }
 0x35c   : > { %2769 = vmatpush.bf16.msra.mxu0 %v4723_v8 }
 0x360   : > { %2770 = vmatpush.bf16.msra.mxu0 %v4722_v13  ;;  %v4732_v13 = vld [vmem:[#allocation13 + $0xc0] sm:$0xff] }
 0x3b4   : > { %v2138_v27 = vpop.f32.mrf.mxu1 }
 0x3b5   : > { %v2139_v47 = vadd.f32 %v2138_v27, %v5757_v36 }
 0x3ba   : > { %v2100_v37 = vpop.f32.mrf.mxu3  ;;  %v2119_v38 = vpop.f32.mrf.mxu0 }
 0x3bb   : > { %v2101_v39 = vadd.f32 %v2100_v37, %v5754_v29 }
 0x3bc   : > { %v2140_v48 = vpop.f32.mrf.mxu1 }
 0x3bd   : > { %v5765_v45 = vadd.f32 %v2119_v38, %v2101_v39  ;;  %v2141_v57 = vadd.f32 %v2140_v48, %v5757_v36  ;;  %v2197_v39 = vld [vmem:[%s5419_s17 + $0x10] sm:$0xff] }
 0x3be   : > { %v4714_v48 = vld [vmem:[#allocation13 + $0x30] sm:$0xff] }
 0x3bf   : > { %2175 = vst [vmem:[%s5763_s21] sm:$0xff] %v5765_v45  ;;  %2751 = vmatpush.bf16.msrb.mxu3 %v4714_v48 }
 0x3c0   : > { %v2157_v49 = vpop.f32.mrf.mxu2 }
 0x3c1   : > { %v2158_v50 = vadd.f32 %v2157_v49, %v2139_v47  ;;  %v4720_v49 = vld [vmem:[#allocation13 + $0x60] sm:$0xff] }
 0x3c2   : > { %v2102_v51 = vpop.f32.mrf.mxu3  ;;  %v2121_v52 = vpop.f32.mrf.mxu0 }
 0x3c3   : > { %v2167_v53 = vmax.f32 %v2158_v50, -30.0  ;;  %v2103_v54 = vadd.f32 %v2102_v51, %v5754_v29  ;;  %v4713_v50 = vld [vmem:[#allocation13 + $0x28] sm:$0xff]  ;;  %v4719_v51 = vld [vmem:[#allocation13 + $0x58] sm:$0xff] }
 0x3c4   : > { %v2143_v60 = vpop.f32.mrf.mxu1  ;;  %2752 = vmatpush.bf16.msrb.mxu3 %v4713_v50 }
 0x3c5   : > { %v2171_v55 = vmin.f32 %v2167_v53, 20.0  ;;  %v2122_v56 = vadd.f32 %v2121_v52, %v2103_v54  ;;  %v2144_v5 = vadd.f32 %v2143_v60, %v5757_v36  ;;  %v4712_v52 = vld [vmem:[#allocation13 + $0x20] sm:$0xff]  ;;  %v4718_v53 = vld [vmem:[#allocation13 + $0x50] sm:$0xff]  ;;  %v4739_v54 = vld [vmem:[#allocation13 + $0xf8] sm:$0xff] }
 0x3c6   : > { %2635 = vmatpush.bf16.msrb.mxu2 %v4739_v54  ;;  %v4716_v60 = vld [vmem:[#allocation13 + $0x40] sm:$0xff] }
 0x3c7   : > { %2179 = vst [vmem:[%s5763_s21 + $0x8] sm:$0xff] %v2171_v55  ;;  %v2183_v58 = vmul.f32 0.5, %v2171_v55  ;;  %v4711_v55 = vld [vmem:[#allocation13 + $0x18] sm:$0xff] }
 0x3c8   : > { %2176 = vst [vmem:[%s5763_s21 + $0x10] sm:$0xff] %v2122_v56  ;;  %v2159_v59 = vpop.f32.mrf.mxu2  ;;  %2753 = vmatpush.bf16.msrb.mxu3 %v4712_v52 }
 0x3c9   : > { %v2160_v30 = vadd.f32 %v2159_v59, %v2141_v57  ;;  %v2187_v63 = vmul.f32 1.442695, %v2183_v58  ;;  %v4738_v57 = vld [vmem:[#allocation13 + $0xf0] sm:$0xff]  ;;  %v4731_v59 = vld [vmem:[#allocation13 + $0xb8] sm:$0xff] }
 0x3ca   : > { %v2105_v61 = vpop.f32.mrf.mxu3  ;;  %v2124_v62 = vpop.f32.mrf.mxu0  ;;  %v4710_v58 = vld [vmem:[#allocation13 + $0x10] sm:$0xff]  ;;  %2636 = vmatpush.bf16.msrb.mxu2 %v4738_v57  ;;  %2616 = vmatpush.bf16.msrb.mxu1 %v4731_v59  ;;  %v4749_v57 = vld [vmem:[#allocation13 + $0x148] sm:$0xff] }
 0x3cb   : > { %v2168_v0 = vmax.f32 %v2160_v30, -30.0  ;;  %v2106_v1 = vadd.f32 %v2105_v61, %v5754_v29  ;;  %4893 = vpow2.f32 %v2187_v63  ;;  %v4737_v30 = vld [vmem:[#allocation13 + $0xe8] sm:$0xff]  ;;  %v4736_v63 = vld [vmem:[#allocation13 + $0xe0] sm:$0xff] }
 0x3cc   : > { %v2145_v16 = vpop.f32.mrf.mxu1  ;;  %2754 = vmatpush.bf16.msrb.mxu3 %v4711_v55  ;;  %v4709_v61 = vld [vmem:[#allocation13 + $0x8] sm:$0xff] }
 0x3cd   : > { %v2172_v2 = vmin.f32 %v2168_v0, 20.0  ;;  %v2125_v3 = vadd.f32 %v2124_v62, %v2106_v1  ;;  %v2146_v23 = vadd.f32 %v2145_v16, %v5757_v36  ;;  %v4730_v62 = vld [vmem:[#allocation13 + $0xb0] sm:$0xff]  ;;  %v4708_v0 = vld [vmem:[#allocation13] sm:$0xff]  ;;  %v4729_v1 = vld [vmem:[#allocation13 + $0xa8] sm:$0xff] }
 0x3ce   : > { %2637 = vmatpush.bf16.msrb.mxu2 %v4737_v30  ;;  %2617 = vmatpush.bf16.msrb.mxu1 %v4730_v62  ;;  %v4725_v16 = vld [vmem:[#allocation13 + $0x88] sm:$0xff] }
 0x3cf   : > { %2180 = vst [vmem:[%s5763_s21 + $0x18] sm:$0xff] %v2172_v2  ;;  %v2184_v6 = vmul.f32 0.5, %v2172_v2  ;;  %v4735_v2 = vld [vmem:[#allocation13 + $0xd8] sm:$0xff] }
 0x3d0   : > { %2177 = vst [vmem:[%s5763_s21 + $0x20] sm:$0xff] %v2125_v3  ;;  %v2162_v7 = vpop.f32.mrf.mxu2  ;;  %2755 = vmatpush.bf16.msrb.mxu3 %v4710_v58 }
 0x3d1   : > { %v2189_v10 = vmul.f32 1.442695, %v2184_v6  ;;  %v2163_v11 = vadd.f32 %v2162_v7, %v2144_v5  ;;  %v4894_v18 = vpop.eup %4893  ;;  %v4734_v5 = vld [vmem:[#allocation13 + $0xd0] sm:$0xff]  ;;  %v2225_v6 = vld [vmem:[%s6013_s13] sm:$0x3]  ;;  %v4727_v7 = vld [vmem:[#allocation13 + $0x98] sm:$0xff] }
 0x3d2   : > { %v2107_v12 = vpop.f32.mrf.mxu3  ;;  %v2126_v17 = vpop.f32.mrf.mxu0  ;;  %v2199_v26 = vmul.f32 %v4894_v18, %v2195_v22  ;;  %2638 = vmatpush.bf16.msrb.mxu2 %v4736_v63  ;;  %2618 = vmatpush.bf16.msrb.mxu1 %v4729_v1  ;;  %v2228_v8 = vperm.slane %v2225_v6, 1  ;;  %v4754_v22 = vld [vmem:[#allocation13 + $0x170] sm:$0xff]  ;;  %v4748_v1 = vld [vmem:[#allocation13 + $0x140] sm:$0xff] }
 0x3d3   : > { %4895 = vpow2.f32 %v2189_v10  ;;  %v2169_v14 = vmax.f32 %v2163_v11, -30.0  ;;  %v2108_v15 = vadd.f32 %v2107_v12, %v5754_v29  ;;  %v4726_v10 = vld [vmem:[#allocation13 + $0x90] sm:$0xff] }
 0x3d4   : > { %v2203_v32 = vadd.f32 %v2199_v26, %v5765_v45  ;;  %v4721_v45 = vld [vmem:[#allocation13 + $0x68] sm:$0xff]  ;;  %2756 = vmatpush.bf16.msrb.mxu3 %v4709_v61  ;;  %v4747_v26 = vld [vmem:[#allocation13 + $0x138] sm:$0xff] }
 0x3d5   : > { %v2173_v20 = vmin.f32 %v2169_v14, 20.0  ;;  %v2127_v21 = vadd.f32 %v2126_v17, %v2108_v15  ;;  %2771 = vmatpush.bf16.msra.mxu0 %v4721_v45  ;;  %v5791_v15 = vperm.slane %v2225_v6, 0  ;;  %v4755_v17 = vld [vmem:[#allocation13 + $0x178] sm:$0xff] }
 0x3d6   : > { %2639 = vmatpush.bf16.msrb.mxu2 %v4735_v2 }
 0x3d7   : > { %2181 = vst [vmem:[%s5763_s21 + $0x28] sm:$0xff] %v2173_v20  ;;  %v2185_v19 = vmul.f32 0.5, %v2173_v20  ;;  %v4724_v20 = vld [vmem:[#allocation13 + $0x80] sm:$0xff] }
 0x3d8   : > { %2178 = vst [vmem:[%s5763_s21 + $0x30] sm:$0xff] %v2127_v21  ;;  %v2164_v25 = vpop.f32.mrf.mxu2  ;;  %2757 = vmatpush.bf16.msrb.mxu3 %v4708_v0 }
 0x3d9   : > { %v4896_v27 = vpop.eup %4895  ;;  %v2165_v28 = vadd.f32 %v2164_v25, %v2146_v23  ;;  %v2191_v24 = vmul.f32 1.442695, %v2185_v19  ;;  %2772 = vmatpush.bf16.msra.mxu0 %v4720_v49  ;;  %v4750_v49 = vld [vmem:[#allocation13 + $0x150] sm:$0xff] }
 0x3da   : > { %v2200_v29 = vmul.f32 %v4896_v27, %v2196_v4  ;;  %2640 = vmatpush.bf16.msrb.mxu2 %v4734_v5  ;;  %v4753_v27 = vld [vmem:[#allocation13 + $0x168] sm:$0xff] }
 0x3db   : > { %v2170_v31 = vmax.f32 %v2165_v28, -30.0  ;;  %4897 = vpow2.f32 %v2191_v24  ;;  %v4746_v24 = vld [vmem:[#allocation13 + $0x130] sm:$0xff] }
 0x3dc   : > { %v2204_v33 = vadd.f32 %v2200_v29, %v2122_v56  ;;  %v4717_v56 = vld [vmem:[#allocation13 + $0x48] sm:$0xff] }
 0x3dd   : > { %v2174_v34 = vmin.f32 %v2170_v31, 20.0  ;;  %2773 = vmatpush.bf16.msra.mxu0 %v4719_v51 }
 0x3de   : > { %v2207_v35 = vpack.c.bf16 %v2204_v33, %v2203_v32  ;;  %2641 = vmatpush.bf16.msrb.mxu2 %v4733_v9 }
 0x3df   : > { %2182 = vst [vmem:[%s5763_s21 + $0x38] sm:$0xff] %v2174_v34  ;;  %v2186_v36 = vmul.f32 0.5, %v2174_v34  ;;  %v4752_v34 = vld [vmem:[#allocation13 + $0x160] sm:$0xff]  ;;  %s6065_s21 = sld [smem:[#allocation29_spill]] }
 0x3e0   : > { %2319 = vmatmul.bf16.vlgmr.msra.gmra.mxu3 %v2207_v35  ;;  %2338 = vmatmul.bf16.vlgmr.msrb.gmra.mxu0 %v2207_v35 }
 0x3e1   : > { %v2193_v37 = vmul.f32 1.442695, %v2186_v36  ;;  %v4898_v38 = vpop.eup %4897  ;;  %2774 = vmatpush.bf16.msra.mxu0 %v4718_v53 }
 0x3e2   : > { %v2201_v41 = vmul.f32 %v4898_v38, %v2197_v39  ;;  %2642 = vmatpush.bf16.msrb.mxu2 %v4732_v13  ;;  %v4745_v38 = vld [vmem:[#allocation13 + $0x128] sm:$0xff] }
 0x3e3   : > { %4899 = vpow2.f32 %v2193_v37 }
 0x3e4   : > { %v2205_v44 = vadd.f32 %v2201_v41, %v2125_v3  ;;  %v4728_v3 = vld [vmem:[#allocation13 + $0xa0] sm:$0xff] }
 0x3e5   : > { %2775 = vmatpush.bf16.msra.mxu0 %v4717_v56  ;;  %2619 = vmatpush.bf16.msrb.mxu1 %v4728_v3  ;;  %v4743_v56 = vld [vmem:[#allocation13 + $0x118] sm:$0xff] }
 0x3e6   : > { %2964 = vmatpush.bf16.msra.mxu2 %v4755_v17 }
 0x3e9   : > { %v4900_v42 = vpop.eup %4899  ;;  %2776 = vmatpush.bf16.msra.mxu0 %v4716_v60  ;;  %2620 = vmatpush.bf16.msrb.mxu1 %v4727_v7  ;;  %v4742_v60 = vld [vmem:[#allocation13 + $0x110] sm:$0xff]  ;;  %v4741_v7 = vld [vmem:[#allocation13 + $0x108] sm:$0xff] }
 0x3ea   : > { %v2202_v43 = vmul.f32 %v4900_v42, %v2198_v40  ;;  %2965 = vmatpush.bf16.msra.mxu2 %v4754_v22 }
 0x3ec   : > { %v2206_v46 = vadd.f32 %v2202_v43, %v2127_v21 }
 0x3ed   : > { %2621 = vmatpush.bf16.msrb.mxu1 %v4726_v10 }
 0x3ee   : > { %v2208_v47 = vpack.c.bf16 %v2206_v46, %v2205_v44  ;;  %2966 = vmatpush.bf16.msra.mxu2 %v4753_v27  ;;  %v4751_v46 = vld [vmem:[#allocation13 + $0x158] sm:$0xff] }
 0x3f0   : > { %2324 = vmatmul.bf16.gmra.mxu3 %v2208_v47  ;;  %2343 = vmatmul.bf16.gmra.mxu0 %v2208_v47  ;;  %v4744_v47 = vld [vmem:[#allocation13 + $0x120] sm:$0xff] }
 0x3f1   : > { %2622 = vmatpush.bf16.msrb.mxu1 %v4725_v16  ;;  %v4740_v16 = vld [vmem:[#allocation13 + $0x100] sm:$0xff] }
 0x3f2   : > { %2967 = vmatpush.bf16.msra.mxu2 %v4752_v34 }
 0x3f5   : > { %2623 = vmatpush.bf16.msrb.mxu1 %v4724_v20 }
 0x3f6   : > { %2968 = vmatpush.bf16.msra.mxu2 %v4751_v46 }
 0x3f9   : > { %2945 = vmatpush.bf16.msra.mxu1 %v4747_v26 }
 0x3fa   : > { %2969 = vmatpush.bf16.msra.mxu2 %v4750_v49 }
 0x3fd   : > { %2946 = vmatpush.bf16.msra.mxu1 %v4746_v24 }
 0x3fe   : > { %2970 = vmatpush.bf16.msra.mxu2 %v4749_v57 }
 0x401   : > { %2947 = vmatpush.bf16.msra.mxu1 %v4745_v38 }
 0x402   : > { %2971 = vmatpush.bf16.msra.mxu2 %v4748_v1  ;;  %v4757_v1 = vld [vmem:[%s6016_s16 + $0x8] sm:$0xff] }
 0x405   : > { %2948 = vmatpush.bf16.msra.mxu1 %v4744_v47 }
 0x409   : > { %2949 = vmatpush.bf16.msra.mxu1 %v4743_v56 }
 0x40d   : > { %2950 = vmatpush.bf16.msra.mxu1 %v4742_v60 }
 0x411   : > { %2951 = vmatpush.bf16.msra.mxu1 %v4741_v7  ;;  %v4756_v7 = vld [vmem:[%s6016_s16] sm:$0xff] }
 0x415   : > { %2952 = vmatpush.bf16.msra.mxu1 %v4740_v16  ;;  %v4775_v16 = vld [vmem:[%s6016_s16 + $0x98] sm:$0xff] }
 0x45d   : > { %v2339_v11 = vpop.f32.mrf.mxu0 }
 0x45e   : > { %v2340_v12 = vadd.f32 %v2339_v11, %v2228_v8 }
 0x460   : > { %v2358_v14 = vrot.slane %v2340_v12, 7 }
 0x462   : > { %2382 = vst [vmem:[#allocation2 + $0x8] sm:$0xfe] %v2358_v14 }
 0x463   : > { %v2320_v18 = vpop.f32.mrf.mxu3 }
 0x464   : > { %v2321_v21 = vadd.f32 %v2320_v18, %v5791_v15 }
 0x465   : > { %v2341_v23 = vpop.f32.mrf.mxu0 }
 0x466   : > { %v2357_v19 = vrot.slane %v2321_v21, 7  ;;  %v2342_v4 = vadd.f32 %v2341_v23, %v2228_v8 }
 0x468   : > { %2381 = vst [vmem:[#allocation2] sm:$0xfe] %v2357_v19  ;;  %v2361_v25 = vrot.slane %v2342_v4, 7 }
 0x469   : > { %v2392_v28 = vld [vmem:[#allocation2 + $0x8] sm:$0xff] }
 0x46a   : > { %v5795_v29 = vsel %vm877_vm3, %v2358_v14, %v2361_v25  ;;  %v2436_v42 = vld [vmem:[#allocation2 + $0x8] sm:$0xfe] }
 0x46b   : > { %v2322_v31 = vpop.f32.mrf.mxu3  ;;  %v2400_v32 = vpack.c.bf16 %v5795_v29, %v2392_v28  ;;  %v2440_v48 = vpack.c.bf16 %v5795_v29, %v2436_v42 }
 0x46c   : > { %v2323_v33 = vadd.f32 %v2322_v31, %v5791_v15 }
 0x46d   : > { %v2344_v35 = vpop.f32.mrf.mxu0  ;;  %2777 = vmatmul.bf16.vlgmr.msra.gmra.mxu0 %v2400_v32  ;;  %v2491_v53 = vshll.u32 %v2440_v48, 16  ;;  %v2489_v2 = vshrl.u32 %v2440_v48, 16 }
 0x46e   : > { %v2359_v36 = vrot.slane %v2323_v33, 7  ;;  %v2345_v37 = vadd.f32 %v2344_v35, %v2228_v8 }
 0x46f   : > { %v2391_v39 = vld [vmem:[#allocation2] sm:$0xff]  ;;  %v2493_v62 = vrot.slane %v2491_v53, 1 }
 0x470   : > { %v5800_v40 = vsel %vm877_vm3, %v2357_v19, %v2359_v36  ;;  %v2365_v41 = vrot.slane %v2345_v37, 7  ;;  %v2435_v52 = vld [vmem:[#allocation2] sm:$0xfe] }
 0x471   : > { %v2399_v43 = vpack.c.bf16 %v5800_v40, %v2391_v39  ;;  %v2439_v58 = vpack.c.bf16 %v5800_v40, %v2435_v52  ;;  %v2788_v39 = vld [vmem:[#allocation2] sm:$0xfc] }
 0x472   : > { %v2366_v44 = vsel %vm877_vm3, %v2361_v25, %v2365_v41 }
 0x473   : > { %v2325_v45 = vpop.f32.mrf.mxu3  ;;  %2758 = vmatmul.bf16.vlgmr.msrb.gmra.mxu3 %v2399_v43  ;;  %v2479_v5 = vshll.u32 %v2439_v58, 16  ;;  %v2477_v17 = vshrl.u32 %v2439_v58, 16  ;;  %v2792_v43 = vpack.c.bf16 %v5800_v40, %v2788_v39  ;;  %v4763_v40 = vld [vmem:[%s6016_s16 + $0x38] sm:$0xff]  ;;  %v4760_v58 = vld [vmem:[%s6016_s16 + $0x20] sm:$0xff] }
 0x474   : > { %v2326_v54 = vadd.f32 %v2325_v45, %v5791_v15  ;;  %3200 = vmatpush.bf16.msrb.mxu0 %v4763_v40 }
 0x475   : > { %v2346_v50 = vpop.f32.mrf.mxu0  ;;  %v2481_v14 = vrot.slane %v2479_v5, 1  ;;  %v2835_v46 = vrot.slane %v2792_v43, 1 }
 0x476   : > { %v2347_v51 = vadd.f32 %v2346_v50, %v2228_v8  ;;  %v2363_v63 = vrot.slane %v2326_v54, 7  ;;  %v2494_v8 = vor.u32 %v2493_v62, %v2489_v2  ;;  %v4762_v54 = vld [vmem:[%s6016_s16 + $0x30] sm:$0xff] }
 0x477   : > { %v2482_v20 = vor.u32 %v2481_v14, %v2477_v17  ;;  %v4758_v62 = vld [vmem:[%s6016_s16 + $0x10] sm:$0xff]  ;;  %v4767_v17 = vld [vmem:[%s6016_s16 + $0x58] sm:$0xff] }
 0x478   : > { %v2369_v55 = vrot.slane %v2347_v51, 7  ;;  %v2364_v10 = vsel %vm877_vm3, %v2359_v36, %v2363_v63  ;;  %v2789_v36 = vld [vmem:[#allocation2 + $0x8] sm:$0xfc]  ;;  %3201 = vmatpush.bf16.msrb.mxu0 %v4762_v54  ;;  %v4770_v2 = vld [vmem:[%s6016_s16 + $0x70] sm:$0xff] }
 0x479   : > { %v2793_v37 = vpack.c.bf16 %v5795_v29, %v2789_v36  ;;  %v4764_v36 = vld [vmem:[%s6016_s16 + $0x40] sm:$0xff] }
 0x47a   : > { %v2370_v59 = vsel %vm877_vm3, %v2365_v41, %v2369_v55  ;;  %2390 = vst [vmem:[#allocation2 + $0x48] sm:$0x1] %v2369_v55  ;;  %v4761_v55 = vld [vmem:[%s6016_s16 + $0x28] sm:$0xff] }
 0x47b   : > { %v2327_v30 = vpop.f32.mrf.mxu3  ;;  %v5808_v61 = vpack.c.bf16 %v2370_v59, %v2366_v44  ;;  %v2838_v41 = vrot.slane %v2793_v37, 1  ;;  %v4759_v59 = vld [vmem:[%s6016_s16 + $0x18] sm:$0xff] }
 0x47c   : > { %v2328_v0 = vadd.f32 %v2327_v30, %v5791_v15  ;;  %3202 = vmatpush.bf16.msrb.mxu0 %v4761_v55 }
 0x47d   : > { %2782 = vmatmul.bf16.gmra.mxu0 %v5808_v61  ;;  %v2496_v3 = vshll.u32 %v5808_v61, 16  ;;  %v2508_v26 = vshrl.u32 %v5808_v61, 16  ;;  %v2839_v38 = vrot.slane %v5808_v61, 1  ;;  %v4779_v61 = vld [vmem:[%s6016_s16 + $0xb8] sm:$0xff] }
 0x47e   : > { %v2367_v6 = vrot.slane %v2328_v0, 7  ;;  %v4778_v0 = vld [vmem:[%s6016_s16 + $0xb0] sm:$0xff] }
 0x47f   : > { %v2498_v9 = vrot.slane %v2496_v3, 1  ;;  %v2840_v42 = vsel %vm1000_vm7, %v2838_v41, %v2839_v38 }
 0x480   : > { %v2368_v11 = vsel %vm877_vm3, %v2363_v63, %v2367_v6  ;;  %2389 = vst [vmem:[#allocation2 + $0x40] sm:$0x1] %v2367_v6  ;;  %3203 = vmatpush.bf16.msrb.mxu0 %v4760_v58  ;;  %v4771_v63 = vld [vmem:[%s6016_s16 + $0x78] sm:$0xff]  ;;  %v4777_v6 = vld [vmem:[%s6016_s16 + $0xa8] sm:$0xff] }
 0x481   : > { %v2499_v12 = vsel %vm911_vm8, %v2494_v8, %v2498_v9  ;;  %v2401_v13 = vpack.c.bf16 %v2368_v11, %v2364_v10  ;;  %v2438_v15 = vld [vmem:[#allocation2 + $0x48] sm:$0x1]  ;;  %v2510_v28 = vor.u32 %v2508_v26, %v2498_v9  ;;  %3133 = vmatpush.bf16.msra.mxu3 %v4771_v63  ;;  %v4776_v10 = vld [vmem:[%s6016_s16 + $0xa0] sm:$0xff] }
 0x482   : > { %2643 = vmatmul.bf16.vlgmr.msrb.gmra.mxu2 %v2499_v12  ;;  %v2442_v22 = vpack.c.bf16 %v2438_v15, %v2438_v15  ;;  %v2791_v47 = vld [vmem:[#allocation2 + $0x48] sm:$0x3]  ;;  %v4768_v11 = vld [vmem:[%s6016_s16 + $0x60] sm:$0xff] }
 0x483   : > { %2763 = vmatmul.bf16.gmra.mxu3 %v2401_v13  ;;  %v2484_v18 = vshll.u32 %v2401_v13, 16  ;;  %v2500_v32 = vshrl.u32 %v2401_v13, 16  ;;  %v2836_v44 = vrot.slane %v2401_v13, 1  ;;  %v2795_v48 = vpack.c.bf16 %v2791_v47, %v2791_v47  ;;  %v4769_v8 = vld [vmem:[%s6016_s16 + $0x68] sm:$0xff] }
 0x484   : > { %v2512_v4 = vshll.u32 %v2442_v22, 16  ;;  %3204 = vmatpush.bf16.msrb.mxu0 %v4759_v59  ;;  %v4766_v22 = vld [vmem:[%s6016_s16 + $0x50] sm:$0xff] }
 0x485   : > { %v2486_v21 = vrot.slane %v2484_v18, 1  ;;  %v2837_v45 = vsel %vm1000_vm7, %v2835_v46, %v2836_v44  ;;  %v2843_v50 = vrot.slane %v2795_v48, 1  ;;  %3134 = vmatpush.bf16.msra.mxu3 %v4770_v2 }
 0x486   : > { %v2514_v27 = vrot.slane %v2512_v4, 1 }
 0x487   : > { %v2487_v23 = vsel %vm911_vm8, %v2482_v20, %v2486_v21  ;;  %v2437_v19 = vld [vmem:[#allocation2 + $0x40] sm:$0x1]  ;;  %v2502_v34 = vor.u32 %v2500_v32, %v2486_v21  ;;  %v2844_v29 = vsel %vm1000_vm7, %v2839_v38, %v2843_v50  ;;  %v4774_v20 = vld [vmem:[%s6016_s16 + $0x90] sm:$0xff]  ;;  %v4765_v32 = vld [vmem:[%s6016_s16 + $0x48] sm:$0xff] }
 0x488   : > { %2624 = vmatmul.bf16.vlgmr.msrb.gmra.mxu1 %v2487_v23  ;;  %v2441_v25 = vpack.c.bf16 %v2437_v19, %v2437_v19  ;;  %v2515_v31 = vsel %vm911_vm8, %v2510_v28, %v2514_v27  ;;  %v2790_v49 = vld [vmem:[#allocation2 + $0x40] sm:$0x3]  ;;  %3205 = vmatpush.bf16.msrb.mxu0 %v4758_v62  ;;  %v4773_v28 = vld [vmem:[%s6016_s16 + $0x88] sm:$0xff] }
 0x489   : > { %v2794_v51 = vpack.c.bf16 %v2790_v49, %v2790_v49  ;;  %3298 = vmatpush.bf16.msrb.mxu1 %v4779_v61  ;;  %3135 = vmatpush.bf16.msra.mxu3 %v4769_v8  ;;  %v4889_v27 = vld [vmem:[%s6015_s15] ss:$0 sm:$0xff] }
 0x48a   : > { %v2504_v24 = vshll.u32 %v2441_v25, 16 }
 0x48b   : > { %v2841_v52 = vrot.slane %v2794_v51, 1 }
 0x48c   : > { %v2506_v33 = vrot.slane %v2504_v24, 1  ;;  %3206 = vmatpush.bf16.msrb.mxu0 %v4757_v1 }
 0x48d   : > { %v2842_v53 = vsel %vm1000_vm7, %v2836_v44, %v2841_v52  ;;  %3299 = vmatpush.bf16.msrb.mxu1 %v4778_v0  ;;  %3136 = vmatpush.bf16.msra.mxu3 %v4768_v11 }
 0x48e   : > { %v2507_v35 = vsel %vm911_vm8, %v2502_v34, %v2506_v33 }
 0x490   : > { %3207 = vmatpush.bf16.msrb.mxu0 %v4756_v7 }
 0x491   : > { %3300 = vmatpush.bf16.msrb.mxu1 %v4777_v6  ;;  %3137 = vmatpush.bf16.msra.mxu3 %v4767_v17 }
 0x492   : > { %2648 = vmatmul.bf16.gmra.mxu2 %v2515_v31 }
 0x495   : > { %3301 = vmatpush.bf16.msrb.mxu1 %v4776_v10  ;;  %3138 = vmatpush.bf16.msra.mxu3 %v4766_v22 }
 0x498   : > { %2629 = vmatmul.bf16.gmra.mxu1 %v2507_v35  ;;  %v4772_v35 = vld [vmem:[%s6016_s16 + $0x80] sm:$0xff] }
 0x499   : > { %3302 = vmatpush.bf16.msrb.mxu1 %v4775_v16  ;;  %3139 = vmatpush.bf16.msra.mxu3 %v4765_v32 }
 0x49d   : > { %3303 = vmatpush.bf16.msrb.mxu1 %v4774_v20  ;;  %3140 = vmatpush.bf16.msra.mxu3 %v4764_v36 }
 0x4a1   : > { %3304 = vmatpush.bf16.msrb.mxu1 %v4773_v28 }
 0x4a2   : > { %2972 = vmatmul.bf16.vlgmr.msra.gmra.mxu2 %v2840_v42 }
 0x4a5   : > { %3305 = vmatpush.bf16.msrb.mxu1 %v4772_v35 }
 0x4a8   : > { %2953 = vmatmul.bf16.vlgmr.msra.gmra.mxu1 %v2837_v45 }
 0x4b2   : > { %2977 = vmatmul.bf16.gmra.mxu2 %v2844_v29 }
 0x4b8   : > { %2958 = vmatmul.bf16.gmra.mxu1 %v2842_v53 }
 0x4ea   : > { %v2778_v14 = vpop.f32.mrf.mxu0 }
 0x4f2   : > { %v2780_v24 = vpop.f32.mrf.mxu0 }
 0x4f6   : > { %v2759_v9 = vpop.f32.mrf.mxu3 }
 0x4fa   : > { %v2783_v45 = vpop.f32.mrf.mxu0 }
 0x4fe   : > { %v2761_v21 = vpop.f32.mrf.mxu3 }
 0x502   : > { %v2785_v61 = vpop.f32.mrf.mxu0 }
 0x505   : > { %v2625_v56 = vpop.f32.mrf.mxu1  ;;  %v2644_v57 = vpop.f32.mrf.mxu2 }
 0x506   : > { %v2645_v15 = vadd.f32 %v2644_v57, %v2625_v56  ;;  %v2764_v46 = vpop.f32.mrf.mxu3 }
 0x508   : > { %v2760_v18 = vadd.f32 %v2759_v9, %v2645_v15 }
 0x50a   : > { %v2779_v25 = vadd.f32 %v2778_v14, %v2760_v18 }
 0x50d   : > { %v2627_v60 = vpop.f32.mrf.mxu1  ;;  %v2646_v30 = vpop.f32.mrf.mxu2 }
 0x50e   : > { %v2647_v4 = vadd.f32 %v2646_v30, %v2627_v60  ;;  %v2766_v58 = vpop.f32.mrf.mxu3 }
 0x510   : > { %v2762_v33 = vadd.f32 %v2761_v21, %v2647_v4 }
 0x512   : > { %v2781_v43 = vadd.f32 %v2780_v24, %v2762_v33 }
 0x515   : > { %v2630_v3 = vpop.f32.mrf.mxu1  ;;  %v2649_v5 = vpop.f32.mrf.mxu2 }
 0x516   : > { %v2650_v41 = vadd.f32 %v2649_v5, %v2630_v3 }
 0x518   : > { %v2765_v48 = vadd.f32 %v2764_v46, %v2650_v41  ;;  %v3360_v41 = vld [vmem:[%s6018_s18] sm:$0xf] }
 0x519   : > { %v4890_v46 = vld [vmem:[%s6062_s22] ss:$0 sm:$0xff] }
 0x51a   : > { %v2784_v40 = vadd.f32 %v2783_v45, %v2765_v48 }
 0x51d   : > { %v2632_v12 = vpop.f32.mrf.mxu1  ;;  %v2651_v13 = vpop.f32.mrf.mxu2 }
 0x51e   : > { %v2652_v52 = vadd.f32 %v2651_v13, %v2632_v12 }
 0x520   : > { %v2767_v60 = vadd.f32 %v2766_v58, %v2652_v52  ;;  %v4595_v52 = vld [vmem:[%s6018_s18 + $0x8] sm:$0xf] }
 0x522   : > { %v2786_v2 = vadd.f32 %v2785_v61, %v2767_v60 }
 0x525   : > { %v2954_v23 = vpop.f32.mrf.mxu1  ;;  %v2973_v19 = vpop.f32.mrf.mxu2 }
 0x526   : > { %v2974_v26 = vadd.f32 %v2973_v19, %v2954_v23 }
 0x528   : > { %v2983_v31 = vadd.f32 %v2974_v26, %v2779_v25 }
 0x52a   : > { %v2991_v34 = vadd.f32 %v4889_v27, %v2983_v31 }
 0x52c   : > { %v2995_v37 = vmax.f32 %v2991_v34, 0.0 }
 0x52d   : > { %v2956_v38 = vpop.f32.mrf.mxu1  ;;  %v2975_v39 = vpop.f32.mrf.mxu2 }
 0x52e   : > { %v3003_v42 = vrot.slane %v2995_v37, 7  ;;  %v2976_v44 = vadd.f32 %v2975_v39, %v2956_v38 }
 0x530   : > { %3015 = vst [vmem:[#allocation2] sm:$0xfe] %v3003_v42  ;;  %v2984_v47 = vadd.f32 %v2976_v44, %v2781_v43  ;;  %v3421_v43 = vsel %vm1113_vm9, %v3360_v41, 0 }
 0x531   : > { %3430 = vmatpush.bf16.msrb.mxu3 %v3421_v43 }
 0x532   : > { %v2992_v49 = vadd.f32 %v4889_v27, %v2984_v47 }
 0x534   : > { %v2996_v50 = vmax.f32 %v2992_v49, 0.0 }
 0x535   : > { %v2959_v51 = vpop.f32.mrf.mxu1  ;;  %v2978_v29 = vpop.f32.mrf.mxu2 }
 0x536   : > { %v3004_v53 = vrot.slane %v2996_v50, 7  ;;  %v2979_v54 = vadd.f32 %v2978_v29, %v2959_v51  ;;  %v4590_v29 = vld [vmem:[%s6018_s18 + $0x4] sm:$0xf] }
 0x537   : > { %v3020_v55 = vld [vmem:[#allocation2] sm:$0xff] }
 0x538   : > { %v3005_v56 = vsel %vm877_vm3, %v3003_v42, %v3004_v53  ;;  %v2985_v57 = vadd.f32 %v2979_v54, %v2784_v40  ;;  %v3042_v5 = vld [vmem:[#allocation2] sm:$0xfe]  ;;  %v3463_v40 = vsel %vm1113_vm9, %v4595_v52, 0 }
 0x539   : > { %3016 = vst [vmem:[#allocation2 + $0x10] sm:$0xff] %v3005_v56  ;;  %v3024_v59 = vpack.c.bf16 %v3005_v56, %v3020_v55  ;;  %v3044_v8 = vpack.c.bf16 %v3005_v56, %v3042_v5  ;;  %v3219_v11 = vld [vmem:[#allocation2] sm:$0xfc]  ;;  %3472 = vmatpush.bf16.msra.mxu0 %v3463_v40 }
 0x53a   : > { %v2993_v30 = vadd.f32 %v4889_v27, %v2985_v57  ;;  %v3221_v14 = vpack.c.bf16 %v3005_v56, %v3219_v11  ;;  %v4598_v52 = vld [vmem:[%s6064_s1 + $0x4] sm:$0xf] }
 0x53b   : > { %3208 = vmatmul.bf16.vlgmr.msrb.gmra.mxu0 %v3024_v59  ;;  %v3066_v12 = vshll.u32 %v3044_v8, 16  ;;  %v3064_v21 = vshrl.u32 %v3044_v8, 16  ;;  %v3561_v40 = vsel %vm1113_vm9, %v4598_v52, 0 }
 0x53c   : > { %v2997_v62 = vmax.f32 %v2993_v30, 0.0  ;;  %v3243_v18 = vrot.slane %v3221_v14, 1  ;;  %3570 = vmatpush.bf16.msra.mxu1 %v3561_v40 }
 0x53d   : > { %v2961_v63 = vpop.f32.mrf.mxu1  ;;  %v2980_v0 = vpop.f32.mrf.mxu2  ;;  %v3068_v17 = vrot.slane %v3066_v12, 1 }
 0x53e   : > { %v3006_v1 = vrot.slane %v2997_v62, 7  ;;  %v2981_v3 = vadd.f32 %v2980_v0, %v2961_v63 }
 0x53f   : > { %v3069_v19 = vor.u32 %v3068_v17, %v3064_v21 }
 0x540   : > { %v3007_v6 = vsel %vm877_vm3, %v3004_v53, %v3006_v1  ;;  %v2986_v7 = vadd.f32 %v2981_v3, %v2786_v2  ;;  %v3394_v53 = vsel %vm1113_vm9, %v4590_v29, 0  ;;  %v4603_v29 = vld [vmem:[%s6064_s1 + $0x8] sm:$0xf] }
 0x541   : > { %3017 = vst [vmem:[#allocation2 + $0x20] sm:$0xff] %v3007_v6  ;;  %3403 = vmatpush.bf16.msrb.mxu2 %v3394_v53  ;;  %v3630_v53 = vsel %vm1113_vm9, %v4603_v29, 0 }
 0x542   : > { %v2994_v9 = vadd.f32 %v4889_v27, %v2986_v7 }
 0x544   : > { %v2998_v10 = vmax.f32 %v2994_v9, 0.0 }
 0x546   : > { %v3008_v13 = vrot.slane %v2998_v10, 7 }
 0x548   : > { %v3009_v15 = vsel %vm877_vm3, %v3006_v1, %v3008_v13  ;;  %3019 = vst [vmem:[#allocation2 + $0x40] sm:$0x1] %v3008_v13 }
 0x549   : > { %3018 = vst [vmem:[#allocation2 + $0x30] sm:$0xff] %v3009_v15  ;;  %v3025_v16 = vpack.c.bf16 %v3009_v15, %v3007_v6 }
 0x54b   : > { %3213 = vmatmul.bf16.gmra.mxu0 %v3025_v16  ;;  %v3244_v20 = vrot.slane %v3025_v16, 1  ;;  %v3071_v22 = vshll.u32 %v3025_v16, 16  ;;  %v3075_v33 = vshrl.u32 %v3025_v16, 16 }
 0x54d   : > { %v3245_v23 = vsel %vm1000_vm7, %v3243_v18, %v3244_v20  ;;  %v3073_v4 = vrot.slane %v3071_v22, 1 }
 0x54e   : > { %3306 = vmatmul.bf16.vlgmr.msrb.gmra.mxu1 %v3245_v23 }
 0x54f   : > { %v3074_v25 = vsel %vm911_vm8, %v3069_v19, %v3073_v4  ;;  %v3043_v26 = vld [vmem:[#allocation2 + $0x40] sm:$0x1]  ;;  %v3077_v36 = vor.u32 %v3075_v33, %v3073_v4 }
 0x550   : > { %3141 = vmatmul.bf16.vlgmr.msra.gmra.mxu3 %v3074_v25  ;;  %v3220_v27 = vld [vmem:[#allocation2 + $0x40] sm:$0x3]  ;;  %v3045_v28 = vpack.c.bf16 %v3043_v26, %v3043_v26 }
 0x551   : > { %v3222_v24 = vpack.c.bf16 %v3220_v27, %v3220_v27  ;;  %3639 = vmatpush.bf16.msra.mxu3 %v3630_v53 }
 0x552   : > { %v3079_v31 = vshll.u32 %v3045_v28, 16 }
 0x553   : > { %v3246_v32 = vrot.slane %v3222_v24, 1 }
 0x554   : > { %v3081_v34 = vrot.slane %v3079_v31, 1 }
 0x555   : > { %v3247_v35 = vsel %vm1000_vm7, %v3244_v20, %v3246_v32 }
 0x556   : > { %v3082_v37 = vsel %vm911_vm8, %v3077_v36, %v3081_v34 }
 0x55e   : > { %3311 = vmatmul.bf16.gmra.mxu1 %v3247_v35 }
 0x560   : > { %3146 = vmatmul.bf16.gmra.mxu3 %v3082_v37 }
 0x5b8   : > { %v3209_v38 = vpop.f32.mrf.mxu0 }
 0x5c0   : > { %v3211_v45 = vpop.f32.mrf.mxu0 }
 0x5c8   : > { %v3214_v57 = vpop.f32.mrf.mxu0 }
 0x5cb   : > { %v3307_v39 = vpop.f32.mrf.mxu1 }
 0x5d0   : > { %v3216_v1 = vpop.f32.mrf.mxu0 }
 0x5d3   : > { %v3142_v42 = vpop.f32.mrf.mxu3  ;;  %v3309_v49 = vpop.f32.mrf.mxu1 }
 0x5d4   : > { %v3210_v44 = vadd.f32 %v3209_v38, %v3142_v42 }
 0x5d6   : > { %v3317_v47 = vadd.f32 %v3307_v39, %v3210_v44 }
 0x5d8   : > { %v3325_v48 = vadd.f32 %v4890_v46, %v3317_v47 }
 0x5da   : > { %4901 = vtanh.f32 %v3325_v48  ;;  %v3527_v48 = vld [vmem:[%s6063_s25] sm:$0xf] }
 0x5db   : > { %v3144_v50 = vpop.f32.mrf.mxu3  ;;  %v3312_v59 = vpop.f32.mrf.mxu1 }
 0x5dc   : > { %v3212_v51 = vadd.f32 %v3211_v45, %v3144_v50 }
 0x5de   : > { %v3318_v54 = vadd.f32 %v3309_v49, %v3212_v51  ;;  %v3588_v49 = vsel %vm1113_vm9, %v3527_v48, 0 }
 0x5df   : > { %3597 = vmatpush.bf16.msra.mxu2 %v3588_v49 }
 0x5e0   : > { %v4902_v55 = vpop.eup %4901  ;;  %v3326_v56 = vadd.f32 %v4890_v46, %v3318_v54 }
 0x5e1   : > { %v3337_v58 = vrot.slane %v4902_v55, 7 }
 0x5e2   : > { %4903 = vtanh.f32 %v3326_v56  ;;  %v4891_v56 = vld [vmem:[%s6065_s21] ss:$0 sm:$0xff] }
 0x5e3   : > { %3349 = vst.msk [vmem:[#allocation2] sm:$0xfe] %vm1066_vm10, %v3337_v58  ;;  %v3147_v60 = vpop.f32.mrf.mxu3  ;;  %v3314_v6 = vpop.f32.mrf.mxu1 }
 0x5e4   : > { %v3215_v30 = vadd.f32 %v3214_v57, %v3147_v60 }
 0x5e6   : > { %v3319_v61 = vadd.f32 %v3312_v59, %v3215_v30 }
 0x5e8   : > { %v4904_v62 = vpop.eup %4903  ;;  %v3327_v63 = vadd.f32 %v4890_v46, %v3319_v61 }
 0x5e9   : > { %v3338_v0 = vrot.slane %v4904_v62, 7 }
 0x5ea   : > { %4905 = vtanh.f32 %v3327_v63  ;;  %v3354_v12 = vld [vmem:[#allocation2] sm:$0xff] }
 0x5eb   : > { %v3339_v2 = vsel %vm877_vm3, %v3337_v58, %v3338_v0  ;;  %v3149_v3 = vpop.f32.mrf.mxu3  ;;  %v3361_v18 = vld [vmem:[#allocation2] sm:$0xfe] }
 0x5ec   : > { %3350 = vst.msk [vmem:[#allocation2 + $0x10] sm:$0xff] %vm1068_vm11, %v3339_v2  ;;  %v3217_v5 = vadd.f32 %v3216_v1, %v3149_v3  ;;  %v3442_v22 = vld [vmem:[#allocation2] sm:$0xfc] }
 0x5ee   : > { %v3320_v7 = vadd.f32 %v3314_v6, %v3217_v5 }
 0x5f0   : > { %v4906_v8 = vpop.eup %4905  ;;  %v3328_v9 = vadd.f32 %v4890_v46, %v3320_v7 }
 0x5f1   : > { %v3340_v10 = vrot.slane %v4906_v8, 7 }
 0x5f2   : > { %4907 = vtanh.f32 %v3328_v9 }
 0x5f3   : > { %v3341_v11 = vsel %vm877_vm3, %v3338_v0, %v3340_v10  ;;  %v3355_v13 = vld [vmem:[#allocation2 + $0x10] sm:$0xff] }
 0x5f4   : > { %3351 = vst.msk [vmem:[#allocation2 + $0x20] sm:$0xff] %vm1068_vm11, %v3341_v11  ;;  %v3358_v14 = vpack.c.bf16 %v3355_v13, %v3354_v12  ;;  %v3363_v20 = vpack.c.bf16 %v3355_v13, %v3361_v18  ;;  %v3444_v23 = vpack.c.bf16 %v3355_v13, %v3442_v22 }
 0x5f6   : > { %4593 = vmatmul.msk.bf16.vlgmr.msrb.gmra.mxu3 %vm1068_vm11, %v3358_v14  ;;  %v3370_v21 = vshll.u32 %v3363_v20, 16  ;;  %v3451_v27 = vrot.slane %v3444_v23, 1  ;;  %v3368_v24 = vshrl.u32 %v3363_v20, 16 }
 0x5f8   : > { %v4908_v15 = vpop.eup %4907  ;;  %v3372_v26 = vrot.slane %v3370_v21, 1 }
 0x5f9   : > { %v3342_v16 = vrot.slane %v4908_v15, 7 }
 0x5fa   : > { %v3373_v33 = vor.u32 %v3372_v26, %v3368_v24 }
 0x5fb   : > { %v3343_v17 = vsel %vm877_vm3, %v3340_v10, %v3342_v16  ;;  %3353 = vst.msk [vmem:[#allocation2 + $0x40] sm:$0x1] %vm1072_vm12, %v3342_v16  ;;  %v3356_v19 = vld [vmem:[#allocation2 + $0x20] sm:$0xff] }
 0x5fc   : > { %3352 = vst.msk [vmem:[#allocation2 + $0x30] sm:$0xff] %vm1068_vm11, %v3343_v17 }
 0x602   : > { %v3443_v36 = vld [vmem:[#allocation2 + $0x40] sm:$0x3] }
 0x603   : > { %v3357_v4 = vld [vmem:[#allocation2 + $0x30] sm:$0xff]  ;;  %v3362_v37 = vld [vmem:[#allocation2 + $0x40] sm:$0x1]  ;;  %v3445_v38 = vpack.c.bf16 %v3443_v36, %v3443_v36 }
 0x604   : > { %v3359_v25 = vpack.c.bf16 %v3357_v4, %v3356_v19  ;;  %v3364_v39 = vpack.c.bf16 %v3362_v37, %v3362_v37 }
 0x605   : > { %v3454_v41 = vrot.slane %v3445_v38, 1 }
 0x606   : > { %4594 = vmatmul.msk.bf16.gmra.mxu3 %vm1068_vm11, %v3359_v25  ;;  %v3452_v28 = vrot.slane %v3359_v25, 1  ;;  %v3375_v31 = vshll.u32 %v3359_v25, 16  ;;  %v3379_v42 = vshrl.u32 %v3359_v25, 16  ;;  %v3383_v43 = vshll.u32 %v3364_v39, 16 }
 0x608   : > { %v3453_v32 = vsel %vm1000_vm7, %v3451_v27, %v3452_v28  ;;  %v3377_v34 = vrot.slane %v3375_v31, 1  ;;  %v3455_v46 = vsel %vm1000_vm7, %v3452_v28, %v3454_v41  ;;  %v3385_v47 = vrot.slane %v3383_v43, 1 }
 0x609   : > { %4596 = vmatmul.msk.bf16.vlgmr.msra.gmra.mxu0 %vm1068_vm11, %v3453_v32 }
 0x60a   : > { %v3378_v35 = vsel %vm911_vm8, %v3373_v33, %v3377_v34  ;;  %v3381_v44 = vor.u32 %v3379_v42, %v3377_v34 }
 0x60b   : > { %4591 = vmatmul.msk.bf16.vlgmr.msrb.gmra.mxu2 %vm1068_vm11, %v3378_v35 }
 0x60c   : > { %v3386_v45 = vsel %vm911_vm8, %v3381_v44, %v3385_v47 }
 0x619   : > { %4597 = vmatmul.msk.bf16.gmra.mxu0 %vm1068_vm11, %v3455_v46 }
 0x61b   : > { %4592 = vmatmul.msk.bf16.gmra.mxu2 %vm1068_vm11, %v3386_v45 }
 0x679   : > { %v3432_v50 = vpop.f32.mrf.mxu3 }
 0x681   : > { %v3434_v58 = vpop.f32.mrf.mxu3 }
 0x686   : > { %v3474_v51 = vpop.f32.mrf.mxu0 }
 0x689   : > { %v3437_v2 = vpop.f32.mrf.mxu3 }
 0x68e   : > { %v3405_v54 = vpop.f32.mrf.mxu2  ;;  %v3476_v60 = vpop.f32.mrf.mxu0 }
 0x68f   : > { %v3433_v55 = vadd.f32 %v3432_v50, %v3405_v54 }
 0x691   : > { %v3484_v57 = vadd.f32 %v3474_v51, %v3433_v55  ;;  %v3439_v13 = vpop.f32.mrf.mxu3 }
 0x693   : > { %v3492_v59 = vadd.f32 %v4891_v56, %v3484_v57 }
 0x695   : > { %v3496_v30 = vmax.f32 %v3492_v59, 0.0 }
 0x696   : > { %v3407_v61 = vpop.f32.mrf.mxu2  ;;  %v3479_v5 = vpop.f32.mrf.mxu0 }
 0x697   : > { %v3504_v62 = vrot.slane %v3496_v30, 7  ;;  %v3435_v63 = vadd.f32 %v3434_v58, %v3407_v61  ;;  %v4892_v58 = vld [vmem:[%s6066_s4] ss:$0 sm:$0xff] }
 0x699   : > { %3516 = vst.msk [vmem:[#allocation2] sm:$0xfe] %vm1066_vm10, %v3504_v62  ;;  %v3485_v0 = vadd.f32 %v3476_v60, %v3435_v63 }
 0x69b   : > { %v3493_v1 = vadd.f32 %v4891_v56, %v3485_v0 }
 0x69d   : > { %v3497_v3 = vmax.f32 %v3493_v1, 0.0 }
 0x69e   : > { %v3410_v6 = vpop.f32.mrf.mxu2  ;;  %v3481_v17 = vpop.f32.mrf.mxu0 }
 0x69f   : > { %v3505_v7 = vrot.slane %v3497_v3, 7  ;;  %v3438_v8 = vadd.f32 %v3437_v2, %v3410_v6 }
 0x6a0   : > { %v3521_v21 = vld [vmem:[#allocation2] sm:$0xff] }
 0x6a1   : > { %v3506_v9 = vsel %vm877_vm3, %v3504_v62, %v3505_v7  ;;  %v3486_v10 = vadd.f32 %v3479_v5, %v3438_v8  ;;  %v3528_v27 = vld [vmem:[#allocation2] sm:$0xfe] }
 0x6a2   : > { %3517 = vst.msk [vmem:[#allocation2 + $0x10] sm:$0xff] %vm1068_vm11, %v3506_v9  ;;  %v3609_v31 = vld [vmem:[#allocation2] sm:$0xfc] }
 0x6a3   : > { %v3494_v11 = vadd.f32 %v4891_v56, %v3486_v10 }
 0x6a5   : > { %v3498_v12 = vmax.f32 %v3494_v11, 0.0 }
 0x6a6   : > { %v3412_v14 = vpop.f32.mrf.mxu2 }
 0x6a7   : > { %v3507_v15 = vrot.slane %v3498_v12, 7  ;;  %v3440_v16 = vadd.f32 %v3439_v13, %v3412_v14 }
 0x6a9   : > { %v3508_v18 = vsel %vm877_vm3, %v3505_v7, %v3507_v15  ;;  %v3487_v20 = vadd.f32 %v3481_v17, %v3440_v16  ;;  %v3522_v22 = vld [vmem:[#allocation2 + $0x10] sm:$0xff] }
 0x6aa   : > { %3518 = vst.msk [vmem:[#allocation2 + $0x20] sm:$0xff] %vm1068_vm11, %v3508_v18  ;;  %v3525_v23 = vpack.c.bf16 %v3522_v22, %v3521_v21  ;;  %v3530_v28 = vpack.c.bf16 %v3522_v22, %v3528_v27  ;;  %v3611_v32 = vpack.c.bf16 %v3522_v22, %v3609_v31 }
 0x6ab   : > { %v3495_v19 = vadd.f32 %v4891_v56, %v3487_v20 }
 0x6ac   : > { %4601 = vmatmul.msk.bf16.vlgmr.msra.gmra.mxu2 %vm1068_vm11, %v3525_v23  ;;  %v3537_v24 = vshll.u32 %v3530_v28, 16  ;;  %v3618_v37 = vrot.slane %v3611_v32, 1  ;;  %v3535_v39 = vshrl.u32 %v3530_v28, 16 }
 0x6ad   : > { %v3499_v4 = vmax.f32 %v3495_v19, 0.0 }
 0x6ae   : > { %v3539_v36 = vrot.slane %v3537_v24, 1 }
 0x6af   : > { %v3509_v25 = vrot.slane %v3499_v4, 7 }
 0x6b0   : > { %v3540_v43 = vor.u32 %v3539_v36, %v3535_v39 }
 0x6b1   : > { %v3510_v26 = vsel %vm877_vm3, %v3507_v15, %v3509_v25  ;;  %3520 = vst.msk [vmem:[#allocation2 + $0x40] sm:$0x1] %vm1072_vm12, %v3509_v25  ;;  %v3523_v33 = vld [vmem:[#allocation2 + $0x20] sm:$0xff] }
 0x6b2   : > { %3519 = vst.msk [vmem:[#allocation2 + $0x30] sm:$0xff] %vm1068_vm11, %v3510_v26 }
 0x6b8   : > { %v3610_v47 = vld [vmem:[#allocation2 + $0x40] sm:$0x3] }
 0x6b9   : > { %v3524_v34 = vld [vmem:[#allocation2 + $0x30] sm:$0xff]  ;;  %v3529_v45 = vld [vmem:[#allocation2 + $0x40] sm:$0x1]  ;;  %v3612_v48 = vpack.c.bf16 %v3610_v47, %v3610_v47 }
 0x6ba   : > { %v3526_v35 = vpack.c.bf16 %v3524_v34, %v3523_v33  ;;  %v3531_v49 = vpack.c.bf16 %v3529_v45, %v3529_v45 }
 0x6bb   : > { %v3621_v50 = vrot.slane %v3612_v48, 1 }
 0x6bc   : > { %4602 = vmatmul.msk.bf16.gmra.mxu2 %vm1068_vm11, %v3526_v35  ;;  %v3619_v38 = vrot.slane %v3526_v35, 1  ;;  %v3542_v41 = vshll.u32 %v3526_v35, 16  ;;  %v3546_v51 = vshrl.u32 %v3526_v35, 16  ;;  %v3550_v29 = vshll.u32 %v3531_v49, 16 }
 0x6be   : > { %v3620_v42 = vsel %vm1000_vm7, %v3618_v37, %v3619_v38  ;;  %v3544_v44 = vrot.slane %v3542_v41, 1  ;;  %v3622_v53 = vsel %vm1000_vm7, %v3619_v38, %v3621_v50  ;;  %v3552_v40 = vrot.slane %v3550_v29, 1 }
 0x6bf   : > { %4604 = vmatmul.msk.bf16.vlgmr.msra.gmra.mxu3 %vm1068_vm11, %v3620_v42 }
 0x6c0   : > { %v3545_v46 = vsel %vm911_vm8, %v3540_v43, %v3544_v44  ;;  %v3548_v52 = vor.u32 %v3546_v51, %v3544_v44 }
 0x6c1   : > { %4599 = vmatmul.msk.bf16.vlgmr.msra.gmra.mxu1 %vm1068_vm11, %v3545_v46 }
 0x6c2   : > { %v3553_v54 = vsel %vm911_vm8, %v3548_v52, %v3552_v40 }
 0x6cf   : > { %4605 = vmatmul.msk.bf16.gmra.mxu3 %vm1068_vm11, %v3622_v53 }
 0x6d1   : > { %4600 = vmatmul.msk.bf16.gmra.mxu1 %vm1068_vm11, %v3553_v54 }
 0x72f   : > { %v3599_v55 = vpop.f32.mrf.mxu2 }
 0x737   : > { %v3601_v30 = vpop.f32.mrf.mxu2 }
 0x73e   : > { %v3572_v56 = vpop.f32.mrf.mxu1 }
 0x73f   : > { %v3600_v57 = vadd.f32 %v3599_v55, %v3572_v56  ;;  %v3604_v3 = vpop.f32.mrf.mxu2 }
 0x742   : > { %v3641_v59 = vpop.f32.mrf.mxu3 }
 0x743   : > { %v3651_v60 = vadd.f32 %v3641_v59, %v3600_v57 }
 0x745   : > { %v3659_v61 = vadd.f32 %v4892_v58, %v3651_v60 }
 0x746   : > { %v3574_v62 = vpop.f32.mrf.mxu1 }
 0x747   : > { %3663 = vst.msk [vmem:[%s853_s5] sm:$0xff] %vm892_vm5, %v3659_v61  ;;  %v3602_v63 = vadd.f32 %v3601_v30, %v3574_v62  ;;  %v3606_v11 = vpop.f32.mrf.mxu2 }
 0x74a   : > { %v3643_v0 = vpop.f32.mrf.mxu3 }
 0x74b   : > { %v3652_v1 = vadd.f32 %v3643_v0, %v3602_v63 }
 0x74d   : > { %v3660_v2 = vadd.f32 %v4892_v58, %v3652_v1 }
 0x74e   : > { %v3577_v5 = vpop.f32.mrf.mxu1 }
 0x74f   : > { %3664 = vst.msk [vmem:[%s853_s5 + $0x8] sm:$0xff] %vm892_vm5, %v3660_v2  ;;  %v3605_v6 = vadd.f32 %v3604_v3, %v3577_v5 }
 0x752   : > { %v3646_v7 = vpop.f32.mrf.mxu3 }
 0x753   : > { %v3653_v8 = vadd.f32 %v3646_v7, %v3605_v6 }
 0x755   : > { %v3661_v9 = vadd.f32 %v4892_v58, %v3653_v8 }
 0x756   : > { %v3579_v10 = vpop.f32.mrf.mxu1 }
 0x757   : > { %3665 = vst.msk [vmem:[%s853_s5 + $0x10] sm:$0xff] %vm892_vm5, %v3661_v9  ;;  %v3607_v12 = vadd.f32 %v3606_v11, %v3579_v10 }
 0x75a   : > { %v3648_v13 = vpop.f32.mrf.mxu3 }
 0x75b   : > { %v3654_v14 = vadd.f32 %v3648_v13, %v3607_v12 }
 0x75d   : > { %v3662_v15 = vadd.f32 %v4892_v58, %v3654_v14 }
 0x75f   : > { %3666 = vst.msk [vmem:[%s853_s5 + $0x18] sm:$0xff] %vm892_vm5, %v3662_v15 }
 0x760 PF: > { %p37_p1 = scmp.ge.s32.totalorder %s5374_s26, 4   ;;  %s6068_s4 = smov %s5157_s30 }
 0x761   : > { %s6069_s30 = smov %s5161_s24  ;;  %s6070_s24 = smov %s5385_s3 }
 0x762   : > { %s6071_s25 = smov %s5374_s26  ;;  %39 = sbr.rel (!%p37_p1) target bundleno = 22 (0x16), region = 204 }
 0x767   :  { %3704 = vsyncpa [#allocation4], 1 }
 0x768   :  { %3706 = vsyncpa [#allocation4 + $0x1], 1 }
 0x769   :  { %3707 = vsyncpa [#allocation6], 1 }
 0x76a   :  { %3708 = vsyncpa [#allocation9], 1 }
 0x76b   :  { %3709 = vsyncpa [#allocation12], 1 }

</bundles_post_ra>
